<compile_context>
chip_gen: v7x
topology: tpu7x:2x2x1
jax: 0.10.0
libtpu: 0.0.40
codegen_flags: <defaults>
</compile_context>

<pallas_src>
import functools

import jax
import jax.numpy as jnp
from jax import lax
from jax.experimental import pallas as pl
from jax.experimental.pallas import tpu as pltpu


# ----------------------------------------------------------------------------
# Fused kernel
# ----------------------------------------------------------------------------

def _coat_kernel(x_ref, tall_ref, maskbb_ref, mavg_ref, maskff_ref, rsel_ref,
                 wf_ref, fb_ref,
                 chebw_ref, headw_ref, ha1_ref, ha2_ref, outw_ref, oa1_ref,
                 oa2_ref, timew_ref, timeb_ref, uu3_ref, be_ref, ve_ref,
                 resw_ref, resb_ref, lng_ref, lnb_ref, bfw_ref, bfb_ref,
                 out_ref, *,
                 B, N, K, nheads, nb_block, Ft, T, D, alpha, eps, cheb_scale):
    f32 = jnp.float32
    bf16 = jnp.bfloat16
    BN = B * N
    FtT = Ft * T

    def mxu(a, b):
        # bf16 MXU matmul with f32 accumulation.
        return jnp.dot(a.astype(bf16), b.astype(bf16), preferred_element_type=f32)

    def mmf(a, b):
        # f32 matmul (LayerNorm stats / attention-logit inputs).
        return jnp.dot(a, b, preferred_element_type=f32)

    def leaky(v):
        return jnp.where(v > 0, v, alpha * v)

    def elu(v):
        return jnp.where(v > 0, v, jnp.exp(jnp.minimum(v, 0.0)) - 1.0)

    def gat_attend(Wh, a1, a2row):
        # e[i,j] = LeakyReLU(Wh_i.a1 + Wh_j.a2); attention = softmax_rows(sigmoid(e))
        # restricted (via the block mask) to the per-batch diagonal blocks, i.e.
        # the batched torch softmax(dim=1) applied as one block-diagonal matmul.
        wh1 = mmf(Wh, a1)                                              # (BN, 1)
        wh2r = lax.dot_general(a2row, Wh, (((1,), (1,)), ((), ())),
                               preferred_element_type=f32)             # (1, BN)
        esig = jax.nn.sigmoid(leaky(wh1 + wh2r))                       # (BN, BN)
        num = jnp.exp(esig) * maskbb_ref[...]                          # zero off-batch
        den = jnp.sum(num, axis=0, keepdims=True)
        att = num * pl.reciprocal(den, approx=True)
        return mxu(att, Wh)                                            # (BN, Fout)

    xb = x_ref[...]                                 # (BN, Cin*T) f32, layout [c*T+t]
    zb = jnp.zeros((BN, FtT), f32)

    for blk in range(nb_block):
        # --- 1) ChebNet-II interpolation conv: one fused left matmul over all K,
        #        one fused right matmul over lane-concatenated K slices. --------
        y = mxu(tall_ref[...], xb)                                     # (K*BN, Cin*T)
        ycat = jnp.concatenate([y[k * BN:(k + 1) * BN, :] for k in range(K)],
                               axis=1)                                 # (BN, K*Cin*T)
        h_flat = jnp.maximum(cheb_scale * mxu(ycat, chebw_ref[blk]), 0.0)

        # --- 2) spatial transformer: merged-head GAT -> out-GAT -> ReLU --------
        whcat = mxu(h_flat, headw_ref[blk])                            # (BN, nheads*D)
        hps = []
        for hd in range(nheads):
            wh_h = whcat[:, hd * D:(hd + 1) * D]                       # (BN, D)
            hps.append(elu(gat_attend(wh_h, ha1_ref[blk, hd], ha2_ref[blk, hd])))
        hp_cat = jnp.concatenate(hps, axis=1)                          # (BN, FinA)
        wh_out = mxu(hp_cat, outw_ref[blk])                            # (BN, FinA)
        gcn = jnp.maximum(gat_attend(wh_out, oa1_ref[blk], oa2_ref[blk]), 0.0)

        # --- 3) 1x3 time conv along T as one banded matmul ----------------------
        tc = mxu(gcn, timew_ref[blk]) + timeb_ref[blk]                 # (BN, Ft*T)

        # --- 4) temporal attention: per-batch E (T,T), applied as one wide
        #        lane-concatenated block-diagonal right operator ---------------
        lr = mmf(tc, uu3_ref[blk])                                     # (BN, 2T)
        lhs_nt = lr[:, :T]
        rhs_nt = lr[:, T:2 * T]
        bigEs = []
        for b in range(B):
            lb = lhs_nt[b * N:(b + 1) * N, :]                          # (N, T)
            rb = rhs_nt[b * N:(b + 1) * N, :]
            prod = lax.dot_general(lb, rb, (((0,), (0,)), ((), ())),
                                   preferred_element_type=f32)         # (T, T)
            logits = mmf(ve_ref[blk], jax.nn.sigmoid(prod + be_ref[blk]))
            logits = logits - jnp.max(logits, axis=0, keepdims=True)
            ex = jnp.exp(logits)
            E = ex * pl.reciprocal(jnp.sum(ex, axis=0, keepdims=True), approx=True)
            # kron(I_F, E) without a 128-row MXU drain: lane-replicate with one
            # tiny matmul, sublane-replicate with a concat, mask on the VPU.
            erep = mmf(E, rsel_ref[...])                               # (T, Ft*T)
            bigE = jnp.concatenate([erep] * Ft, axis=0) * maskff_ref[...]
            bigEs.append(bigE.astype(bf16))                            # (Ft*T, Ft*T)
        tcn_all = mxu(tc, jnp.concatenate(bigEs, axis=1))              # (BN, B*Ft*T)
        tcn = jnp.concatenate(
            [tcn_all[b * N:(b + 1) * N, b * FtT:(b + 1) * FtT] for b in range(B)],
            axis=0)                                                    # (BN, Ft*T)

        # --- 5) residual 1x1 conv (flat) ----------------------------------------
        xres = mxu(xb, resw_ref[blk]) + resb_ref[blk]                  # (BN, Ft*T)

        # --- 6) LayerNorm(ReLU(xres + tcn)) over the channel axis (f32 stats) ---
        h = jnp.maximum(xres + tcn, 0.0)
        mu = mmf(h, mavg_ref[...])                                     # mean over Ft
        hc = h - mu
        var = mmf(hc * hc, mavg_ref[...])                              # E[(x-mu)^2]
        result = hc * lax.rsqrt(var + eps) * lng_ref[blk] + lnb_ref[blk]

        # --- 7) backcast / forecast 1x3 convs via one hstacked banded matmul ----
        bf = mxu(result, bfw_ref[blk]) + bfb_ref[blk]                  # (BN, 2*Ft*T)
        xb = xb - bf[:, :FtT]
        zb = zb + bf[:, FtT:2 * FtT]

    # --- final conv == dense (Ft*T) -> P projection; one lane-contiguous store --
    out_ref[...] = mxu(zb, wf_ref[...]) + fb_ref[...]


# ----------------------------------------------------------------------------
# Parameter preprocessing (tiny, parameter-only; done once in plain JAX)
# ----------------------------------------------------------------------------

def _band_from_conv3(w, T):
    """Conv2d weight (Cout, Cin, 1, 3) with padding (0,1) along T, expressed as
    a banded (Cin*T, Cout*T) matrix acting on [c*T+t]-flattened features."""
    w3 = w[:, :, 0, :]                                              # (Cout, Cin, 3)
    shift = jnp.stack([jnp.eye(T, k=1 - d, dtype=w.dtype) for d in range(3)], 0)
    band = jnp.einsum("ocd,dst->csot", w3, shift)                   # (Cin,T,Cout,T)
    Cin, Cout = w.shape[1], w.shape[0]
    return band.reshape(Cin * T, Cout * T)


def _precompute_block(p, T):
    """Turn raw COAT_block parameters into flat/banded/stacked matrices."""
    eyeT = jnp.eye(T, dtype=jnp.float32)

    gamma = p["gamma"]                                              # (K, Cin, Fc)
    K = gamma.shape[0]
    lhs = jnp.einsum("jio,jk->kio", gamma, p["cheb_xj"])            # (K, Cin, Fc)
    chebW = jnp.concatenate([jnp.kron(lhs[k], eyeT) for k in range(K)], axis=0)

    D = p["att_W0"].shape[1]
    headW = jnp.concatenate([p["att_W0"], p["att_W1"]], axis=1)     # (FinA, 2D)
    ha1 = jnp.stack([p["att_a0"][:D], p["att_a1"][:D]], 0)          # (2, D, 1)
    ha2 = jnp.stack([p["att_a0"][D:].T, p["att_a1"][D:].T], 0)      # (2, 1, D)

    outW = p["out_W"]                                               # (FinA, FinA)
    FinA = outW.shape[0]
    oa1 = p["out_a"][:FinA]                                         # (FinA, 1)
    oa2 = p["out_a"][FinA:].T                                       # (1, FinA)

    Ft = p["time_w"].shape[0]
    timeW = _band_from_conv3(p["time_w"], T)                        # (Fc*T, Ft*T)
    timeB = jnp.repeat(p["time_b"], T).reshape(1, Ft * T)

    u = p["U1"] @ p["U2"]                                           # (Ft,)
    umat = jnp.kron(u.reshape(Ft, 1), eyeT)                         # (Ft*T, T)
    u3mat = jnp.kron(p["U3"].reshape(Ft, 1), eyeT)
    uu3 = jnp.concatenate([umat, u3mat], axis=1)                    # (Ft*T, 2T)

    resW = jnp.kron(p["res_w"][:, :, 0, 0].T, eyeT)                 # (Cin*T, Ft*T)
    resB = jnp.repeat(p["res_b"], T).reshape(1, Ft * T)
    lng = jnp.repeat(p["ln_g"], T).reshape(1, Ft * T)
    lnb = jnp.repeat(p["ln_b"], T).reshape(1, Ft * T)

    backW = _band_from_conv3(p["back_w"], T)
    backB = jnp.repeat(p["back_b"], T).reshape(1, Ft * T)
    foreW = _band_from_conv3(p["fore_w"], T)
    foreB = jnp.repeat(p["fore_b"], T).reshape(1, Ft * T)
    bfW = jnp.concatenate([backW, foreW], axis=1)                   # (Fc*T, 2*Ft*T)
    bfB = jnp.concatenate([backB, foreB], axis=1)                   # (1, 2*Ft*T)

    return dict(chebW=chebW, headW=headW, ha1=ha1, ha2=ha2, outW=outW,
                oa1=oa1, oa2=oa2, timeW=timeW, timeB=timeB, uu3=uu3,
                be=p["be"][0], ve=p["Ve"],
                resW=resW, resB=resB, lng=lng, lnb=lnb, bfW=bfW, bfB=bfB)


# ----------------------------------------------------------------------------
# Forward wrapper: a single fused pallas_call for the whole submodule
# ----------------------------------------------------------------------------

def coat_submodule_forward(x, cheb_polys, block_params, final_w, final_b, *,
                           K, nheads=2, alpha=0.1):
    B, N, Cin, T = x.shape
    nb_block = len(block_params)
    Ft = block_params[0]["time_w"].shape[0]
    Fc = block_params[0]["gamma"].shape[-1]
    assert Fc == Ft, "reference model requires nb_chev_filter == nb_time_filter"
    assert Cin == Ft, "reference model requires in_channels == nb_time_filter"
    BN = B * N
    FinA = Fc * T
    D = FinA // nheads

    pre_list = [_precompute_block(p, T) for p in block_params]
    pre = {k: jnp.stack([d[k] for d in pre_list], axis=0) for k in pre_list[0]}
    # Large matmul weights stored in bf16 (halves DMA + MXU input passes).
    for name in ("chebW", "headW", "outW", "timeW", "resW", "bfW"):
        pre[name] = pre[name].astype(jnp.bfloat16)

    eyeT = jnp.eye(T, dtype=jnp.float32)
    mavg = jnp.kron(jnp.ones((Ft, Ft), jnp.float32) / Ft, eyeT)     # LN channel mean
    maskff = jnp.kron(jnp.eye(Ft, dtype=jnp.float32),
                      jnp.ones((T, T), jnp.float32))                # feature block mask
    rsel = jnp.kron(jnp.ones((1, Ft), jnp.float32), eyeT)           # (T, Ft*T)
    maskbb = jnp.kron(jnp.eye(B, dtype=jnp.float32),
                      jnp.ones((N, N), jnp.float32))                # batch block mask

    # Fused Chebyshev left operator: vstack_k kron(I_B, Tk^T) -> (K*BN, BN)
    tall = jnp.concatenate(
        [jnp.kron(jnp.eye(B, dtype=jnp.float32), cheb_polys[k].T) for k in range(K)],
        axis=0)

    P = final_w.shape[0]
    Wf = jnp.transpose(final_w[:, :, 0, :], (2, 1, 0)).reshape(Ft * T, P)
    fbr = final_b.reshape(1, P)

    x_flat = x.reshape(BN, Cin * T)                                 # free reshape

    kernel = functools.partial(
        _coat_kernel, B=B, N=N, K=K, nheads=nheads, nb_block=nb_block,
        Ft=Ft, T=T, D=D, alpha=alpha, eps=1e-5, cheb_scale=2.0 / (K + 1))

    # Grid-less call: every operand is a full-array VMEM block, the whole
    # submodule runs in one kernel invocation (no per-step launch overhead,
    # no intermediate HBM traffic).  Working set ~1 MiB << VMEM.
    out = pl.pallas_call(
        kernel,
        out_shape=jax.ShapeDtypeStruct((BN, P), jnp.float32),
        compiler_params=pltpu.CompilerParams(vmem_limit_bytes=32 * 1024 * 1024),
    )(x_flat, tall, maskbb, mavg, maskff, rsel, Wf, fbr,
      pre["chebW"], pre["headW"], pre["ha1"], pre["ha2"], pre["outW"],
      pre["oa1"], pre["oa2"],
      pre["timeW"], pre["timeB"], pre["uu3"], pre["be"], pre["ve"],
      pre["resW"], pre["resB"], pre["lng"], pre["lnb"],
      pre["bfW"], pre["bfB"])
    return out.reshape(B, N, P)


# ----------------------------------------------------------------------------
# Deterministic parameter construction
# ----------------------------------------------------------------------------

def xavier(key, shape, gain=1.414):
    fan_in, fan_out = shape[0], shape[1]
    a = gain * (6.0 / (fan_in + fan_out)) ** 0.5
    return jax.random.uniform(key, shape, jnp.float32, -a, a)


def init_block_params(key, Cin, F_chev, F_time, T, K, xj):
    ks = jax.random.split(key, 20)
    Fin_att = F_chev * T
    D = Fin_att // 2
    nrm = lambda k, s: 0.1 * jax.random.normal(k, s, jnp.float32)
    return {
        "gamma": nrm(ks[0], (K, Cin, F_chev)),
        "cheb_xj": xj,
        "att_W0": xavier(ks[1], (Fin_att, D)),
        "att_a0": xavier(ks[2], (2 * D, 1)),
        "att_W1": xavier(ks[3], (Fin_att, D)),
        "att_a1": xavier(ks[4], (2 * D, 1)),
        "out_W": xavier(ks[5], (Fin_att, Fin_att)),
        "out_a": xavier(ks[6], (2 * Fin_att, 1)),
        "time_w": nrm(ks[7], (F_time, F_chev, 1, 3)),
        "time_b": nrm(ks[8], (F_time,)),
        "U1": nrm(ks[9], (F_time, F_time)),
        "U2": nrm(ks[10], (F_time,)),
        "U3": nrm(ks[11], (F_time,)),
        "be": nrm(ks[12], (1, T, T)),
        "Ve": nrm(ks[13], (T, T)),
        "res_w": nrm(ks[14], (F_time, Cin, 1, 1)),
        "res_b": nrm(ks[15], (F_time,)),
        "ln_g": jnp.ones((F_time,), jnp.float32),
        "ln_b": jnp.zeros((F_time,), jnp.float32),
        "back_w": nrm(ks[16], (F_time, F_chev, 1, 3)),
        "back_b": nrm(ks[17], (F_time,)),
        "fore_w": nrm(ks[18], (F_time, F_chev, 1, 3)),
        "fore_b": nrm(ks[19], (F_time,)),
    }


def make_cheb_polynomials(key, N, K):
    A = jax.random.uniform(key, (N, N), jnp.float32)
    A = (A + A.T) / (2.0 * N)                          # small symmetric matrix
    polys = [jnp.eye(N, dtype=jnp.float32), A]
    for _ in range(2, K):
        polys.append(2.0 * A @ polys[-1] - polys[-2])
    return jnp.stack(polys[:K], axis=0)                # (K, N, N)


def make_cheb_poly_xj(K):
    j = jnp.arange(K, dtype=jnp.float32)
    k = jnp.arange(K, dtype=jnp.float32)
    # T_k(x_j) with Chebyshev nodes x_j = cos(pi (j+0.5)/K)
    return jnp.cos(k[None, :] * jnp.pi * (j[:, None] + 0.5) / K)    # (K, K)


# ----------------------------------------------------------------------------
if __name__ == "__main__":
    key = jax.random.PRNGKey(0)
    B, N, T = 2, 8, 8
    K = 3
    # flat feature dim F*T = 128 -> lane-dense intermediates inside the kernel
    nb_chev_filter = nb_time_filter = F_in = 16
    nb_block = 2
    num_for_predict = 4
    time_strides = 1   # stride 1 keeps T fixed (required by the residual in the ref model)

    k_x, k_cheb, k_b0, k_b1, k_fw, k_fb = jax.random.split(key, 6)
    x = jax.random.normal(k_x, (B, N, F_in, T), jnp.float32)
    cheb_polys = make_cheb_polynomials(k_cheb, N, K)                # (K, N, N)
    xj = make_cheb_poly_xj(K)                                       # (K, K)

    block_params = [
        init_block_params(k_b0, F_in, nb_chev_filter, nb_time_filter, T, K, xj),
        init_block_params(k_b1, nb_time_filter, nb_chev_filter, nb_time_filter, T, K, xj),
    ][:nb_block]

    final_w = 0.1 * jax.random.normal(
        k_fw, (num_for_predict, T // time_strides, 1, nb_time_filter), jnp.float32)
    final_b = 0.1 * jax.random.normal(k_fb, (num_for_predict,), jnp.float32)

    # TODO(synk): on v7x (2 TCs) a `grid=(batch_chunks,)` with
    # dimension_semantics=("parallel",) would use the second core; at this toy
    # size (B*N = 16 rows) the whole problem fits one core, so it stays grid-less.
    fwd = jax.jit(functools.partial(coat_submodule_forward, K=K))
    out = jax.block_until_ready(fwd(x, cheb_polys, block_params, final_w, final_b))

    assert out.shape == (B, N, num_for_predict), out.shape
    assert bool(jnp.all(jnp.isfinite(out)))
    print("KERNEL_OK")
</pallas_src>

<mosaic_0001>
module attributes {stable_mosaic.version = 11 : i64} {
  func.func @_coat_kernel(%arg0: memref<16x128xf32, #tpu.memory_space<vmem>>, %arg1: memref<48x16xf32, #tpu.memory_space<vmem>>, %arg2: memref<16x16xf32, #tpu.memory_space<vmem>>, %arg3: memref<128x128xf32, #tpu.memory_space<vmem>>, %arg4: memref<128x128xf32, #tpu.memory_space<vmem>>, %arg5: memref<8x128xf32, #tpu.memory_space<vmem>>, %arg6: memref<128x4xf32, #tpu.memory_space<vmem>>, %arg7: memref<1x4xf32, #tpu.memory_space<vmem>>, %arg8: memref<2x384x128xbf16, #tpu.memory_space<vmem>>, %arg9: memref<2x128x128xbf16, #tpu.memory_space<vmem>>, %arg10: memref<2x2x64x1xf32, #tpu.memory_space<vmem>>, %arg11: memref<2x2x1x64xf32, #tpu.memory_space<vmem>>, %arg12: memref<2x128x128xbf16, #tpu.memory_space<vmem>>, %arg13: memref<2x128x1xf32, #tpu.memory_space<vmem>>, %arg14: memref<2x1x128xf32, #tpu.memory_space<vmem>>, %arg15: memref<2x128x128xbf16, #tpu.memory_space<vmem>>, %arg16: memref<2x1x128xf32, #tpu.memory_space<vmem>>, %arg17: memref<2x128x16xf32, #tpu.memory_space<vmem>>, %arg18: memref<2x8x8xf32, #tpu.memory_space<vmem>>, %arg19: memref<2x8x8xf32, #tpu.memory_space<vmem>>, %arg20: memref<2x128x128xbf16, #tpu.memory_space<vmem>>, %arg21: memref<2x1x128xf32, #tpu.memory_space<vmem>>, %arg22: memref<2x1x128xf32, #tpu.memory_space<vmem>>, %arg23: memref<2x1x128xf32, #tpu.memory_space<vmem>>, %arg24: memref<2x128x256xbf16, #tpu.memory_space<vmem>>, %arg25: memref<2x1x256xf32, #tpu.memory_space<vmem>>, %arg26: memref<16x4xf32, #tpu.memory_space<vmem>>) attributes {dimension_semantics = [], scalar_prefetch = 0 : i64, scratch_operands = 0 : i64, tpu.core_type = #tpu.core_type<tc>} {
    %c0 = arith.constant 0 : index
    %c0_0 = arith.constant 0 : index
    %0 = vector.load %arg0[%c0, %c0_0] : memref<16x128xf32, #tpu.memory_space<vmem>>, vector<16x128xf32>
    %cst = arith.constant 0.000000e+00 : f32
    %1 = vector.broadcast %cst : f32 to vector<16x128xf32>
    %c0_1 = arith.constant 0 : index
    %c0_2 = arith.constant 0 : index
    %2 = vector.load %arg1[%c0_1, %c0_2] : memref<48x16xf32, #tpu.memory_space<vmem>>, vector<48x16xf32>
    %3 = arith.truncf %2 : vector<48x16xf32> to vector<48x16xbf16>
    %4 = arith.truncf %0 : vector<16x128xf32> to vector<16x128xbf16>
    %cst_3 = arith.constant dense<0.000000e+00> : vector<48x128xf32>
    %5 = tpu.matmul %3, %4, %cst_3 {dimension_numbers = #tpu.dot_dimension_numbers<[1], [0], [0], [1], [0, 0, 1, 1], [], []>} : vector<48x16xbf16>, vector<16x128xbf16>, vector<48x128xf32> -> vector<48x128xf32>
    %6 = vector.extract_strided_slice %5 {offsets = [0, 0], sizes = [16, 128], strides = [1, 1]} : vector<48x128xf32> to vector<16x128xf32>
    %7 = vector.extract_strided_slice %5 {offsets = [16, 0], sizes = [16, 128], strides = [1, 1]} : vector<48x128xf32> to vector<16x128xf32>
    %8 = vector.extract_strided_slice %5 {offsets = [32, 0], sizes = [16, 128], strides = [1, 1]} : vector<48x128xf32> to vector<16x128xf32>
    %9 = tpu.concatenate %6, %7, %8 in 1 : vector<16x128xf32>, vector<16x128xf32>, vector<16x128xf32> -> vector<16x384xf32>
    %c0_4 = arith.constant 0 : index
    %c0_5 = arith.constant 0 : index
    %c0_6 = arith.constant 0 : index
    %10 = vector.load %arg8[%c0_4, %c0_5, %c0_6] : memref<2x384x128xbf16, #tpu.memory_space<vmem>>, vector<1x384x128xbf16>
    %11 = vector.shape_cast %10 : vector<1x384x128xbf16> to vector<384x128xbf16>
    %12 = arith.truncf %9 : vector<16x384xf32> to vector<16x384xbf16>
    %cst_7 = arith.constant dense<0.000000e+00> : vector<16x128xf32>
    %13 = tpu.matmul %12, %11, %cst_7 {dimension_numbers = #tpu.dot_dimension_numbers<[1], [0], [0], [1], [0, 0, 1, 1], [], []>} : vector<16x384xbf16>, vector<384x128xbf16>, vector<16x128xf32> -> vector<16x128xf32>
    %cst_8 = arith.constant 5.000000e-01 : f32
    %14 = vector.broadcast %cst_8 : f32 to vector<16x128xf32>
    %15 = arith.mulf %14, %13 : vector<16x128xf32>
    %cst_9 = arith.constant 0.000000e+00 : f32
    %16 = vector.broadcast %cst_9 : f32 to vector<16x128xf32>
    %17 = arith.maximumf %15, %16 : vector<16x128xf32>
    %c0_10 = arith.constant 0 : index
    %c0_11 = arith.constant 0 : index
    %c0_12 = arith.constant 0 : index
    %18 = vector.load %arg9[%c0_10, %c0_11, %c0_12] : memref<2x128x128xbf16, #tpu.memory_space<vmem>>, vector<1x128x128xbf16>
    %19 = vector.shape_cast %18 : vector<1x128x128xbf16> to vector<128x128xbf16>
    %20 = arith.truncf %17 : vector<16x128xf32> to vector<16x128xbf16>
    %cst_13 = arith.constant dense<0.000000e+00> : vector<16x128xf32>
    %21 = tpu.matmul %20, %19, %cst_13 {dimension_numbers = #tpu.dot_dimension_numbers<[1], [0], [0], [1], [0, 0, 1, 1], [], []>} : vector<16x128xbf16>, vector<128x128xbf16>, vector<16x128xf32> -> vector<16x128xf32>
    %22 = vector.extract_strided_slice %21 {offsets = [0, 0], sizes = [16, 64], strides = [1, 1]} : vector<16x128xf32> to vector<16x64xf32>
    %c0_14 = arith.constant 0 : index
    %c0_15 = arith.constant 0 : index
    %c0_16 = arith.constant 0 : index
    %c0_17 = arith.constant 0 : index
    %23 = vector.load %arg10[%c0_14, %c0_15, %c0_16, %c0_17] : memref<2x2x64x1xf32, #tpu.memory_space<vmem>>, vector<1x1x64x1xf32>
    %24 = vector.shape_cast %23 : vector<1x1x64x1xf32> to vector<64x1xf32>
    %c0_18 = arith.constant 0 : index
    %c0_19 = arith.constant 0 : index
    %c0_20 = arith.constant 0 : index
    %c0_21 = arith.constant 0 : index
    %25 = vector.load %arg11[%c0_18, %c0_19, %c0_20, %c0_21] : memref<2x2x1x64xf32, #tpu.memory_space<vmem>>, vector<1x1x1x64xf32>
    %26 = vector.shape_cast %25 : vector<1x1x1x64xf32> to vector<1x64xf32>
    %cst_22 = arith.constant dense<0.000000e+00> : vector<16x1xf32>
    %27 = tpu.matmul %22, %24, %cst_22 {dimension_numbers = #tpu.dot_dimension_numbers<[1], [0], [0], [1], [0, 0, 1, 1], [], []>} : vector<16x64xf32>, vector<64x1xf32>, vector<16x1xf32> -> vector<16x1xf32>
    %cst_23 = arith.constant dense<0.000000e+00> : vector<1x16xf32>
    %28 = tpu.matmul %26, %22, %cst_23 {dimension_numbers = #tpu.dot_dimension_numbers<[1], [1], [0], [0], [0, 0, 1, 0], [], []>} : vector<1x64xf32>, vector<16x64xf32>, vector<1x16xf32> -> vector<1x16xf32>
    %29 = vector.broadcast %27 : vector<16x1xf32> to vector<16x16xf32>
    %30 = vector.broadcast %28 : vector<1x16xf32> to vector<16x16xf32>
    %31 = arith.addf %29, %30 : vector<16x16xf32>
    %cst_24 = arith.constant 0.000000e+00 : f32
    %32 = vector.broadcast %cst_24 : f32 to vector<16x16xf32>
    %33 = arith.cmpf ogt, %31, %32 : vector<16x16xf32>
    %cst_25 = arith.constant 1.000000e-01 : f32
    %34 = vector.broadcast %cst_25 : f32 to vector<16x16xf32>
    %35 = arith.mulf %34, %31 : vector<16x16xf32>
    %36 = arith.select %33, %31, %35 : vector<16x16xi1>, vector<16x16xf32>
    %37 = arith.negf %36 : vector<16x16xf32>
    %38 = math.exp %37 : vector<16x16xf32>
    %cst_26 = arith.constant 1.000000e+00 : f32
    %39 = vector.broadcast %cst_26 : f32 to vector<16x16xf32>
    %40 = arith.addf %39, %38 : vector<16x16xf32>
    %41 = arith.divf %39, %40 : vector<16x16xf32>
    %42 = math.exp %41 : vector<16x16xf32>
    %c0_27 = arith.constant 0 : index
    %c0_28 = arith.constant 0 : index
    %43 = vector.load %arg2[%c0_27, %c0_28] : memref<16x16xf32, #tpu.memory_space<vmem>>, vector<16x16xf32>
    %44 = arith.mulf %42, %43 : vector<16x16xf32>
    %cst_29 = arith.constant dense<0.000000e+00> : vector<16xf32>
    %45 = vector.multi_reduction <add>, %44, %cst_29 [0] : vector<16x16xf32> to vector<16xf32>
    %46 = vector.shape_cast %45 : vector<16xf32> to vector<1x16xf32>
    %47 = tpu.reciprocal %46 {approx = true} : vector<1x16xf32> -> vector<1x16xf32>
    %48 = vector.broadcast %47 : vector<1x16xf32> to vector<16x16xf32>
    %49 = arith.mulf %44, %48 : vector<16x16xf32>
    %50 = arith.truncf %49 : vector<16x16xf32> to vector<16x16xbf16>
    %51 = arith.truncf %22 : vector<16x64xf32> to vector<16x64xbf16>
    %cst_30 = arith.constant dense<0.000000e+00> : vector<16x64xf32>
    %52 = tpu.matmul %50, %51, %cst_30 {dimension_numbers = #tpu.dot_dimension_numbers<[1], [0], [0], [1], [0, 0, 1, 1], [], []>} : vector<16x16xbf16>, vector<16x64xbf16>, vector<16x64xf32> -> vector<16x64xf32>
    %cst_31 = arith.constant 0.000000e+00 : f32
    %53 = vector.broadcast %cst_31 : f32 to vector<16x64xf32>
    %54 = arith.cmpf ogt, %52, %53 : vector<16x64xf32>
    %cst_32 = arith.constant 0.000000e+00 : f32
    %55 = vector.broadcast %cst_32 : f32 to vector<16x64xf32>
    %56 = arith.minimumf %52, %55 : vector<16x64xf32>
    %57 = math.exp %56 : vector<16x64xf32>
    %cst_33 = arith.constant 1.000000e+00 : f32
    %58 = vector.broadcast %cst_33 : f32 to vector<16x64xf32>
    %59 = arith.subf %57, %58 : vector<16x64xf32>
    %60 = arith.select %54, %52, %59 : vector<16x64xi1>, vector<16x64xf32>
    %61 = vector.extract_strided_slice %21 {offsets = [0, 64], sizes = [16, 64], strides = [1, 1]} : vector<16x128xf32> to vector<16x64xf32>
    %c0_34 = arith.constant 0 : index
    %c1 = arith.constant 1 : index
    %c0_35 = arith.constant 0 : index
    %c0_36 = arith.constant 0 : index
    %62 = vector.load %arg10[%c0_34, %c1, %c0_35, %c0_36] : memref<2x2x64x1xf32, #tpu.memory_space<vmem>>, vector<1x1x64x1xf32>
    %63 = vector.shape_cast %62 : vector<1x1x64x1xf32> to vector<64x1xf32>
    %c0_37 = arith.constant 0 : index
    %c1_38 = arith.constant 1 : index
    %c0_39 = arith.constant 0 : index
    %c0_40 = arith.constant 0 : index
    %64 = vector.load %arg11[%c0_37, %c1_38, %c0_39, %c0_40] : memref<2x2x1x64xf32, #tpu.memory_space<vmem>>, vector<1x1x1x64xf32>
    %65 = vector.shape_cast %64 : vector<1x1x1x64xf32> to vector<1x64xf32>
    %cst_41 = arith.constant dense<0.000000e+00> : vector<16x1xf32>
    %66 = tpu.matmul %61, %63, %cst_41 {dimension_numbers = #tpu.dot_dimension_numbers<[1], [0], [0], [1], [0, 0, 1, 1], [], []>} : vector<16x64xf32>, vector<64x1xf32>, vector<16x1xf32> -> vector<16x1xf32>
    %cst_42 = arith.constant dense<0.000000e+00> : vector<1x16xf32>
    %67 = tpu.matmul %65, %61, %cst_42 {dimension_numbers = #tpu.dot_dimension_numbers<[1], [1], [0], [0], [0, 0, 1, 0], [], []>} : vector<1x64xf32>, vector<16x64xf32>, vector<1x16xf32> -> vector<1x16xf32>
    %68 = vector.broadcast %66 : vector<16x1xf32> to vector<16x16xf32>
    %69 = vector.broadcast %67 : vector<1x16xf32> to vector<16x16xf32>
    %70 = arith.addf %68, %69 : vector<16x16xf32>
    %cst_43 = arith.constant 0.000000e+00 : f32
    %71 = vector.broadcast %cst_43 : f32 to vector<16x16xf32>
    %72 = arith.cmpf ogt, %70, %71 : vector<16x16xf32>
    %cst_44 = arith.constant 1.000000e-01 : f32
    %73 = vector.broadcast %cst_44 : f32 to vector<16x16xf32>
    %74 = arith.mulf %73, %70 : vector<16x16xf32>
    %75 = arith.select %72, %70, %74 : vector<16x16xi1>, vector<16x16xf32>
    %76 = arith.negf %75 : vector<16x16xf32>
    %77 = math.exp %76 : vector<16x16xf32>
    %cst_45 = arith.constant 1.000000e+00 : f32
    %78 = vector.broadcast %cst_45 : f32 to vector<16x16xf32>
    %79 = arith.addf %78, %77 : vector<16x16xf32>
    %80 = arith.divf %78, %79 : vector<16x16xf32>
    %81 = math.exp %80 : vector<16x16xf32>
    %c0_46 = arith.constant 0 : index
    %c0_47 = arith.constant 0 : index
    %82 = vector.load %arg2[%c0_46, %c0_47] : memref<16x16xf32, #tpu.memory_space<vmem>>, vector<16x16xf32>
    %83 = arith.mulf %81, %82 : vector<16x16xf32>
    %cst_48 = arith.constant dense<0.000000e+00> : vector<16xf32>
    %84 = vector.multi_reduction <add>, %83, %cst_48 [0] : vector<16x16xf32> to vector<16xf32>
    %85 = vector.shape_cast %84 : vector<16xf32> to vector<1x16xf32>
    %86 = tpu.reciprocal %85 {approx = true} : vector<1x16xf32> -> vector<1x16xf32>
    %87 = vector.broadcast %86 : vector<1x16xf32> to vector<16x16xf32>
    %88 = arith.mulf %83, %87 : vector<16x16xf32>
    %89 = arith.truncf %88 : vector<16x16xf32> to vector<16x16xbf16>
    %90 = arith.truncf %61 : vector<16x64xf32> to vector<16x64xbf16>
    %cst_49 = arith.constant dense<0.000000e+00> : vector<16x64xf32>
    %91 = tpu.matmul %89, %90, %cst_49 {dimension_numbers = #tpu.dot_dimension_numbers<[1], [0], [0], [1], [0, 0, 1, 1], [], []>} : vector<16x16xbf16>, vector<16x64xbf16>, vector<16x64xf32> -> vector<16x64xf32>
    %cst_50 = arith.constant 0.000000e+00 : f32
    %92 = vector.broadcast %cst_50 : f32 to vector<16x64xf32>
    %93 = arith.cmpf ogt, %91, %92 : vector<16x64xf32>
    %cst_51 = arith.constant 0.000000e+00 : f32
    %94 = vector.broadcast %cst_51 : f32 to vector<16x64xf32>
    %95 = arith.minimumf %91, %94 : vector<16x64xf32>
    %96 = math.exp %95 : vector<16x64xf32>
    %cst_52 = arith.constant 1.000000e+00 : f32
    %97 = vector.broadcast %cst_52 : f32 to vector<16x64xf32>
    %98 = arith.subf %96, %97 : vector<16x64xf32>
    %99 = arith.select %93, %91, %98 : vector<16x64xi1>, vector<16x64xf32>
    %100 = tpu.concatenate %60, %99 in 1 : vector<16x64xf32>, vector<16x64xf32> -> vector<16x128xf32>
    %c0_53 = arith.constant 0 : index
    %c0_54 = arith.constant 0 : index
    %c0_55 = arith.constant 0 : index
    %101 = vector.load %arg12[%c0_53, %c0_54, %c0_55] : memref<2x128x128xbf16, #tpu.memory_space<vmem>>, vector<1x128x128xbf16>
    %102 = vector.shape_cast %101 : vector<1x128x128xbf16> to vector<128x128xbf16>
    %103 = arith.truncf %100 : vector<16x128xf32> to vector<16x128xbf16>
    %cst_56 = arith.constant dense<0.000000e+00> : vector<16x128xf32>
    %104 = tpu.matmul %103, %102, %cst_56 {dimension_numbers = #tpu.dot_dimension_numbers<[1], [0], [0], [1], [0, 0, 1, 1], [], []>} : vector<16x128xbf16>, vector<128x128xbf16>, vector<16x128xf32> -> vector<16x128xf32>
    %c0_57 = arith.constant 0 : index
    %c0_58 = arith.constant 0 : index
    %c0_59 = arith.constant 0 : index
    %105 = vector.load %arg13[%c0_57, %c0_58, %c0_59] : memref<2x128x1xf32, #tpu.memory_space<vmem>>, vector<1x128x1xf32>
    %106 = vector.shape_cast %105 : vector<1x128x1xf32> to vector<128x1xf32>
    %c0_60 = arith.constant 0 : index
    %c0_61 = arith.constant 0 : index
    %c0_62 = arith.constant 0 : index
    %107 = vector.load %arg14[%c0_60, %c0_61, %c0_62] : memref<2x1x128xf32, #tpu.memory_space<vmem>>, vector<1x1x128xf32>
    %108 = vector.shape_cast %107 : vector<1x1x128xf32> to vector<1x128xf32>
    %cst_63 = arith.constant dense<0.000000e+00> : vector<16x1xf32>
    %109 = tpu.matmul %104, %106, %cst_63 {dimension_numbers = #tpu.dot_dimension_numbers<[1], [0], [0], [1], [0, 0, 1, 1], [], []>} : vector<16x128xf32>, vector<128x1xf32>, vector<16x1xf32> -> vector<16x1xf32>
    %cst_64 = arith.constant dense<0.000000e+00> : vector<1x16xf32>
    %110 = tpu.matmul %108, %104, %cst_64 {dimension_numbers = #tpu.dot_dimension_numbers<[1], [1], [0], [0], [0, 0, 1, 0], [], []>} : vector<1x128xf32>, vector<16x128xf32>, vector<1x16xf32> -> vector<1x16xf32>
    %111 = vector.broadcast %109 : vector<16x1xf32> to vector<16x16xf32>
    %112 = vector.broadcast %110 : vector<1x16xf32> to vector<16x16xf32>
    %113 = arith.addf %111, %112 : vector<16x16xf32>
    %cst_65 = arith.constant 0.000000e+00 : f32
    %114 = vector.broadcast %cst_65 : f32 to vector<16x16xf32>
    %115 = arith.cmpf ogt, %113, %114 : vector<16x16xf32>
    %cst_66 = arith.constant 1.000000e-01 : f32
    %116 = vector.broadcast %cst_66 : f32 to vector<16x16xf32>
    %117 = arith.mulf %116, %113 : vector<16x16xf32>
    %118 = arith.select %115, %113, %117 : vector<16x16xi1>, vector<16x16xf32>
    %119 = arith.negf %118 : vector<16x16xf32>
    %120 = math.exp %119 : vector<16x16xf32>
    %cst_67 = arith.constant 1.000000e+00 : f32
    %121 = vector.broadcast %cst_67 : f32 to vector<16x16xf32>
    %122 = arith.addf %121, %120 : vector<16x16xf32>
    %123 = arith.divf %121, %122 : vector<16x16xf32>
    %124 = math.exp %123 : vector<16x16xf32>
    %c0_68 = arith.constant 0 : index
    %c0_69 = arith.constant 0 : index
    %125 = vector.load %arg2[%c0_68, %c0_69] : memref<16x16xf32, #tpu.memory_space<vmem>>, vector<16x16xf32>
    %126 = arith.mulf %124, %125 : vector<16x16xf32>
    %cst_70 = arith.constant dense<0.000000e+00> : vector<16xf32>
    %127 = vector.multi_reduction <add>, %126, %cst_70 [0] : vector<16x16xf32> to vector<16xf32>
    %128 = vector.shape_cast %127 : vector<16xf32> to vector<1x16xf32>
    %129 = tpu.reciprocal %128 {approx = true} : vector<1x16xf32> -> vector<1x16xf32>
    %130 = vector.broadcast %129 : vector<1x16xf32> to vector<16x16xf32>
    %131 = arith.mulf %126, %130 : vector<16x16xf32>
    %132 = arith.truncf %131 : vector<16x16xf32> to vector<16x16xbf16>
    %133 = arith.truncf %104 : vector<16x128xf32> to vector<16x128xbf16>
    %cst_71 = arith.constant dense<0.000000e+00> : vector<16x128xf32>
    %134 = tpu.matmul %132, %133, %cst_71 {dimension_numbers = #tpu.dot_dimension_numbers<[1], [0], [0], [1], [0, 0, 1, 1], [], []>} : vector<16x16xbf16>, vector<16x128xbf16>, vector<16x128xf32> -> vector<16x128xf32>
    %cst_72 = arith.constant 0.000000e+00 : f32
    %135 = vector.broadcast %cst_72 : f32 to vector<16x128xf32>
    %136 = arith.maximumf %134, %135 : vector<16x128xf32>
    %c0_73 = arith.constant 0 : index
    %c0_74 = arith.constant 0 : index
    %c0_75 = arith.constant 0 : index
    %137 = vector.load %arg15[%c0_73, %c0_74, %c0_75] : memref<2x128x128xbf16, #tpu.memory_space<vmem>>, vector<1x128x128xbf16>
    %138 = vector.shape_cast %137 : vector<1x128x128xbf16> to vector<128x128xbf16>
    %139 = arith.truncf %136 : vector<16x128xf32> to vector<16x128xbf16>
    %cst_76 = arith.constant dense<0.000000e+00> : vector<16x128xf32>
    %140 = tpu.matmul %139, %138, %cst_76 {dimension_numbers = #tpu.dot_dimension_numbers<[1], [0], [0], [1], [0, 0, 1, 1], [], []>} : vector<16x128xbf16>, vector<128x128xbf16>, vector<16x128xf32> -> vector<16x128xf32>
    %c0_77 = arith.constant 0 : index
    %c0_78 = arith.constant 0 : index
    %c0_79 = arith.constant 0 : index
    %141 = vector.load %arg16[%c0_77, %c0_78, %c0_79] : memref<2x1x128xf32, #tpu.memory_space<vmem>>, vector<1x1x128xf32>
    %142 = vector.shape_cast %141 : vector<1x1x128xf32> to vector<1x128xf32>
    %143 = vector.broadcast %142 : vector<1x128xf32> to vector<16x128xf32>
    %144 = arith.addf %140, %143 : vector<16x128xf32>
    %c0_80 = arith.constant 0 : index
    %c0_81 = arith.constant 0 : index
    %c0_82 = arith.constant 0 : index
    %145 = vector.load %arg17[%c0_80, %c0_81, %c0_82] : memref<2x128x16xf32, #tpu.memory_space<vmem>>, vector<1x128x16xf32>
    %146 = vector.shape_cast %145 : vector<1x128x16xf32> to vector<128x16xf32>
    %cst_83 = arith.constant dense<0.000000e+00> : vector<16x16xf32>
    %147 = tpu.matmul %144, %146, %cst_83 {dimension_numbers = #tpu.dot_dimension_numbers<[1], [0], [0], [1], [0, 0, 1, 1], [], []>} : vector<16x128xf32>, vector<128x16xf32>, vector<16x16xf32> -> vector<16x16xf32>
    %148 = vector.extract_strided_slice %147 {offsets = [0, 0], sizes = [16, 8], strides = [1, 1]} : vector<16x16xf32> to vector<16x8xf32>
    %149 = vector.extract_strided_slice %147 {offsets = [0, 8], sizes = [16, 8], strides = [1, 1]} : vector<16x16xf32> to vector<16x8xf32>
    %150 = vector.extract_strided_slice %148 {offsets = [0, 0], sizes = [8, 8], strides = [1, 1]} : vector<16x8xf32> to vector<8x8xf32>
    %151 = vector.extract_strided_slice %149 {offsets = [0, 0], sizes = [8, 8], strides = [1, 1]} : vector<16x8xf32> to vector<8x8xf32>
    %cst_84 = arith.constant dense<0.000000e+00> : vector<8x8xf32>
    %152 = tpu.matmul %150, %151, %cst_84 {dimension_numbers = #tpu.dot_dimension_numbers<[0], [0], [1], [1], [0, 1, 1, 1], [], []>} : vector<8x8xf32>, vector<8x8xf32>, vector<8x8xf32> -> vector<8x8xf32>
    %c0_85 = arith.constant 0 : index
    %c0_86 = arith.constant 0 : index
    %c0_87 = arith.constant 0 : index
    %153 = vector.load %arg19[%c0_85, %c0_86, %c0_87] : memref<2x8x8xf32, #tpu.memory_space<vmem>>, vector<1x8x8xf32>
    %154 = vector.shape_cast %153 : vector<1x8x8xf32> to vector<8x8xf32>
    %c0_88 = arith.constant 0 : index
    %c0_89 = arith.constant 0 : index
    %c0_90 = arith.constant 0 : index
    %155 = vector.load %arg18[%c0_88, %c0_89, %c0_90] : memref<2x8x8xf32, #tpu.memory_space<vmem>>, vector<1x8x8xf32>
    %156 = vector.shape_cast %155 : vector<1x8x8xf32> to vector<8x8xf32>
    %157 = arith.addf %152, %156 : vector<8x8xf32>
    %158 = arith.negf %157 : vector<8x8xf32>
    %159 = math.exp %158 : vector<8x8xf32>
    %cst_91 = arith.constant 1.000000e+00 : f32
    %160 = vector.broadcast %cst_91 : f32 to vector<8x8xf32>
    %161 = arith.addf %160, %159 : vector<8x8xf32>
    %162 = arith.divf %160, %161 : vector<8x8xf32>
    %cst_92 = arith.constant dense<0.000000e+00> : vector<8x8xf32>
    %163 = tpu.matmul %154, %162, %cst_92 {dimension_numbers = #tpu.dot_dimension_numbers<[1], [0], [0], [1], [0, 0, 1, 1], [], []>} : vector<8x8xf32>, vector<8x8xf32>, vector<8x8xf32> -> vector<8x8xf32>
    %cst_93 = arith.constant dense<0xFF800000> : vector<8xf32>
    %164 = vector.multi_reduction <maximumf>, %163, %cst_93 [0] : vector<8x8xf32> to vector<8xf32>
    %165 = vector.shape_cast %164 : vector<8xf32> to vector<1x8xf32>
    %166 = vector.broadcast %165 : vector<1x8xf32> to vector<8x8xf32>
    %167 = arith.subf %163, %166 : vector<8x8xf32>
    %168 = math.exp %167 : vector<8x8xf32>
    %cst_94 = arith.constant dense<0.000000e+00> : vector<8xf32>
    %169 = vector.multi_reduction <add>, %168, %cst_94 [0] : vector<8x8xf32> to vector<8xf32>
    %170 = vector.shape_cast %169 : vector<8xf32> to vector<1x8xf32>
    %171 = tpu.reciprocal %170 {approx = true} : vector<1x8xf32> -> vector<1x8xf32>
    %172 = vector.broadcast %171 : vector<1x8xf32> to vector<8x8xf32>
    %173 = arith.mulf %168, %172 : vector<8x8xf32>
    %c0_95 = arith.constant 0 : index
    %c0_96 = arith.constant 0 : index
    %174 = vector.load %arg5[%c0_95, %c0_96] : memref<8x128xf32, #tpu.memory_space<vmem>>, vector<8x128xf32>
    %cst_97 = arith.constant dense<0.000000e+00> : vector<8x128xf32>
    %175 = tpu.matmul %173, %174, %cst_97 {dimension_numbers = #tpu.dot_dimension_numbers<[1], [0], [0], [1], [0, 0, 1, 1], [], []>} : vector<8x8xf32>, vector<8x128xf32>, vector<8x128xf32> -> vector<8x128xf32>
    %176 = tpu.concatenate %175, %175, %175, %175, %175, %175, %175, %175, %175, %175, %175, %175, %175, %175, %175, %175 in 0 : vector<8x128xf32>, vector<8x128xf32>, vector<8x128xf32>, vector<8x128xf32>, vector<8x128xf32>, vector<8x128xf32>, vector<8x128xf32>, vector<8x128xf32>, vector<8x128xf32>, vector<8x128xf32>, vector<8x128xf32>, vector<8x128xf32>, vector<8x128xf32>, vector<8x128xf32>, vector<8x128xf32>, vector<8x128xf32> -> vector<128x128xf32>
    %c0_98 = arith.constant 0 : index
    %c0_99 = arith.constant 0 : index
    %177 = vector.load %arg4[%c0_98, %c0_99] : memref<128x128xf32, #tpu.memory_space<vmem>>, vector<128x128xf32>
    %178 = arith.mulf %176, %177 : vector<128x128xf32>
    %179 = arith.truncf %178 : vector<128x128xf32> to vector<128x128xbf16>
    %180 = vector.extract_strided_slice %148 {offsets = [8, 0], sizes = [8, 8], strides = [1, 1]} : vector<16x8xf32> to vector<8x8xf32>
    %181 = vector.extract_strided_slice %149 {offsets = [8, 0], sizes = [8, 8], strides = [1, 1]} : vector<16x8xf32> to vector<8x8xf32>
    %cst_100 = arith.constant dense<0.000000e+00> : vector<8x8xf32>
    %182 = tpu.matmul %180, %181, %cst_100 {dimension_numbers = #tpu.dot_dimension_numbers<[0], [0], [1], [1], [0, 1, 1, 1], [], []>} : vector<8x8xf32>, vector<8x8xf32>, vector<8x8xf32> -> vector<8x8xf32>
    %c0_101 = arith.constant 0 : index
    %c0_102 = arith.constant 0 : index
    %c0_103 = arith.constant 0 : index
    %183 = vector.load %arg19[%c0_101, %c0_102, %c0_103] : memref<2x8x8xf32, #tpu.memory_space<vmem>>, vector<1x8x8xf32>
    %184 = vector.shape_cast %183 : vector<1x8x8xf32> to vector<8x8xf32>
    %c0_104 = arith.constant 0 : index
    %c0_105 = arith.constant 0 : index
    %c0_106 = arith.constant 0 : index
    %185 = vector.load %arg18[%c0_104, %c0_105, %c0_106] : memref<2x8x8xf32, #tpu.memory_space<vmem>>, vector<1x8x8xf32>
    %186 = vector.shape_cast %185 : vector<1x8x8xf32> to vector<8x8xf32>
    %187 = arith.addf %182, %186 : vector<8x8xf32>
    %188 = arith.negf %187 : vector<8x8xf32>
    %189 = math.exp %188 : vector<8x8xf32>
    %cst_107 = arith.constant 1.000000e+00 : f32
    %190 = vector.broadcast %cst_107 : f32 to vector<8x8xf32>
    %191 = arith.addf %190, %189 : vector<8x8xf32>
    %192 = arith.divf %190, %191 : vector<8x8xf32>
    %cst_108 = arith.constant dense<0.000000e+00> : vector<8x8xf32>
    %193 = tpu.matmul %184, %192, %cst_108 {dimension_numbers = #tpu.dot_dimension_numbers<[1], [0], [0], [1], [0, 0, 1, 1], [], []>} : vector<8x8xf32>, vector<8x8xf32>, vector<8x8xf32> -> vector<8x8xf32>
    %cst_109 = arith.constant dense<0xFF800000> : vector<8xf32>
    %194 = vector.multi_reduction <maximumf>, %193, %cst_109 [0] : vector<8x8xf32> to vector<8xf32>
    %195 = vector.shape_cast %194 : vector<8xf32> to vector<1x8xf32>
    %196 = vector.broadcast %195 : vector<1x8xf32> to vector<8x8xf32>
    %197 = arith.subf %193, %196 : vector<8x8xf32>
    %198 = math.exp %197 : vector<8x8xf32>
    %cst_110 = arith.constant dense<0.000000e+00> : vector<8xf32>
    %199 = vector.multi_reduction <add>, %198, %cst_110 [0] : vector<8x8xf32> to vector<8xf32>
    %200 = vector.shape_cast %199 : vector<8xf32> to vector<1x8xf32>
    %201 = tpu.reciprocal %200 {approx = true} : vector<1x8xf32> -> vector<1x8xf32>
    %202 = vector.broadcast %201 : vector<1x8xf32> to vector<8x8xf32>
    %203 = arith.mulf %198, %202 : vector<8x8xf32>
    %c0_111 = arith.constant 0 : index
    %c0_112 = arith.constant 0 : index
    %204 = vector.load %arg5[%c0_111, %c0_112] : memref<8x128xf32, #tpu.memory_space<vmem>>, vector<8x128xf32>
    %cst_113 = arith.constant dense<0.000000e+00> : vector<8x128xf32>
    %205 = tpu.matmul %203, %204, %cst_113 {dimension_numbers = #tpu.dot_dimension_numbers<[1], [0], [0], [1], [0, 0, 1, 1], [], []>} : vector<8x8xf32>, vector<8x128xf32>, vector<8x128xf32> -> vector<8x128xf32>
    %206 = tpu.concatenate %205, %205, %205, %205, %205, %205, %205, %205, %205, %205, %205, %205, %205, %205, %205, %205 in 0 : vector<8x128xf32>, vector<8x128xf32>, vector<8x128xf32>, vector<8x128xf32>, vector<8x128xf32>, vector<8x128xf32>, vector<8x128xf32>, vector<8x128xf32>, vector<8x128xf32>, vector<8x128xf32>, vector<8x128xf32>, vector<8x128xf32>, vector<8x128xf32>, vector<8x128xf32>, vector<8x128xf32>, vector<8x128xf32> -> vector<128x128xf32>
    %c0_114 = arith.constant 0 : index
    %c0_115 = arith.constant 0 : index
    %207 = vector.load %arg4[%c0_114, %c0_115] : memref<128x128xf32, #tpu.memory_space<vmem>>, vector<128x128xf32>
    %208 = arith.mulf %206, %207 : vector<128x128xf32>
    %209 = arith.truncf %208 : vector<128x128xf32> to vector<128x128xbf16>
    %210 = tpu.concatenate %179, %209 in 1 : vector<128x128xbf16>, vector<128x128xbf16> -> vector<128x256xbf16>
    %211 = arith.truncf %144 : vector<16x128xf32> to vector<16x128xbf16>
    %cst_116 = arith.constant dense<0.000000e+00> : vector<16x256xf32>
    %212 = tpu.matmul %211, %210, %cst_116 {dimension_numbers = #tpu.dot_dimension_numbers<[1], [0], [0], [1], [0, 0, 1, 1], [], []>} : vector<16x128xbf16>, vector<128x256xbf16>, vector<16x256xf32> -> vector<16x256xf32>
    %213 = vector.extract_strided_slice %212 {offsets = [0, 0], sizes = [8, 128], strides = [1, 1]} : vector<16x256xf32> to vector<8x128xf32>
    %214 = vector.extract_strided_slice %212 {offsets = [8, 128], sizes = [8, 128], strides = [1, 1]} : vector<16x256xf32> to vector<8x128xf32>
    %215 = tpu.concatenate %213, %214 in 0 : vector<8x128xf32>, vector<8x128xf32> -> vector<16x128xf32>
    %c0_117 = arith.constant 0 : index
    %c0_118 = arith.constant 0 : index
    %c0_119 = arith.constant 0 : index
    %216 = vector.load %arg20[%c0_117, %c0_118, %c0_119] : memref<2x128x128xbf16, #tpu.memory_space<vmem>>, vector<1x128x128xbf16>
    %217 = vector.shape_cast %216 : vector<1x128x128xbf16> to vector<128x128xbf16>
    %218 = arith.truncf %0 : vector<16x128xf32> to vector<16x128xbf16>
    %cst_120 = arith.constant dense<0.000000e+00> : vector<16x128xf32>
    %219 = tpu.matmul %218, %217, %cst_120 {dimension_numbers = #tpu.dot_dimension_numbers<[1], [0], [0], [1], [0, 0, 1, 1], [], []>} : vector<16x128xbf16>, vector<128x128xbf16>, vector<16x128xf32> -> vector<16x128xf32>
    %c0_121 = arith.constant 0 : index
    %c0_122 = arith.constant 0 : index
    %c0_123 = arith.constant 0 : index
    %220 = vector.load %arg21[%c0_121, %c0_122, %c0_123] : memref<2x1x128xf32, #tpu.memory_space<vmem>>, vector<1x1x128xf32>
    %221 = vector.shape_cast %220 : vector<1x1x128xf32> to vector<1x128xf32>
    %222 = vector.broadcast %221 : vector<1x128xf32> to vector<16x128xf32>
    %223 = arith.addf %219, %222 : vector<16x128xf32>
    %224 = arith.addf %223, %215 : vector<16x128xf32>
    %cst_124 = arith.constant 0.000000e+00 : f32
    %225 = vector.broadcast %cst_124 : f32 to vector<16x128xf32>
    %226 = arith.maximumf %224, %225 : vector<16x128xf32>
    %c0_125 = arith.constant 0 : index
    %c0_126 = arith.constant 0 : index
    %227 = vector.load %arg3[%c0_125, %c0_126] : memref<128x128xf32, #tpu.memory_space<vmem>>, vector<128x128xf32>
    %cst_127 = arith.constant dense<0.000000e+00> : vector<16x128xf32>
    %228 = tpu.matmul %226, %227, %cst_127 {dimension_numbers = #tpu.dot_dimension_numbers<[1], [0], [0], [1], [0, 0, 1, 1], [], []>} : vector<16x128xf32>, vector<128x128xf32>, vector<16x128xf32> -> vector<16x128xf32>
    %229 = arith.subf %226, %228 : vector<16x128xf32>
    %230 = arith.mulf %229, %229 : vector<16x128xf32>
    %c0_128 = arith.constant 0 : index
    %c0_129 = arith.constant 0 : index
    %231 = vector.load %arg3[%c0_128, %c0_129] : memref<128x128xf32, #tpu.memory_space<vmem>>, vector<128x128xf32>
    %cst_130 = arith.constant dense<0.000000e+00> : vector<16x128xf32>
    %232 = tpu.matmul %230, %231, %cst_130 {dimension_numbers = #tpu.dot_dimension_numbers<[1], [0], [0], [1], [0, 0, 1, 1], [], []>} : vector<16x128xf32>, vector<128x128xf32>, vector<16x128xf32> -> vector<16x128xf32>
    %cst_131 = arith.constant 9.99999974E-6 : f32
    %233 = vector.broadcast %cst_131 : f32 to vector<16x128xf32>
    %234 = arith.addf %232, %233 : vector<16x128xf32>
    %235 = math.rsqrt %234 : vector<16x128xf32>
    %236 = arith.mulf %229, %235 : vector<16x128xf32>
    %c0_132 = arith.constant 0 : index
    %c0_133 = arith.constant 0 : index
    %c0_134 = arith.constant 0 : index
    %237 = vector.load %arg22[%c0_132, %c0_133, %c0_134] : memref<2x1x128xf32, #tpu.memory_space<vmem>>, vector<1x1x128xf32>
    %238 = vector.shape_cast %237 : vector<1x1x128xf32> to vector<1x128xf32>
    %239 = vector.broadcast %238 : vector<1x128xf32> to vector<16x128xf32>
    %240 = arith.mulf %236, %239 : vector<16x128xf32>
    %c0_135 = arith.constant 0 : index
    %c0_136 = arith.constant 0 : index
    %c0_137 = arith.constant 0 : index
    %241 = vector.load %arg23[%c0_135, %c0_136, %c0_137] : memref<2x1x128xf32, #tpu.memory_space<vmem>>, vector<1x1x128xf32>
    %242 = vector.shape_cast %241 : vector<1x1x128xf32> to vector<1x128xf32>
    %243 = vector.broadcast %242 : vector<1x128xf32> to vector<16x128xf32>
    %244 = arith.addf %240, %243 : vector<16x128xf32>
    %c0_138 = arith.constant 0 : index
    %c0_139 = arith.constant 0 : index
    %c0_140 = arith.constant 0 : index
    %245 = vector.load %arg24[%c0_138, %c0_139, %c0_140] : memref<2x128x256xbf16, #tpu.memory_space<vmem>>, vector<1x128x256xbf16>
    %246 = vector.shape_cast %245 : vector<1x128x256xbf16> to vector<128x256xbf16>
    %247 = arith.truncf %244 : vector<16x128xf32> to vector<16x128xbf16>
    %cst_141 = arith.constant dense<0.000000e+00> : vector<16x256xf32>
    %248 = tpu.matmul %247, %246, %cst_141 {dimension_numbers = #tpu.dot_dimension_numbers<[1], [0], [0], [1], [0, 0, 1, 1], [], []>} : vector<16x128xbf16>, vector<128x256xbf16>, vector<16x256xf32> -> vector<16x256xf32>
    %c0_142 = arith.constant 0 : index
    %c0_143 = arith.constant 0 : index
    %c0_144 = arith.constant 0 : index
    %249 = vector.load %arg25[%c0_142, %c0_143, %c0_144] : memref<2x1x256xf32, #tpu.memory_space<vmem>>, vector<1x1x256xf32>
    %250 = vector.shape_cast %249 : vector<1x1x256xf32> to vector<1x256xf32>
    %251 = vector.broadcast %250 : vector<1x256xf32> to vector<16x256xf32>
    %252 = arith.addf %248, %251 : vector<16x256xf32>
    %253 = vector.extract_strided_slice %252 {offsets = [0, 0], sizes = [16, 128], strides = [1, 1]} : vector<16x256xf32> to vector<16x128xf32>
    %254 = arith.subf %0, %253 : vector<16x128xf32>
    %255 = vector.extract_strided_slice %252 {offsets = [0, 128], sizes = [16, 128], strides = [1, 1]} : vector<16x256xf32> to vector<16x128xf32>
    %256 = arith.addf %1, %255 : vector<16x128xf32>
    %c0_145 = arith.constant 0 : index
    %c0_146 = arith.constant 0 : index
    %257 = vector.load %arg1[%c0_145, %c0_146] : memref<48x16xf32, #tpu.memory_space<vmem>>, vector<48x16xf32>
    %258 = arith.truncf %257 : vector<48x16xf32> to vector<48x16xbf16>
    %259 = arith.truncf %254 : vector<16x128xf32> to vector<16x128xbf16>
    %cst_147 = arith.constant dense<0.000000e+00> : vector<48x128xf32>
    %260 = tpu.matmul %258, %259, %cst_147 {dimension_numbers = #tpu.dot_dimension_numbers<[1], [0], [0], [1], [0, 0, 1, 1], [], []>} : vector<48x16xbf16>, vector<16x128xbf16>, vector<48x128xf32> -> vector<48x128xf32>
    %261 = vector.extract_strided_slice %260 {offsets = [0, 0], sizes = [16, 128], strides = [1, 1]} : vector<48x128xf32> to vector<16x128xf32>
    %262 = vector.extract_strided_slice %260 {offsets = [16, 0], sizes = [16, 128], strides = [1, 1]} : vector<48x128xf32> to vector<16x128xf32>
    %263 = vector.extract_strided_slice %260 {offsets = [32, 0], sizes = [16, 128], strides = [1, 1]} : vector<48x128xf32> to vector<16x128xf32>
    %264 = tpu.concatenate %261, %262, %263 in 1 : vector<16x128xf32>, vector<16x128xf32>, vector<16x128xf32> -> vector<16x384xf32>
    %c1_148 = arith.constant 1 : index
    %c0_149 = arith.constant 0 : index
    %c0_150 = arith.constant 0 : index
    %265 = vector.load %arg8[%c1_148, %c0_149, %c0_150] : memref<2x384x128xbf16, #tpu.memory_space<vmem>>, vector<1x384x128xbf16>
    %266 = vector.shape_cast %265 : vector<1x384x128xbf16> to vector<384x128xbf16>
    %267 = arith.truncf %264 : vector<16x384xf32> to vector<16x384xbf16>
    %cst_151 = arith.constant dense<0.000000e+00> : vector<16x128xf32>
    %268 = tpu.matmul %267, %266, %cst_151 {dimension_numbers = #tpu.dot_dimension_numbers<[1], [0], [0], [1], [0, 0, 1, 1], [], []>} : vector<16x384xbf16>, vector<384x128xbf16>, vector<16x128xf32> -> vector<16x128xf32>
    %cst_152 = arith.constant 5.000000e-01 : f32
    %269 = vector.broadcast %cst_152 : f32 to vector<16x128xf32>
    %270 = arith.mulf %269, %268 : vector<16x128xf32>
    %cst_153 = arith.constant 0.000000e+00 : f32
    %271 = vector.broadcast %cst_153 : f32 to vector<16x128xf32>
    %272 = arith.maximumf %270, %271 : vector<16x128xf32>
    %c1_154 = arith.constant 1 : index
    %c0_155 = arith.constant 0 : index
    %c0_156 = arith.constant 0 : index
    %273 = vector.load %arg9[%c1_154, %c0_155, %c0_156] : memref<2x128x128xbf16, #tpu.memory_space<vmem>>, vector<1x128x128xbf16>
    %274 = vector.shape_cast %273 : vector<1x128x128xbf16> to vector<128x128xbf16>
    %275 = arith.truncf %272 : vector<16x128xf32> to vector<16x128xbf16>
    %cst_157 = arith.constant dense<0.000000e+00> : vector<16x128xf32>
    %276 = tpu.matmul %275, %274, %cst_157 {dimension_numbers = #tpu.dot_dimension_numbers<[1], [0], [0], [1], [0, 0, 1, 1], [], []>} : vector<16x128xbf16>, vector<128x128xbf16>, vector<16x128xf32> -> vector<16x128xf32>
    %277 = vector.extract_strided_slice %276 {offsets = [0, 0], sizes = [16, 64], strides = [1, 1]} : vector<16x128xf32> to vector<16x64xf32>
    %c1_158 = arith.constant 1 : index
    %c0_159 = arith.constant 0 : index
    %c0_160 = arith.constant 0 : index
    %c0_161 = arith.constant 0 : index
    %278 = vector.load %arg10[%c1_158, %c0_159, %c0_160, %c0_161] : memref<2x2x64x1xf32, #tpu.memory_space<vmem>>, vector<1x1x64x1xf32>
    %279 = vector.shape_cast %278 : vector<1x1x64x1xf32> to vector<64x1xf32>
    %c1_162 = arith.constant 1 : index
    %c0_163 = arith.constant 0 : index
    %c0_164 = arith.constant 0 : index
    %c0_165 = arith.constant 0 : index
    %280 = vector.load %arg11[%c1_162, %c0_163, %c0_164, %c0_165] : memref<2x2x1x64xf32, #tpu.memory_space<vmem>>, vector<1x1x1x64xf32>
    %281 = vector.shape_cast %280 : vector<1x1x1x64xf32> to vector<1x64xf32>
    %cst_166 = arith.constant dense<0.000000e+00> : vector<16x1xf32>
    %282 = tpu.matmul %277, %279, %cst_166 {dimension_numbers = #tpu.dot_dimension_numbers<[1], [0], [0], [1], [0, 0, 1, 1], [], []>} : vector<16x64xf32>, vector<64x1xf32>, vector<16x1xf32> -> vector<16x1xf32>
    %cst_167 = arith.constant dense<0.000000e+00> : vector<1x16xf32>
    %283 = tpu.matmul %281, %277, %cst_167 {dimension_numbers = #tpu.dot_dimension_numbers<[1], [1], [0], [0], [0, 0, 1, 0], [], []>} : vector<1x64xf32>, vector<16x64xf32>, vector<1x16xf32> -> vector<1x16xf32>
    %284 = vector.broadcast %282 : vector<16x1xf32> to vector<16x16xf32>
    %285 = vector.broadcast %283 : vector<1x16xf32> to vector<16x16xf32>
    %286 = arith.addf %284, %285 : vector<16x16xf32>
    %cst_168 = arith.constant 0.000000e+00 : f32
    %287 = vector.broadcast %cst_168 : f32 to vector<16x16xf32>
    %288 = arith.cmpf ogt, %286, %287 : vector<16x16xf32>
    %cst_169 = arith.constant 1.000000e-01 : f32
    %289 = vector.broadcast %cst_169 : f32 to vector<16x16xf32>
    %290 = arith.mulf %289, %286 : vector<16x16xf32>
    %291 = arith.select %288, %286, %290 : vector<16x16xi1>, vector<16x16xf32>
    %292 = arith.negf %291 : vector<16x16xf32>
    %293 = math.exp %292 : vector<16x16xf32>
    %cst_170 = arith.constant 1.000000e+00 : f32
    %294 = vector.broadcast %cst_170 : f32 to vector<16x16xf32>
    %295 = arith.addf %294, %293 : vector<16x16xf32>
    %296 = arith.divf %294, %295 : vector<16x16xf32>
    %297 = math.exp %296 : vector<16x16xf32>
    %c0_171 = arith.constant 0 : index
    %c0_172 = arith.constant 0 : index
    %298 = vector.load %arg2[%c0_171, %c0_172] : memref<16x16xf32, #tpu.memory_space<vmem>>, vector<16x16xf32>
    %299 = arith.mulf %297, %298 : vector<16x16xf32>
    %cst_173 = arith.constant dense<0.000000e+00> : vector<16xf32>
    %300 = vector.multi_reduction <add>, %299, %cst_173 [0] : vector<16x16xf32> to vector<16xf32>
    %301 = vector.shape_cast %300 : vector<16xf32> to vector<1x16xf32>
    %302 = tpu.reciprocal %301 {approx = true} : vector<1x16xf32> -> vector<1x16xf32>
    %303 = vector.broadcast %302 : vector<1x16xf32> to vector<16x16xf32>
    %304 = arith.mulf %299, %303 : vector<16x16xf32>
    %305 = arith.truncf %304 : vector<16x16xf32> to vector<16x16xbf16>
    %306 = arith.truncf %277 : vector<16x64xf32> to vector<16x64xbf16>
    %cst_174 = arith.constant dense<0.000000e+00> : vector<16x64xf32>
    %307 = tpu.matmul %305, %306, %cst_174 {dimension_numbers = #tpu.dot_dimension_numbers<[1], [0], [0], [1], [0, 0, 1, 1], [], []>} : vector<16x16xbf16>, vector<16x64xbf16>, vector<16x64xf32> -> vector<16x64xf32>
    %cst_175 = arith.constant 0.000000e+00 : f32
    %308 = vector.broadcast %cst_175 : f32 to vector<16x64xf32>
    %309 = arith.cmpf ogt, %307, %308 : vector<16x64xf32>
    %cst_176 = arith.constant 0.000000e+00 : f32
    %310 = vector.broadcast %cst_176 : f32 to vector<16x64xf32>
    %311 = arith.minimumf %307, %310 : vector<16x64xf32>
    %312 = math.exp %311 : vector<16x64xf32>
    %cst_177 = arith.constant 1.000000e+00 : f32
    %313 = vector.broadcast %cst_177 : f32 to vector<16x64xf32>
    %314 = arith.subf %312, %313 : vector<16x64xf32>
    %315 = arith.select %309, %307, %314 : vector<16x64xi1>, vector<16x64xf32>
    %316 = vector.extract_strided_slice %276 {offsets = [0, 64], sizes = [16, 64], strides = [1, 1]} : vector<16x128xf32> to vector<16x64xf32>
    %c1_178 = arith.constant 1 : index
    %c1_179 = arith.constant 1 : index
    %c0_180 = arith.constant 0 : index
    %c0_181 = arith.constant 0 : index
    %317 = vector.load %arg10[%c1_178, %c1_179, %c0_180, %c0_181] : memref<2x2x64x1xf32, #tpu.memory_space<vmem>>, vector<1x1x64x1xf32>
    %318 = vector.shape_cast %317 : vector<1x1x64x1xf32> to vector<64x1xf32>
    %c1_182 = arith.constant 1 : index
    %c1_183 = arith.constant 1 : index
    %c0_184 = arith.constant 0 : index
    %c0_185 = arith.constant 0 : index
    %319 = vector.load %arg11[%c1_182, %c1_183, %c0_184, %c0_185] : memref<2x2x1x64xf32, #tpu.memory_space<vmem>>, vector<1x1x1x64xf32>
    %320 = vector.shape_cast %319 : vector<1x1x1x64xf32> to vector<1x64xf32>
    %cst_186 = arith.constant dense<0.000000e+00> : vector<16x1xf32>
    %321 = tpu.matmul %316, %318, %cst_186 {dimension_numbers = #tpu.dot_dimension_numbers<[1], [0], [0], [1], [0, 0, 1, 1], [], []>} : vector<16x64xf32>, vector<64x1xf32>, vector<16x1xf32> -> vector<16x1xf32>
    %cst_187 = arith.constant dense<0.000000e+00> : vector<1x16xf32>
    %322 = tpu.matmul %320, %316, %cst_187 {dimension_numbers = #tpu.dot_dimension_numbers<[1], [1], [0], [0], [0, 0, 1, 0], [], []>} : vector<1x64xf32>, vector<16x64xf32>, vector<1x16xf32> -> vector<1x16xf32>
    %323 = vector.broadcast %321 : vector<16x1xf32> to vector<16x16xf32>
    %324 = vector.broadcast %322 : vector<1x16xf32> to vector<16x16xf32>
    %325 = arith.addf %323, %324 : vector<16x16xf32>
    %cst_188 = arith.constant 0.000000e+00 : f32
    %326 = vector.broadcast %cst_188 : f32 to vector<16x16xf32>
    %327 = arith.cmpf ogt, %325, %326 : vector<16x16xf32>
    %cst_189 = arith.constant 1.000000e-01 : f32
    %328 = vector.broadcast %cst_189 : f32 to vector<16x16xf32>
    %329 = arith.mulf %328, %325 : vector<16x16xf32>
    %330 = arith.select %327, %325, %329 : vector<16x16xi1>, vector<16x16xf32>
    %331 = arith.negf %330 : vector<16x16xf32>
    %332 = math.exp %331 : vector<16x16xf32>
    %cst_190 = arith.constant 1.000000e+00 : f32
    %333 = vector.broadcast %cst_190 : f32 to vector<16x16xf32>
    %334 = arith.addf %333, %332 : vector<16x16xf32>
    %335 = arith.divf %333, %334 : vector<16x16xf32>
    %336 = math.exp %335 : vector<16x16xf32>
    %c0_191 = arith.constant 0 : index
    %c0_192 = arith.constant 0 : index
    %337 = vector.load %arg2[%c0_191, %c0_192] : memref<16x16xf32, #tpu.memory_space<vmem>>, vector<16x16xf32>
    %338 = arith.mulf %336, %337 : vector<16x16xf32>
    %cst_193 = arith.constant dense<0.000000e+00> : vector<16xf32>
    %339 = vector.multi_reduction <add>, %338, %cst_193 [0] : vector<16x16xf32> to vector<16xf32>
    %340 = vector.shape_cast %339 : vector<16xf32> to vector<1x16xf32>
    %341 = tpu.reciprocal %340 {approx = true} : vector<1x16xf32> -> vector<1x16xf32>
    %342 = vector.broadcast %341 : vector<1x16xf32> to vector<16x16xf32>
    %343 = arith.mulf %338, %342 : vector<16x16xf32>
    %344 = arith.truncf %343 : vector<16x16xf32> to vector<16x16xbf16>
    %345 = arith.truncf %316 : vector<16x64xf32> to vector<16x64xbf16>
    %cst_194 = arith.constant dense<0.000000e+00> : vector<16x64xf32>
    %346 = tpu.matmul %344, %345, %cst_194 {dimension_numbers = #tpu.dot_dimension_numbers<[1], [0], [0], [1], [0, 0, 1, 1], [], []>} : vector<16x16xbf16>, vector<16x64xbf16>, vector<16x64xf32> -> vector<16x64xf32>
    %cst_195 = arith.constant 0.000000e+00 : f32
    %347 = vector.broadcast %cst_195 : f32 to vector<16x64xf32>
    %348 = arith.cmpf ogt, %346, %347 : vector<16x64xf32>
    %cst_196 = arith.constant 0.000000e+00 : f32
    %349 = vector.broadcast %cst_196 : f32 to vector<16x64xf32>
    %350 = arith.minimumf %346, %349 : vector<16x64xf32>
    %351 = math.exp %350 : vector<16x64xf32>
    %cst_197 = arith.constant 1.000000e+00 : f32
    %352 = vector.broadcast %cst_197 : f32 to vector<16x64xf32>
    %353 = arith.subf %351, %352 : vector<16x64xf32>
    %354 = arith.select %348, %346, %353 : vector<16x64xi1>, vector<16x64xf32>
    %355 = tpu.concatenate %315, %354 in 1 : vector<16x64xf32>, vector<16x64xf32> -> vector<16x128xf32>
    %c1_198 = arith.constant 1 : index
    %c0_199 = arith.constant 0 : index
    %c0_200 = arith.constant 0 : index
    %356 = vector.load %arg12[%c1_198, %c0_199, %c0_200] : memref<2x128x128xbf16, #tpu.memory_space<vmem>>, vector<1x128x128xbf16>
    %357 = vector.shape_cast %356 : vector<1x128x128xbf16> to vector<128x128xbf16>
    %358 = arith.truncf %355 : vector<16x128xf32> to vector<16x128xbf16>
    %cst_201 = arith.constant dense<0.000000e+00> : vector<16x128xf32>
    %359 = tpu.matmul %358, %357, %cst_201 {dimension_numbers = #tpu.dot_dimension_numbers<[1], [0], [0], [1], [0, 0, 1, 1], [], []>} : vector<16x128xbf16>, vector<128x128xbf16>, vector<16x128xf32> -> vector<16x128xf32>
    %c1_202 = arith.constant 1 : index
    %c0_203 = arith.constant 0 : index
    %c0_204 = arith.constant 0 : index
    %360 = vector.load %arg13[%c1_202, %c0_203, %c0_204] : memref<2x128x1xf32, #tpu.memory_space<vmem>>, vector<1x128x1xf32>
    %361 = vector.shape_cast %360 : vector<1x128x1xf32> to vector<128x1xf32>
    %c1_205 = arith.constant 1 : index
    %c0_206 = arith.constant 0 : index
    %c0_207 = arith.constant 0 : index
    %362 = vector.load %arg14[%c1_205, %c0_206, %c0_207] : memref<2x1x128xf32, #tpu.memory_space<vmem>>, vector<1x1x128xf32>
    %363 = vector.shape_cast %362 : vector<1x1x128xf32> to vector<1x128xf32>
    %cst_208 = arith.constant dense<0.000000e+00> : vector<16x1xf32>
    %364 = tpu.matmul %359, %361, %cst_208 {dimension_numbers = #tpu.dot_dimension_numbers<[1], [0], [0], [1], [0, 0, 1, 1], [], []>} : vector<16x128xf32>, vector<128x1xf32>, vector<16x1xf32> -> vector<16x1xf32>
    %cst_209 = arith.constant dense<0.000000e+00> : vector<1x16xf32>
    %365 = tpu.matmul %363, %359, %cst_209 {dimension_numbers = #tpu.dot_dimension_numbers<[1], [1], [0], [0], [0, 0, 1, 0], [], []>} : vector<1x128xf32>, vector<16x128xf32>, vector<1x16xf32> -> vector<1x16xf32>
    %366 = vector.broadcast %364 : vector<16x1xf32> to vector<16x16xf32>
    %367 = vector.broadcast %365 : vector<1x16xf32> to vector<16x16xf32>
    %368 = arith.addf %366, %367 : vector<16x16xf32>
    %cst_210 = arith.constant 0.000000e+00 : f32
    %369 = vector.broadcast %cst_210 : f32 to vector<16x16xf32>
    %370 = arith.cmpf ogt, %368, %369 : vector<16x16xf32>
    %cst_211 = arith.constant 1.000000e-01 : f32
    %371 = vector.broadcast %cst_211 : f32 to vector<16x16xf32>
    %372 = arith.mulf %371, %368 : vector<16x16xf32>
    %373 = arith.select %370, %368, %372 : vector<16x16xi1>, vector<16x16xf32>
    %374 = arith.negf %373 : vector<16x16xf32>
    %375 = math.exp %374 : vector<16x16xf32>
    %cst_212 = arith.constant 1.000000e+00 : f32
    %376 = vector.broadcast %cst_212 : f32 to vector<16x16xf32>
    %377 = arith.addf %376, %375 : vector<16x16xf32>
    %378 = arith.divf %376, %377 : vector<16x16xf32>
    %379 = math.exp %378 : vector<16x16xf32>
    %c0_213 = arith.constant 0 : index
    %c0_214 = arith.constant 0 : index
    %380 = vector.load %arg2[%c0_213, %c0_214] : memref<16x16xf32, #tpu.memory_space<vmem>>, vector<16x16xf32>
    %381 = arith.mulf %379, %380 : vector<16x16xf32>
    %cst_215 = arith.constant dense<0.000000e+00> : vector<16xf32>
    %382 = vector.multi_reduction <add>, %381, %cst_215 [0] : vector<16x16xf32> to vector<16xf32>
    %383 = vector.shape_cast %382 : vector<16xf32> to vector<1x16xf32>
    %384 = tpu.reciprocal %383 {approx = true} : vector<1x16xf32> -> vector<1x16xf32>
    %385 = vector.broadcast %384 : vector<1x16xf32> to vector<16x16xf32>
    %386 = arith.mulf %381, %385 : vector<16x16xf32>
    %387 = arith.truncf %386 : vector<16x16xf32> to vector<16x16xbf16>
    %388 = arith.truncf %359 : vector<16x128xf32> to vector<16x128xbf16>
    %cst_216 = arith.constant dense<0.000000e+00> : vector<16x128xf32>
    %389 = tpu.matmul %387, %388, %cst_216 {dimension_numbers = #tpu.dot_dimension_numbers<[1], [0], [0], [1], [0, 0, 1, 1], [], []>} : vector<16x16xbf16>, vector<16x128xbf16>, vector<16x128xf32> -> vector<16x128xf32>
    %cst_217 = arith.constant 0.000000e+00 : f32
    %390 = vector.broadcast %cst_217 : f32 to vector<16x128xf32>
    %391 = arith.maximumf %389, %390 : vector<16x128xf32>
    %c1_218 = arith.constant 1 : index
    %c0_219 = arith.constant 0 : index
    %c0_220 = arith.constant 0 : index
    %392 = vector.load %arg15[%c1_218, %c0_219, %c0_220] : memref<2x128x128xbf16, #tpu.memory_space<vmem>>, vector<1x128x128xbf16>
    %393 = vector.shape_cast %392 : vector<1x128x128xbf16> to vector<128x128xbf16>
    %394 = arith.truncf %391 : vector<16x128xf32> to vector<16x128xbf16>
    %cst_221 = arith.constant dense<0.000000e+00> : vector<16x128xf32>
    %395 = tpu.matmul %394, %393, %cst_221 {dimension_numbers = #tpu.dot_dimension_numbers<[1], [0], [0], [1], [0, 0, 1, 1], [], []>} : vector<16x128xbf16>, vector<128x128xbf16>, vector<16x128xf32> -> vector<16x128xf32>
    %c1_222 = arith.constant 1 : index
    %c0_223 = arith.constant 0 : index
    %c0_224 = arith.constant 0 : index
    %396 = vector.load %arg16[%c1_222, %c0_223, %c0_224] : memref<2x1x128xf32, #tpu.memory_space<vmem>>, vector<1x1x128xf32>
    %397 = vector.shape_cast %396 : vector<1x1x128xf32> to vector<1x128xf32>
    %398 = vector.broadcast %397 : vector<1x128xf32> to vector<16x128xf32>
    %399 = arith.addf %395, %398 : vector<16x128xf32>
    %c1_225 = arith.constant 1 : index
    %c0_226 = arith.constant 0 : index
    %c0_227 = arith.constant 0 : index
    %400 = vector.load %arg17[%c1_225, %c0_226, %c0_227] : memref<2x128x16xf32, #tpu.memory_space<vmem>>, vector<1x128x16xf32>
    %401 = vector.shape_cast %400 : vector<1x128x16xf32> to vector<128x16xf32>
    %cst_228 = arith.constant dense<0.000000e+00> : vector<16x16xf32>
    %402 = tpu.matmul %399, %401, %cst_228 {dimension_numbers = #tpu.dot_dimension_numbers<[1], [0], [0], [1], [0, 0, 1, 1], [], []>} : vector<16x128xf32>, vector<128x16xf32>, vector<16x16xf32> -> vector<16x16xf32>
    %403 = vector.extract_strided_slice %402 {offsets = [0, 0], sizes = [16, 8], strides = [1, 1]} : vector<16x16xf32> to vector<16x8xf32>
    %404 = vector.extract_strided_slice %402 {offsets = [0, 8], sizes = [16, 8], strides = [1, 1]} : vector<16x16xf32> to vector<16x8xf32>
    %405 = vector.extract_strided_slice %403 {offsets = [0, 0], sizes = [8, 8], strides = [1, 1]} : vector<16x8xf32> to vector<8x8xf32>
    %406 = vector.extract_strided_slice %404 {offsets = [0, 0], sizes = [8, 8], strides = [1, 1]} : vector<16x8xf32> to vector<8x8xf32>
    %cst_229 = arith.constant dense<0.000000e+00> : vector<8x8xf32>
    %407 = tpu.matmul %405, %406, %cst_229 {dimension_numbers = #tpu.dot_dimension_numbers<[0], [0], [1], [1], [0, 1, 1, 1], [], []>} : vector<8x8xf32>, vector<8x8xf32>, vector<8x8xf32> -> vector<8x8xf32>
    %c1_230 = arith.constant 1 : index
    %c0_231 = arith.constant 0 : index
    %c0_232 = arith.constant 0 : index
    %408 = vector.load %arg19[%c1_230, %c0_231, %c0_232] : memref<2x8x8xf32, #tpu.memory_space<vmem>>, vector<1x8x8xf32>
    %409 = vector.shape_cast %408 : vector<1x8x8xf32> to vector<8x8xf32>
    %c1_233 = arith.constant 1 : index
    %c0_234 = arith.constant 0 : index
    %c0_235 = arith.constant 0 : index
    %410 = vector.load %arg18[%c1_233, %c0_234, %c0_235] : memref<2x8x8xf32, #tpu.memory_space<vmem>>, vector<1x8x8xf32>
    %411 = vector.shape_cast %410 : vector<1x8x8xf32> to vector<8x8xf32>
    %412 = arith.addf %407, %411 : vector<8x8xf32>
    %413 = arith.negf %412 : vector<8x8xf32>
    %414 = math.exp %413 : vector<8x8xf32>
    %cst_236 = arith.constant 1.000000e+00 : f32
    %415 = vector.broadcast %cst_236 : f32 to vector<8x8xf32>
    %416 = arith.addf %415, %414 : vector<8x8xf32>
    %417 = arith.divf %415, %416 : vector<8x8xf32>
    %cst_237 = arith.constant dense<0.000000e+00> : vector<8x8xf32>
    %418 = tpu.matmul %409, %417, %cst_237 {dimension_numbers = #tpu.dot_dimension_numbers<[1], [0], [0], [1], [0, 0, 1, 1], [], []>} : vector<8x8xf32>, vector<8x8xf32>, vector<8x8xf32> -> vector<8x8xf32>
    %cst_238 = arith.constant dense<0xFF800000> : vector<8xf32>
    %419 = vector.multi_reduction <maximumf>, %418, %cst_238 [0] : vector<8x8xf32> to vector<8xf32>
    %420 = vector.shape_cast %419 : vector<8xf32> to vector<1x8xf32>
    %421 = vector.broadcast %420 : vector<1x8xf32> to vector<8x8xf32>
    %422 = arith.subf %418, %421 : vector<8x8xf32>
    %423 = math.exp %422 : vector<8x8xf32>
    %cst_239 = arith.constant dense<0.000000e+00> : vector<8xf32>
    %424 = vector.multi_reduction <add>, %423, %cst_239 [0] : vector<8x8xf32> to vector<8xf32>
    %425 = vector.shape_cast %424 : vector<8xf32> to vector<1x8xf32>
    %426 = tpu.reciprocal %425 {approx = true} : vector<1x8xf32> -> vector<1x8xf32>
    %427 = vector.broadcast %426 : vector<1x8xf32> to vector<8x8xf32>
    %428 = arith.mulf %423, %427 : vector<8x8xf32>
    %c0_240 = arith.constant 0 : index
    %c0_241 = arith.constant 0 : index
    %429 = vector.load %arg5[%c0_240, %c0_241] : memref<8x128xf32, #tpu.memory_space<vmem>>, vector<8x128xf32>
    %cst_242 = arith.constant dense<0.000000e+00> : vector<8x128xf32>
    %430 = tpu.matmul %428, %429, %cst_242 {dimension_numbers = #tpu.dot_dimension_numbers<[1], [0], [0], [1], [0, 0, 1, 1], [], []>} : vector<8x8xf32>, vector<8x128xf32>, vector<8x128xf32> -> vector<8x128xf32>
    %431 = tpu.concatenate %430, %430, %430, %430, %430, %430, %430, %430, %430, %430, %430, %430, %430, %430, %430, %430 in 0 : vector<8x128xf32>, vector<8x128xf32>, vector<8x128xf32>, vector<8x128xf32>, vector<8x128xf32>, vector<8x128xf32>, vector<8x128xf32>, vector<8x128xf32>, vector<8x128xf32>, vector<8x128xf32>, vector<8x128xf32>, vector<8x128xf32>, vector<8x128xf32>, vector<8x128xf32>, vector<8x128xf32>, vector<8x128xf32> -> vector<128x128xf32>
    %c0_243 = arith.constant 0 : index
    %c0_244 = arith.constant 0 : index
    %432 = vector.load %arg4[%c0_243, %c0_244] : memref<128x128xf32, #tpu.memory_space<vmem>>, vector<128x128xf32>
    %433 = arith.mulf %431, %432 : vector<128x128xf32>
    %434 = arith.truncf %433 : vector<128x128xf32> to vector<128x128xbf16>
    %435 = vector.extract_strided_slice %403 {offsets = [8, 0], sizes = [8, 8], strides = [1, 1]} : vector<16x8xf32> to vector<8x8xf32>
    %436 = vector.extract_strided_slice %404 {offsets = [8, 0], sizes = [8, 8], strides = [1, 1]} : vector<16x8xf32> to vector<8x8xf32>
    %cst_245 = arith.constant dense<0.000000e+00> : vector<8x8xf32>
    %437 = tpu.matmul %435, %436, %cst_245 {dimension_numbers = #tpu.dot_dimension_numbers<[0], [0], [1], [1], [0, 1, 1, 1], [], []>} : vector<8x8xf32>, vector<8x8xf32>, vector<8x8xf32> -> vector<8x8xf32>
    %c1_246 = arith.constant 1 : index
    %c0_247 = arith.constant 0 : index
    %c0_248 = arith.constant 0 : index
    %438 = vector.load %arg19[%c1_246, %c0_247, %c0_248] : memref<2x8x8xf32, #tpu.memory_space<vmem>>, vector<1x8x8xf32>
    %439 = vector.shape_cast %438 : vector<1x8x8xf32> to vector<8x8xf32>
    %c1_249 = arith.constant 1 : index
    %c0_250 = arith.constant 0 : index
    %c0_251 = arith.constant 0 : index
    %440 = vector.load %arg18[%c1_249, %c0_250, %c0_251] : memref<2x8x8xf32, #tpu.memory_space<vmem>>, vector<1x8x8xf32>
    %441 = vector.shape_cast %440 : vector<1x8x8xf32> to vector<8x8xf32>
    %442 = arith.addf %437, %441 : vector<8x8xf32>
    %443 = arith.negf %442 : vector<8x8xf32>
    %444 = math.exp %443 : vector<8x8xf32>
    %cst_252 = arith.constant 1.000000e+00 : f32
    %445 = vector.broadcast %cst_252 : f32 to vector<8x8xf32>
    %446 = arith.addf %445, %444 : vector<8x8xf32>
    %447 = arith.divf %445, %446 : vector<8x8xf32>
    %cst_253 = arith.constant dense<0.000000e+00> : vector<8x8xf32>
    %448 = tpu.matmul %439, %447, %cst_253 {dimension_numbers = #tpu.dot_dimension_numbers<[1], [0], [0], [1], [0, 0, 1, 1], [], []>} : vector<8x8xf32>, vector<8x8xf32>, vector<8x8xf32> -> vector<8x8xf32>
    %cst_254 = arith.constant dense<0xFF800000> : vector<8xf32>
    %449 = vector.multi_reduction <maximumf>, %448, %cst_254 [0] : vector<8x8xf32> to vector<8xf32>
    %450 = vector.shape_cast %449 : vector<8xf32> to vector<1x8xf32>
    %451 = vector.broadcast %450 : vector<1x8xf32> to vector<8x8xf32>
    %452 = arith.subf %448, %451 : vector<8x8xf32>
    %453 = math.exp %452 : vector<8x8xf32>
    %cst_255 = arith.constant dense<0.000000e+00> : vector<8xf32>
    %454 = vector.multi_reduction <add>, %453, %cst_255 [0] : vector<8x8xf32> to vector<8xf32>
    %455 = vector.shape_cast %454 : vector<8xf32> to vector<1x8xf32>
    %456 = tpu.reciprocal %455 {approx = true} : vector<1x8xf32> -> vector<1x8xf32>
    %457 = vector.broadcast %456 : vector<1x8xf32> to vector<8x8xf32>
    %458 = arith.mulf %453, %457 : vector<8x8xf32>
    %c0_256 = arith.constant 0 : index
    %c0_257 = arith.constant 0 : index
    %459 = vector.load %arg5[%c0_256, %c0_257] : memref<8x128xf32, #tpu.memory_space<vmem>>, vector<8x128xf32>
    %cst_258 = arith.constant dense<0.000000e+00> : vector<8x128xf32>
    %460 = tpu.matmul %458, %459, %cst_258 {dimension_numbers = #tpu.dot_dimension_numbers<[1], [0], [0], [1], [0, 0, 1, 1], [], []>} : vector<8x8xf32>, vector<8x128xf32>, vector<8x128xf32> -> vector<8x128xf32>
    %461 = tpu.concatenate %460, %460, %460, %460, %460, %460, %460, %460, %460, %460, %460, %460, %460, %460, %460, %460 in 0 : vector<8x128xf32>, vector<8x128xf32>, vector<8x128xf32>, vector<8x128xf32>, vector<8x128xf32>, vector<8x128xf32>, vector<8x128xf32>, vector<8x128xf32>, vector<8x128xf32>, vector<8x128xf32>, vector<8x128xf32>, vector<8x128xf32>, vector<8x128xf32>, vector<8x128xf32>, vector<8x128xf32>, vector<8x128xf32> -> vector<128x128xf32>
    %c0_259 = arith.constant 0 : index
    %c0_260 = arith.constant 0 : index
    %462 = vector.load %arg4[%c0_259, %c0_260] : memref<128x128xf32, #tpu.memory_space<vmem>>, vector<128x128xf32>
    %463 = arith.mulf %461, %462 : vector<128x128xf32>
    %464 = arith.truncf %463 : vector<128x128xf32> to vector<128x128xbf16>
    %465 = tpu.concatenate %434, %464 in 1 : vector<128x128xbf16>, vector<128x128xbf16> -> vector<128x256xbf16>
    %466 = arith.truncf %399 : vector<16x128xf32> to vector<16x128xbf16>
    %cst_261 = arith.constant dense<0.000000e+00> : vector<16x256xf32>
    %467 = tpu.matmul %466, %465, %cst_261 {dimension_numbers = #tpu.dot_dimension_numbers<[1], [0], [0], [1], [0, 0, 1, 1], [], []>} : vector<16x128xbf16>, vector<128x256xbf16>, vector<16x256xf32> -> vector<16x256xf32>
    %468 = vector.extract_strided_slice %467 {offsets = [0, 0], sizes = [8, 128], strides = [1, 1]} : vector<16x256xf32> to vector<8x128xf32>
    %469 = vector.extract_strided_slice %467 {offsets = [8, 128], sizes = [8, 128], strides = [1, 1]} : vector<16x256xf32> to vector<8x128xf32>
    %470 = tpu.concatenate %468, %469 in 0 : vector<8x128xf32>, vector<8x128xf32> -> vector<16x128xf32>
    %c1_262 = arith.constant 1 : index
    %c0_263 = arith.constant 0 : index
    %c0_264 = arith.constant 0 : index
    %471 = vector.load %arg20[%c1_262, %c0_263, %c0_264] : memref<2x128x128xbf16, #tpu.memory_space<vmem>>, vector<1x128x128xbf16>
    %472 = vector.shape_cast %471 : vector<1x128x128xbf16> to vector<128x128xbf16>
    %473 = arith.truncf %254 : vector<16x128xf32> to vector<16x128xbf16>
    %cst_265 = arith.constant dense<0.000000e+00> : vector<16x128xf32>
    %474 = tpu.matmul %473, %472, %cst_265 {dimension_numbers = #tpu.dot_dimension_numbers<[1], [0], [0], [1], [0, 0, 1, 1], [], []>} : vector<16x128xbf16>, vector<128x128xbf16>, vector<16x128xf32> -> vector<16x128xf32>
    %c1_266 = arith.constant 1 : index
    %c0_267 = arith.constant 0 : index
    %c0_268 = arith.constant 0 : index
    %475 = vector.load %arg21[%c1_266, %c0_267, %c0_268] : memref<2x1x128xf32, #tpu.memory_space<vmem>>, vector<1x1x128xf32>
    %476 = vector.shape_cast %475 : vector<1x1x128xf32> to vector<1x128xf32>
    %477 = vector.broadcast %476 : vector<1x128xf32> to vector<16x128xf32>
    %478 = arith.addf %474, %477 : vector<16x128xf32>
    %479 = arith.addf %478, %470 : vector<16x128xf32>
    %cst_269 = arith.constant 0.000000e+00 : f32
    %480 = vector.broadcast %cst_269 : f32 to vector<16x128xf32>
    %481 = arith.maximumf %479, %480 : vector<16x128xf32>
    %c0_270 = arith.constant 0 : index
    %c0_271 = arith.constant 0 : index
    %482 = vector.load %arg3[%c0_270, %c0_271] : memref<128x128xf32, #tpu.memory_space<vmem>>, vector<128x128xf32>
    %cst_272 = arith.constant dense<0.000000e+00> : vector<16x128xf32>
    %483 = tpu.matmul %481, %482, %cst_272 {dimension_numbers = #tpu.dot_dimension_numbers<[1], [0], [0], [1], [0, 0, 1, 1], [], []>} : vector<16x128xf32>, vector<128x128xf32>, vector<16x128xf32> -> vector<16x128xf32>
    %484 = arith.subf %481, %483 : vector<16x128xf32>
    %485 = arith.mulf %484, %484 : vector<16x128xf32>
    %c0_273 = arith.constant 0 : index
    %c0_274 = arith.constant 0 : index
    %486 = vector.load %arg3[%c0_273, %c0_274] : memref<128x128xf32, #tpu.memory_space<vmem>>, vector<128x128xf32>
    %cst_275 = arith.constant dense<0.000000e+00> : vector<16x128xf32>
    %487 = tpu.matmul %485, %486, %cst_275 {dimension_numbers = #tpu.dot_dimension_numbers<[1], [0], [0], [1], [0, 0, 1, 1], [], []>} : vector<16x128xf32>, vector<128x128xf32>, vector<16x128xf32> -> vector<16x128xf32>
    %cst_276 = arith.constant 9.99999974E-6 : f32
    %488 = vector.broadcast %cst_276 : f32 to vector<16x128xf32>
    %489 = arith.addf %487, %488 : vector<16x128xf32>
    %490 = math.rsqrt %489 : vector<16x128xf32>
    %491 = arith.mulf %484, %490 : vector<16x128xf32>
    %c1_277 = arith.constant 1 : index
    %c0_278 = arith.constant 0 : index
    %c0_279 = arith.constant 0 : index
    %492 = vector.load %arg22[%c1_277, %c0_278, %c0_279] : memref<2x1x128xf32, #tpu.memory_space<vmem>>, vector<1x1x128xf32>
    %493 = vector.shape_cast %492 : vector<1x1x128xf32> to vector<1x128xf32>
    %494 = vector.broadcast %493 : vector<1x128xf32> to vector<16x128xf32>
    %495 = arith.mulf %491, %494 : vector<16x128xf32>
    %c1_280 = arith.constant 1 : index
    %c0_281 = arith.constant 0 : index
    %c0_282 = arith.constant 0 : index
    %496 = vector.load %arg23[%c1_280, %c0_281, %c0_282] : memref<2x1x128xf32, #tpu.memory_space<vmem>>, vector<1x1x128xf32>
    %497 = vector.shape_cast %496 : vector<1x1x128xf32> to vector<1x128xf32>
    %498 = vector.broadcast %497 : vector<1x128xf32> to vector<16x128xf32>
    %499 = arith.addf %495, %498 : vector<16x128xf32>
    %c1_283 = arith.constant 1 : index
    %c0_284 = arith.constant 0 : index
    %c0_285 = arith.constant 0 : index
    %500 = vector.load %arg24[%c1_283, %c0_284, %c0_285] : memref<2x128x256xbf16, #tpu.memory_space<vmem>>, vector<1x128x256xbf16>
    %501 = vector.shape_cast %500 : vector<1x128x256xbf16> to vector<128x256xbf16>
    %502 = arith.truncf %499 : vector<16x128xf32> to vector<16x128xbf16>
    %cst_286 = arith.constant dense<0.000000e+00> : vector<16x256xf32>
    %503 = tpu.matmul %502, %501, %cst_286 {dimension_numbers = #tpu.dot_dimension_numbers<[1], [0], [0], [1], [0, 0, 1, 1], [], []>} : vector<16x128xbf16>, vector<128x256xbf16>, vector<16x256xf32> -> vector<16x256xf32>
    %c1_287 = arith.constant 1 : index
    %c0_288 = arith.constant 0 : index
    %c0_289 = arith.constant 0 : index
    %504 = vector.load %arg25[%c1_287, %c0_288, %c0_289] : memref<2x1x256xf32, #tpu.memory_space<vmem>>, vector<1x1x256xf32>
    %505 = vector.shape_cast %504 : vector<1x1x256xf32> to vector<1x256xf32>
    %506 = vector.broadcast %505 : vector<1x256xf32> to vector<16x256xf32>
    %507 = arith.addf %503, %506 : vector<16x256xf32>
    %508 = vector.extract_strided_slice %507 {offsets = [0, 128], sizes = [16, 128], strides = [1, 1]} : vector<16x256xf32> to vector<16x128xf32>
    %509 = arith.addf %256, %508 : vector<16x128xf32>
    %c0_290 = arith.constant 0 : index
    %c0_291 = arith.constant 0 : index
    %510 = vector.load %arg6[%c0_290, %c0_291] : memref<128x4xf32, #tpu.memory_space<vmem>>, vector<128x4xf32>
    %511 = arith.truncf %509 : vector<16x128xf32> to vector<16x128xbf16>
    %512 = arith.truncf %510 : vector<128x4xf32> to vector<128x4xbf16>
    %cst_292 = arith.constant dense<0.000000e+00> : vector<16x4xf32>
    %513 = tpu.matmul %511, %512, %cst_292 {dimension_numbers = #tpu.dot_dimension_numbers<[1], [0], [0], [1], [0, 0, 1, 1], [], []>} : vector<16x128xbf16>, vector<128x4xbf16>, vector<16x4xf32> -> vector<16x4xf32>
    %c0_293 = arith.constant 0 : index
    %c0_294 = arith.constant 0 : index
    %514 = vector.load %arg7[%c0_293, %c0_294] : memref<1x4xf32, #tpu.memory_space<vmem>>, vector<1x4xf32>
    %515 = vector.broadcast %514 : vector<1x4xf32> to vector<16x4xf32>
    %516 = arith.addf %513, %515 : vector<16x4xf32>
    %c0_295 = arith.constant 0 : index
    %c0_296 = arith.constant 0 : index
    %517 = vector.load %arg26[%c0_295, %c0_296] : memref<16x4xf32, #tpu.memory_space<vmem>>, vector<16x4xf32>
    tpu.vector_store %arg26[%c0_295, %c0_296], %516 {strides = array<i32>} : memref<16x4xf32, #tpu.memory_space<vmem>>, vector<16x4xf32>,
    return
  }
}

</mosaic_0001>

<bundles_post_ra>
// kernel: coat_submodule_forward.1
= control target key start
LH: loop header
LB: loop body
LE: loop exit
PB: predicated region body
PF: predicated region fallthrough
CT: control target
= control target key end

     0   :  { %v7814_v0 = vmov 0.0   ;;  %vm7815_vm0 = vmmov 0   ;;  %vm96_vm1 = vcmask 130048   ;;  %vm559_vm2 = vcmask 523264   ;;  %s9594_s27 = smov 64   ;;  %s9556_s0 = inlined_call_operand.vmem [shape: f32[16,128], index: 0, kind: input, shape index: {}]   ;;  %s9557_s1 = inlined_call_operand.vmem [shape: f32[48,16], index: 1, kind: input, shape index: {}]   ;;  %s9558_s8 = inlined_call_operand.vmem [shape: bf16[2,384,128], index: 8, kind: input, shape index: {}]   ;;  %s9559_s9 = inlined_call_operand.vmem [shape: bf16[2,128,128], index: 9, kind: input, shape index: {}]   ;;  %s9560_s10 = inlined_call_operand.vmem [shape: f32[2,2,64,1], index: 10, kind: input, shape index: {}]   ;;  %s9561_s11 = inlined_call_operand.vmem [shape: f32[2,2,1,64], index: 11, kind: input, shape index: {}]   ;;  %s9562_s2 = inlined_call_operand.vmem [shape: f32[16,16], index: 2, kind: input, shape index: {}]   ;;  %s9563_s12 = inlined_call_operand.vmem [shape: bf16[2,128,128], index: 12, kind: input, shape index: {}]   ;;  %s9564_s13 = inlined_call_operand.vmem [shape: f32[2,128,1], index: 13, kind: input, shape index: {}]   ;;  %s9565_s14 = inlined_call_operand.vmem [shape: f32[2,1,128], index: 14, kind: input, shape index: {}]   ;;  %s9566_s15 = inlined_call_operand.vmem [shape: bf16[2,128,128], index: 15, kind: input, shape index: {}]   ;;  %s9567_s17 = inlined_call_operand.vmem [shape: f32[2,128,16], index: 17, kind: input, shape index: {}]   ;;  %s9568_s16 = inlined_call_operand.vmem [shape: f32[2,1,128], index: 16, kind: input, shape index: {}]   ;;  %s9569_s18 = inlined_call_operand.vmem [shape: f32[2,8,8], index: 18, kind: input, shape index: {}]   ;;  %s9570_s19 = inlined_call_operand.vmem [shape: f32[2,8,8], index: 19, kind: input, shape index: {}]   ;;  %s9571_s5 = inlined_call_operand.vmem [shape: f32[8,128], index: 5, kind: input, shape index: {}]   ;;  %s9572_s20 = inlined_call_operand.vmem [shape: bf16[2,128,128], index: 20, kind: input, shape index: {}]   ;;  %s9573_s3 = inlined_call_operand.vmem [shape: f32[128,128], index: 3, kind: input, shape index: {}]   ;;  %s9574_s4 = inlined_call_operand.vmem [shape: f32[128,128], index: 4, kind: input, shape index: {}]   ;;  %s9575_s21 = inlined_call_operand.vmem [shape: f32[2,1,128], index: 21, kind: input, shape index: {}]   ;;  %s9576_s24 = inlined_call_operand.vmem [shape: bf16[2,128,256], index: 24, kind: input, shape index: {}]   ;;  %s9577_s22 = inlined_call_operand.vmem [shape: f32[2,1,128], index: 22, kind: input, shape index: {}]   ;;  %s9578_s23 = inlined_call_operand.vmem [shape: f32[2,1,128], index: 23, kind: input, shape index: {}]   ;;  %s9579_s25 = inlined_call_operand.vmem [shape: f32[2,1,256], index: 25, kind: input, shape index: {}]   ;;  %s9580_s6 = inlined_call_operand.vmem [shape: f32[128,4], index: 6, kind: input, shape index: {}]   ;;  %s9581_s7 = inlined_call_operand.vmem [shape: f32[1,4], index: 7, kind: input, shape index: {}]   ;;  %s9582_s26 = inlined_call_operand.vmem [shape: f32[16,4], index: 26, kind: output, shape index: {}]  }
   0x1   :  { %9600 = sst [smem:[#allocation2_spill]] %s9556_s0  ;;  %6390 = vmatprep.subr.bf16.mxu0 %v7814_v0  ;;  %6392 = vmatprep.mubr.msk.bf16.mxu0 %vm7815_vm0, %v7814_v0  ;;  %vm8149_vm3 = vmpackc.low %vm559_vm2, %vm559_vm2  ;;  %vm1726_vm14 = vcmask 64512  }
   0x2   :  { %9601 = sst [smem:[#allocation3_spill]] %s9557_s1 }
   0x3   :  { %9602 = sst [smem:[#allocation4_spill]] %s9558_s8  ;;  %s9615_s0 = sld [smem:[#allocation3_spill]] }
   0x4   :  { %9603 = sst [smem:[#allocation5_spill]] %s9559_s9 }
   0x5   :  { %9604 = sst [smem:[#allocation6_spill]] %s9560_s10 }
   0x6   :  { %9605 = sst [smem:[#allocation7_spill]] %s9561_s11  ;;  %s9618_s8 = sld [smem:[#allocation6_spill]] }
   0x7   :  { %9606 = sst [smem:[#allocation8_spill]] %s9562_s2 }
   0x8   :  { %9607 = sst [smem:[#allocation9_spill]] %s9563_s12  ;;  %s9614_s12 = sld [smem:[#allocation2_spill]] }
   0x9   :  { %9608 = sst [smem:[#allocation10_spill]] %s9564_s13  ;;  %v86_v3 = vld [vmem:[%s9615_s0] sm:$0xff]  ;;  %v87_v5 = vld [vmem:[%s9615_s0 + $0x8] sm:$0xff]  ;;  %v88_v9 = vld [vmem:[%s9615_s0 + $0x10] sm:$0xff]  ;;  %s9621_s13 = sld [smem:[#allocation7_spill]] }
   0xa   :  { %9609 = sst [smem:[#allocation11_spill]] %s9565_s14  ;;  %v7972_v6 = vpack.c.bf16 %v87_v5, %v86_v3  ;;  %v89_v10 = vld [vmem:[%s9615_s0 + $0x18] sm:$0xff]  ;;  %v90_v19 = vld [vmem:[%s9615_s0 + $0x20] sm:$0xff]  ;;  %v91_v20 = vld [vmem:[%s9615_s0 + $0x28] sm:$0xff]  ;;  %s9617_s0 = sld [smem:[#allocation5_spill]] }
   0xb   :  { %9610 = sst [smem:[#allocation12_spill]] %s9566_s15  ;;  %v8004_v15 = vpack.c.bf16 %v89_v10, %v88_v9  ;;  %v8039_v25 = vpack.c.bf16 %v91_v20, %v90_v19  ;;  %s9622_s28 = sld [smem:[#allocation8_spill]] }
   0xc   :  { %9611 = sst [smem:[#allocation13_spill]] %s9580_s6  ;;  %s9616_s15 = sld [smem:[#allocation4_spill]]  ;;  %v550_v60 = vld [vmem:[%s9618_s8] sm:$0xff]  ;;  %v551_v61 = vld [vmem:[%s9618_s8 + $0x8] sm:$0xff]  ;;  %v552_v62 = vld [vmem:[%s9618_s8 + $0x10] sm:$0xff] }
   0xd   :  { %9612 = sst [smem:[#allocation14_spill]] %s9581_s7  ;;  %v7132_v63 = vpack.c.bf16 %v551_v61, %v550_v60  ;;  %v554_v3 = vld [vmem:[%s9618_s8 + $0x20] sm:$0xff]  ;;  %v555_v5 = vld [vmem:[%s9618_s8 + $0x28] sm:$0xff]  ;;  %v557_v9 = vld [vmem:[%s9618_s8 + $0x38] sm:$0xff]  ;;  %s9623_s10 = sld [smem:[#allocation9_spill]] }
   0xe   :  { %9613 = sst [smem:[#allocation15_spill]] %s9582_s26  ;;  %v84_v1 = vld [vmem:[%s9614_s12] sm:$0xff]  ;;  %v85_v2 = vld [vmem:[%s9614_s12 + $0x8] sm:$0xff]  ;;  %s9624_s29 = sld [smem:[#allocation10_spill]] }
   0xf   :  { %v7967_v4 = vpack.c.bf16 %v85_v2, %v84_v1  ;;  %v553_v1 = vld [vmem:[%s9618_s8 + $0x18] sm:$0xff]  ;;  %s9625_s7 = smov 64   ;;  %s9626_s30 = sld [smem:[#allocation11_spill]] }
  0x10   :  { %v7516_v47 = vld [vmem:[%s9617_s0] sm:$0xff]   ;;  %v7517_v48 = vld [vmem:[%s9617_s0 + $0x8] sm:$0xff]   ;;  %v7518_v54 = vld [vmem:[%s9617_s0 + $0x10] sm:$0xff]   ;;  %v7136_v2 = vpack.c.bf16 %v553_v1, %v552_v62  ;;  %s9627_s1 = sld [smem:[#allocation12_spill]]  ;;  %s9628_s26 = sld [smem:[#allocation9_spill]] }
  0x11   :  { %6391 = vmatpush3.bf16.msra.mxu0 %v7967_v4  ;;  %v7519_v55 = vld [vmem:[%s9617_s0 + $0x18] sm:$0xff]   ;;  %v7520_v56 = vld [vmem:[%s9617_s0 + $0x20] sm:$0xff]   ;;  %v7521_v57 = vld [vmem:[%s9617_s0 + $0x28] sm:$0xff]   ;;  %s9630_s14 = sld [smem:[#allocation11_spill]]  ;;  %s9632_s9 = sld [smem:[#allocation14_spill]] }
  0x12   :  { %v7492_v7 = vld [vmem:[%s9616_s15 + $0x40] sm:$0xff]   ;;  %6404 = vmatprep.subr.bf16.mxu0 %v7814_v0  ;;  %v7494_v11 = vld [vmem:[%s9616_s15 + $0x48] sm:$0xff]   ;;  %v7496_v13 = vld [vmem:[%s9616_s15 + $0x50] sm:$0xff]  }
  0x13   :  { %v7493_v8 = vld [vmem:[%s9616_s15] sm:$0xff]   ;;  %6005 = vmatprep.subr.bf16.mxu1 %v7492_v7  ;;  %v7495_v12 = vld [vmem:[%s9616_s15 + $0x8] sm:$0xff]   ;;  %v7498_v16 = vld [vmem:[%s9616_s15 + $0x10] sm:$0xff]   ;;  %v7140_v7 = vpack.c.bf16 %v555_v5, %v554_v3 }
  0x14   :  { %6393 = vmatmul.mubr.msk.bf16.vlgmr.msra.gmra.mrb[0].mxu0 %vm96_vm1, %v7972_v6  ;;  %6006 = vmatpush3.bf16.msra.mxu1 %v7493_v8  ;;  %v7497_v14 = vld [vmem:[%s9616_s15 + $0x80] sm:$0xff]   ;;  %v7499_v17 = vld [vmem:[%s9616_s15 + $0x58] sm:$0xff]   ;;  %v7500_v18 = vld [vmem:[%s9616_s15 + $0x88] sm:$0xff]  }
  0x15   :  { %6396 = vmatprep.mubr.msk.bf16.mxu0 %vm7815_vm0, %v7814_v0  ;;  %6007 = vmatprep.subr.bf16.mxu1 %v7494_v11  ;;  %v7501_v21 = vld [vmem:[%s9616_s15 + $0x18] sm:$0xff]   ;;  %v7502_v22 = vld [vmem:[%s9616_s15 + $0x60] sm:$0xff]   ;;  %v7503_v23 = vld [vmem:[%s9616_s15 + $0x90] sm:$0xff]  }
  0x16   :  { %6405 = vmatpush3.bf16.msra.mxu0 %v7497_v14  ;;  %v7504_v24 = vld [vmem:[%s9616_s15 + $0x20] sm:$0xff]   ;;  %v7505_v26 = vld [vmem:[%s9616_s15 + $0x68] sm:$0xff]   ;;  %v7506_v27 = vld [vmem:[%s9616_s15 + $0x98] sm:$0xff]  }
  0x17   :  { %6406 = vmatprep.subr.bf16.mxu0 %v7814_v0  ;;  %v7507_v28 = vld [vmem:[%s9616_s15 + $0x28] sm:$0xff]   ;;  %v7508_v29 = vld [vmem:[%s9616_s15 + $0x70] sm:$0xff]   ;;  %v7509_v30 = vld [vmem:[%s9616_s15 + $0xa0] sm:$0xff]  }
  0x18   :  { %6008 = vmatpush3.bf16.msra.mxu1 %v7495_v12  ;;  %v7510_v31 = vld [vmem:[%s9616_s15 + $0x30] sm:$0xff]   ;;  %v7511_v32 = vld [vmem:[%s9616_s15 + $0x78] sm:$0xff]   ;;  %v7512_v33 = vld [vmem:[%s9616_s15 + $0xa8] sm:$0xff]  }
  0x19   :  { %6009 = vmatprep.subr.bf16.mxu1 %v7496_v13  ;;  %v7513_v34 = vld [vmem:[%s9616_s15 + $0x38] sm:$0xff]   ;;  %v7514_v35 = vld [vmem:[%s9616_s15 + $0xb0] sm:$0xff]  }
  0x1a   :  { %6407 = vmatpush3.bf16.msra.mxu0 %v7500_v18  ;;  %v7515_v36 = vld [vmem:[%s9616_s15 + $0xb8] sm:$0xff]   ;;  %v7522_v58 = vld [vmem:[%s9617_s0 + $0x30] sm:$0xff]  }
  0x1b   :  { %6408 = vmatprep.subr.bf16.mxu0 %v7814_v0  ;;  %v7523_v59 = vld [vmem:[%s9617_s0 + $0x38] sm:$0xff]   ;;  %v556_v8 = vld [vmem:[%s9618_s8 + $0x30] sm:$0xff] }
  0x1c   :  { %6397 = vmatmul.mubr.msk.bf16.gmra.mrb[4].mxu0 %vm96_vm1, %v8004_v15  ;;  %6010 = vmatpush3.bf16.msra.mxu1 %v7498_v16  ;;  %v7144_v10 = vpack.c.bf16 %v557_v9, %v556_v8 }
  0x1d   :  { %6400 = vmatprep.mubr.msk.bf16.mxu0 %vm7815_vm0, %v7814_v0  ;;  %6011 = vmatprep.subr.bf16.mxu1 %v7499_v17 }
  0x1e   :  { %6409 = vmatpush3.bf16.msra.mxu0 %v7503_v23 }
  0x1f   :  { %6410 = vmatprep.subr.bf16.mxu0 %v7814_v0 }
  0x20   :  { %6012 = vmatpush3.bf16.msra.mxu1 %v7501_v21 }
  0x21   :  { %6013 = vmatprep.subr.bf16.mxu1 %v7502_v22 }
  0x22   :  { %6411 = vmatpush3.bf16.msra.mxu0 %v7506_v27 }
  0x23   :  { %6412 = vmatprep.subr.bf16.mxu0 %v7814_v0 }
  0x24   :  { %6401 = vmatmul.mubr.msk.bf16.gmra.mrb[8].mxu0 %vm96_vm1, %v8039_v25  ;;  %6014 = vmatpush3.bf16.msra.mxu1 %v7504_v24 }
  0x25   :  { %6420 = vmatprep.mubr.msk.bf16.mxu0 %vm7815_vm0, %v7814_v0  ;;  %6015 = vmatprep.subr.bf16.mxu1 %v7505_v26 }
  0x26   :  { %6413 = vmatpush3.bf16.msra.mxu0 %v7509_v30  ;;  %v7816_v30 = vmov 0.0|0.0  }
  0x27   :  { %6414 = vmatprep.subr.bf16.mxu0 %v7814_v0 }
  0x28   :  { %6016 = vmatpush3.bf16.msra.mxu1 %v7507_v28 }
  0x29   :  { %6017 = vmatprep.subr.bf16.mxu1 %v7508_v29 }
  0x2a   :  { %6415 = vmatpush3.bf16.msra.mxu0 %v7512_v33 }
  0x2b   :  { %6416 = vmatprep.subr.bf16.mxu0 %v7814_v0 }
  0x2c   :  { %6018 = vmatpush3.bf16.msra.mxu1 %v7510_v31 }
  0x2d   :  { %6019 = vmatprep.subr.bf16.mxu1 %v7511_v32 }
  0x2e   :  { %6417 = vmatpush3.bf16.msra.mxu0 %v7514_v35 }
  0x2f   :  { %6418 = vmatprep.subr.bf16.mxu0 %v7814_v0 }
  0x30   :  { %6020 = vmatpush3.bf16.msra.mxu1 %v7513_v34 }
  0x31   :  { %6424 = vmatprep.subr.bf16.mxu1 %v7814_v0 }
  0x32   :  { %6419 = vmatpush3.bf16.msra.mxu0 %v7515_v36 }
  0x33   :  { %7133 = vmatprep.subr.bf16.mxu0 %v7132_v63 }
  0xe7   :  { %v140_v37 = vpop.f32.mrb[0].mxu0 }
  0xe8   :  { %v6394_v38 = vpop.f32.mrb[1].mxu0 }
  0xe9   :  { %v143_v39 = vpop.f32.mrb[2].mxu0  ;;  %v7818_v38 = vmov 0  }
  0xea   :  { %v211_v40 = vpack.c.bf16 %v143_v39, %v140_v37  ;;  %v6395_v41 = vpop.f32.mrb[3].mxu0  ;;  %v558_v37 = vld [vmem:[%s9621_s13] sm:$0x1]  ;;  %7480 = vset.pattern.permute.xlu0 %v7818_v38  ;;  %7481 = vset.pattern.permute.xlu1 %v7818_v38 }
  0xef   :  { %v148_v42 = vpop.f32.mrb[4].mxu0 }
  0xf0   :  { %v6398_v43 = vpop.f32.mrb[5].mxu0 }
  0xf1   :  { %v151_v44 = vpop.f32.mrb[6].mxu0 }
  0xf2   :  { %v6399_v45 = vpop.f32.mrb[7].mxu0  ;;  %v212_v46 = vpack.c.bf16 %v151_v44, %v148_v42 }
  0xf4   :  { %390 = vmatprep.mubr.bf16.mxu1 %v212_v46  ;;  %v5630_v46 = vld [vmem:[%s9618_s8 + $0x40] sm:$0xff] }
  0xf5   :  { %391 = vmatmul.mubr.bf16.vlgmr.msra.gmra.mrb[0].mxu1 %v211_v40 }
  0xf6   :  { %6425 = vmatpush3.bf16.msra.mxu1 %v7516_v47  ;;  %6440 = vmatprep.mubr.msk.bf16.mxu1 %vm7815_vm0, %v7814_v0  ;;  %v5631_v47 = vld [vmem:[%s9618_s8 + $0x48] sm:$0xff] }
  0xf7   :  { %v156_v49 = vpop.f32.mrb[8].mxu0  ;;  %6426 = vmatprep.subr.bf16.mxu1 %v7814_v0 }
  0xf8   :  { %v6402_v50 = vpop.f32.mrb[9].mxu0 }
  0xf9   :  { %v159_v51 = vpop.f32.mrb[10].mxu0  ;;  %v724_v50 = vlaneseq }
  0xfa   :  { %v213_v52 = vpack.c.bf16 %v159_v51, %v156_v49  ;;  %v6403_v53 = vpop.f32.mrb[11].mxu0  ;;  %6427 = vmatpush3.bf16.msra.mxu1 %v7517_v48  ;;  %v7152_v48 = vpack.c.bf16 %v5631_v47, %v5630_v46  ;;  %v5638_v49 = vld [vmem:[%s9621_s13 + $0x1] sm:$0x1] }
  0xfb   :  { %6428 = vmatprep.subr.bf16.mxu1 %v7814_v0  ;;  %v8193_v51 = vshrl.u32 %v724_v50, 7 }
  0xfc   :  { %6421 = vmatmul.mubr.bf16.vlgmr.msra.gmra.mrb[12].mxu0 %v213_v52 }
  0xfd   :  { %7135 = vmatpush3.bf16.msra.mxu0 %v7132_v63  ;;  %v8196_v52 = vsub.s32 0, %v8193_v51 }
  0xfe   :  { %6429 = vmatpush3.bf16.msra.mxu1 %v7518_v54  ;;  %7137 = vmatprep.subr.bf16.mxu0 %v7136_v2 }
  0xff   :  { %6430 = vmatprep.subr.bf16.mxu1 %v7814_v0 }
 0x101   :  { %7139 = vmatpush3.bf16.msra.mxu0 %v7136_v2 }
 0x102   :  { %6431 = vmatpush3.bf16.msra.mxu1 %v7519_v55  ;;  %7141 = vmatprep.subr.bf16.mxu0 %v7140_v7 }
 0x103   :  { %6432 = vmatprep.subr.bf16.mxu1 %v7814_v0 }
 0x105   :  { %7143 = vmatpush3.bf16.msra.mxu0 %v7140_v7 }
 0x106   :  { %6433 = vmatpush3.bf16.msra.mxu1 %v7520_v56  ;;  %7145 = vmatprep.subr.bf16.mxu0 %v7144_v10 }
 0x107   :  { %6434 = vmatprep.subr.bf16.mxu1 %v7814_v0 }
 0x109   :  { %7147 = vmatpush3.bf16.msra.mxu0 %v7144_v10 }
 0x10a   :  { %6435 = vmatpush3.bf16.msra.mxu1 %v7521_v57  ;;  %7148 = vmatprep.subr.bf16.mxu0 %v7816_v30 }
 0x10b   :  { %6436 = vmatprep.subr.bf16.mxu1 %v7814_v0 }
 0x10e   :  { %6437 = vmatpush3.bf16.msra.mxu1 %v7522_v58 }
 0x10f   :  { %6438 = vmatprep.subr.bf16.mxu1 %v7814_v0 }
 0x112   :  { %6439 = vmatpush3.bf16.msra.mxu1 %v7523_v59 }
 0x113   :  { %7168 = vmatprep.subr.bf16.mxu1 %v7816_v30 }
 0x1c8   :  { %v6021_v11 = vpop.f32.mrb[0].mxu1 }
 0x1c9   :  { %v6022_v12 = vpop.f32.mrb[1].mxu1 }
 0x1ca   :  { %v6023_v13 = vadd.f32 %v6022_v12, %v6021_v11  ;;  %v6024_v14 = vpop.f32.mrb[2].mxu1  ;;  %v8202_v12 = vld [vmem:[%s9622_s28] sm:$0xff] }
 0x1cb   :  { %v6025_v16 = vpop.f32.mrb[3].mxu1 }
 0x1cc   :  { %v6026_v17 = vadd.f32 %v6025_v16, %v6024_v14 }
 0x1cf   :  { %v433_v18 = vpop.f32.mrb[12].mxu0 }
 0x1d0   :  { %v434_v19 = vadd.f32 %v6023_v13, %v433_v18  ;;  %v6422_v20 = vpop.f32.mrb[13].mxu0  ;;  %v8207_v13 = vld [vmem:[%s9622_s28 + $0x8] sm:$0xff] }
 0x1d1   :  { %v436_v21 = vpop.f32.mrb[14].mxu0 }
 0x1d2   :  { %v440_v22 = vmul.f32 0.5, %v434_v19  ;;  %v437_v23 = vadd.f32 %v6026_v17, %v436_v21  ;;  %v6423_v24 = vpop.f32.mrb[15].mxu0 }
 0x1d4   :  { %v441_v26 = vmul.f32 0.5, %v437_v23  ;;  %v442_v27 = vmax.f32 %v440_v22, 0.0 }
 0x1d6   :  { %v443_v28 = vmax.f32 %v441_v26, 0.0 }
 0x1d8   :  { %v460_v29 = vpack.c.bf16 %v443_v28, %v442_v27 }
 0x1da   :  { %6441 = vmatmul.mubr.bf16.vlgmr.msra.gmra.mrb[4].mxu1 %v460_v29  ;;  %v5632_v29 = vld [vmem:[%s9618_s8 + $0x50] sm:$0xff] }
 0x1db   :  { %6499 = vmatprep.mubr.msk.f32.mxu1 %vm7815_vm0, %v7814_v0 }
 0x2ad   :  { %v543_v31 = vpop.f32.mrb[4].mxu1 }
 0x2ae   :  { %837 = vrot.lane.b32.xlu1 %v543_v31, %s9594_s27  ;;  %v6442_v32 = vpop.f32.mrb[5].mxu1  ;;  %6460 = vmatprep.mubr.msk.f32.mxu0 %vm559_vm2, %v543_v31 }
 0x2af   :  { %v546_v33 = vpop.f32.mrb[6].mxu1 }
 0x2b0   :  { %v8153_v35 = vpack.c.bf16 %v546_v33, %v543_v31  ;;  %v6443_v36 = vpop.f32.mrb[7].mxu1  ;;  %6461 = vmatmul.mubr.msk.f32.vlgmr.msra.gmra.mrb[16].mxu0 %vm559_vm2, %v546_v33  ;;  %v5633_v31 = vld [vmem:[%s9618_s8 + $0x58] sm:$0xff] }
 0x2b1   :  { %6467 = vmatprep.mubr.msk.f32.mxu0 %vm7815_vm0, %v7814_v0 }
 0x2b2   :  { %839 = vrot.lane.b32.xlu1 %v546_v33, %s9594_s27  ;;  %7151 = vmatpush3.bf16.xpose.msk.msra.mxu0 %vm8149_vm3, %v8153_v35 }
 0x2b3   :  { %6470 = vmatprep.subr.bf16.mxu0 %v7814_v0 }
 0x2b9   :  { %6468 = vmatmul.mubr.msk.f32.vlgmr.msra.gmra.mrb[18].mxu0 %vm559_vm2, %v558_v37  ;;  %v7156_v37 = vpack.c.bf16 %v5633_v31, %v5632_v29 }
 0x2ba   :  { %6471 = vmatpush3.bf16.msra.mxu0 %v8153_v35  ;;  %6472 = vmatprep.mubr.msk.bf16.mxu0 %vm7815_vm0, %v7814_v0 }
 0x2bb   :  { %7153 = vmatprep.subr.bf16.mxu0 %v7152_v48 }
 0x320   :  { %v8172_v39 = vpop.permute.xlu1 %837 }
 0x324   :  { %v8174_v40 = vpop.permute.xlu1 %839 }
 0x325   :  { %v7169_v41 = vpack.c.bf16 %v8174_v40, %v8172_v39 }
 0x327   :  { %7171 = vmatpush3.bf16.xpose.msk.msra.mxu1 %vm8149_vm3, %v7169_v41  ;;  %v5634_v41 = vld [vmem:[%s9618_s8 + $0x60] sm:$0xff] }
 0x328   :  { %6502 = vmatprep.subr.bf16.mxu1 %v7814_v0 }
 0x32e   :  { %6500 = vmatmul.mubr.msk.f32.vlgmr.msra.gmra.mrb[8].mxu1 %vm559_vm2, %v5638_v49 }
 0x32f   :  { %6504 = vmatprep.mubr.msk.bf16.mxu1 %vm7815_vm0, %v7814_v0 }
 0x383   :  { %v6462_v42 = vpop.f32.mrb[16].mxu0 }
 0x384   :  { %v632_v43 = vpop.f32.mrb[17].mxu0 }
 0x385   :  { %716 = vperm.xlu0 %7480, %v632_v43  }
 0x389   :  { %721 = vperm.xlu0 %7480, %v6462_v42   ;;  %v5635_v42 = vld [vmem:[%s9618_s8 + $0x68] sm:$0xff] }
 0x38a   :  { %v7160_v43 = vpack.c.bf16 %v5635_v42, %v5634_v41  ;;  %v7525_v41 = vld [vmem:[%s9623_s10 + $0x8] sm:$0xff]   ;;  %v7526_v42 = vld [vmem:[%s9623_s10 + $0x10] sm:$0xff]  }
 0x38c   :  { %v710_v44 = vpop.f32.mrb[18].mxu0 }
 0x38d   :  { %v6469_v45 = vpop.f32.mrb[19].mxu0  ;;  %v727_v53 = vrot.slane %v710_v44, %v8196_v52  ;;  %v5636_v44 = vld [vmem:[%s9618_s8 + $0x70] sm:$0xff] }
 0x38e   :  { %v5637_v45 = vld [vmem:[%s9618_s8 + $0x78] sm:$0xff] }
 0x38f   :  { %v7164_v46 = vpack.c.bf16 %v5637_v45, %v5636_v44  ;;  %v7528_v44 = vld [vmem:[%s9623_s10 + $0x20] sm:$0xff]   ;;  %v7529_v45 = vld [vmem:[%s9623_s10 + $0x28] sm:$0xff]  }
 0x404   :  { %v717_v54 = vpop.permute.xlu0 %716 }
 0x405   :  { %v728_v55 = vadd.f32 %v727_v53, %v717_v54 }
 0x407   :  { %vm730_vm4 = vcmp.gt.f32.partialorder %v728_v55, 0.0  ;;  %v732_v56 = vmul.f32 0.1, %v728_v55 }
 0x408   :  { %v722_v57 = vpop.permute.xlu0 %721 }
 0x409   :  { %v734_v58 = vsel %vm730_vm4, %v728_v55, %v732_v56  ;;  %v729_v59 = vadd.f32 %v727_v53, %v722_v57 }
 0x40a   :  { %v5625_v60 = vmul.f32 -1.442695, %v734_v58 }
 0x40b   :  { %vm731_vm5 = vcmp.gt.f32.partialorder %v729_v59, 0.0  ;;  %v733_v61 = vmul.f32 0.1, %v729_v59 }
 0x40c   :  { %7652 = vpow2.f32 %v5625_v60 }
 0x40d   :  { %v735_v62 = vsel %vm731_vm5, %v729_v59, %v733_v61 }
 0x40e   :  { %v5626_v63 = vmul.f32 -1.442695, %v735_v62 }
 0x410   :  { %7654 = vpow2.f32 %v5626_v63 }
 0x416   :  { %v7653_v1 = vpop.eup %7652 }
 0x417   :  { %v742_v2 = vadd.f32 1.0, %v7653_v1 }
 0x419   :  { %7656 = vrcp.f32 %v742_v2 }
 0x41a   :  { %v7655_v3 = vpop.eup %7654 }
 0x41b   :  { %v743_v5 = vadd.f32 1.0, %v7655_v3 }
 0x41d   :  { %7658 = vrcp.f32 %v743_v5 }
 0x423   :  { %v7657_v7 = vpop.eup %7656 }
 0x424   :  { %v748_v8 = vmul.f32 1.442695, %v7657_v7 }
 0x426   :  { %7660 = vpow2.f32 %v748_v8 }
 0x427   :  { %v7659_v9 = vpop.eup %7658 }
 0x428   :  { %v750_v10 = vmul.f32 1.442695, %v7659_v9 }
 0x42a   :  { %7662 = vpow2.f32 %v750_v10 }
 0x430   :  { %v7661_v11 = vpop.eup %7660 }
 0x431   :  { %v754_v14 = vmul.f32 %v7661_v11, %v8202_v12 }
 0x433   :  { %v756_v18 = vsel %vm96_vm1, %v754_v14, 0.0 }
 0x434   :  { %v7663_v16 = vpop.eup %7662 }
 0x435   :  { %v755_v17 = vmul.f32 %v7663_v16, %v8207_v13 }
 0x437   :  { %v757_v19 = vsel %vm96_vm1, %v755_v17, 0.0 }
 0x438   :  { %v758_v20 = vadd.f32 %v757_v19, %v756_v18 }
 0x43a   :  { %v759_v21 = vrot.slane %v758_v20, 4 }
 0x43c   :  { %v760_v22 = vadd.f32 %v759_v21, %v758_v20 }
 0x43e   :  { %v761_v23 = vrot.slane %v760_v22, 2 }
 0x440   :  { %v762_v24 = vadd.f32 %v761_v23, %v760_v22 }
 0x442   :  { %v763_v26 = vrot.slane %v762_v24, 1 }
 0x444   :  { %v764_v27 = vadd.f32 %v763_v26, %v762_v24 }
 0x446   :  { %7664 = vrcp.f32 %v764_v27 }
 0x450   :  { %v7665_v28 = vpop.eup %7664 }
 0x451   :  { %v766_v32 = vmul.f32 %v7665_v28, %v754_v14  ;;  %v767_v33 = vmul.f32 %v7665_v28, %v755_v17 }
 0x453   :  { %v768_v36 = vpack.c.bf16 %v767_v33, %v766_v32 }
 0x455   :  { %6473 = vmatmul.mubr.msk.bf16.vlgmr.msra.gmra.mrb[20].mxu0 %vm96_vm1, %v768_v36 }
 0x456   :  { %7155 = vmatpush3.bf16.msra.mxu0 %v7152_v48  ;;  %6492 = vmatprep.mubr.msk.f32.mxu0 %vm559_vm2, %v8172_v39  ;;  %v989_v39 = vpop.f32.mrb[8].mxu1 }
 0x457   :  { %7157 = vmatprep.subr.bf16.mxu0 %v7156_v37  ;;  %v6501_v47 = vpop.f32.mrb[9].mxu1  ;;  %v1006_v56 = vrot.slane %v989_v39, %v8196_v52 }
 0x45a   :  { %7159 = vmatpush3.bf16.msra.mxu0 %v7156_v37  ;;  %v7524_v37 = vld [vmem:[%s9623_s10] sm:$0xff]  }
 0x45b   :  { %7161 = vmatprep.subr.bf16.mxu0 %v7160_v43 }
 0x45e   :  { %7163 = vmatpush3.bf16.msra.mxu0 %v7160_v43  ;;  %v7527_v43 = vld [vmem:[%s9623_s10 + $0x18] sm:$0xff]  }
 0x45f   :  { %7165 = vmatprep.subr.bf16.mxu0 %v7164_v46 }
 0x462   :  { %7167 = vmatpush3.bf16.msra.mxu0 %v7164_v46  ;;  %v7530_v46 = vld [vmem:[%s9623_s10 + $0x30] sm:$0xff]  }
 0x465   :  { %6493 = vmatmul.mubr.msk.f32.vlgmr.msra.gmra.mrb[24].mxu0 %vm559_vm2, %v8174_v40 }
 0x528   :  { %v8236_v48 = vpop.f32.mrb[20].mxu0 }
 0x529   :  { %v6474_v49 = vpop.f32.mrb[21].mxu0  ;;  %vm814_vm10 = vcmp.gt.f32.partialorder %v8236_v48, 0.0 }
 0x52a   :  { %v8238_v50 = vpop.f32.mrb[22].mxu0 }
 0x52b   :  { %v6475_v53 = vpop.f32.mrb[23].mxu0  ;;  %vm815_vm11 = vcmp.gt.f32.partialorder %v8238_v50, 0.0 }
 0x538   :  { %v6494_v54 = vpop.f32.mrb[24].mxu0 }
 0x539   :  { %1000 = vperm.xlu1 %7481, %v6494_v54   ;;  %v911_v55 = vpop.f32.mrb[25].mxu0 }
 0x53a   :  { %995 = vperm.xlu0 %7480, %v911_v55  }
 0x53e   :  { %1047 = vrot.lane.b32.xlu0 %v8153_v35, %s9594_s27  ;;  %s7819_s27 = smov 120  }
 0x5b8   :  { %v1001_v57 = vpop.permute.xlu1 %1000 }
 0x5b9   :  { %v1008_v58 = vadd.f32 %v1006_v56, %v1001_v57  ;;  %v996_v40 = vpop.permute.xlu0 %995 }
 0x5ba   :  { %v1007_v59 = vadd.f32 %v1006_v56, %v996_v40 }
 0x5bb   :  { %vm1010_vm6 = vcmp.gt.f32.partialorder %v1008_v58, 0.0  ;;  %v1012_v60 = vmul.f32 0.1, %v1008_v58 }
 0x5bc   :  { %vm1009_vm7 = vcmp.gt.f32.partialorder %v1007_v59, 0.0  ;;  %v1011_v61 = vmul.f32 0.1, %v1007_v59 }
 0x5bd   :  { %v1014_v62 = vsel %vm1010_vm6, %v1008_v58, %v1012_v60  ;;  %v1048_v63 = vpop.permute.xlu0 %1047  ;;  %v7531_v58 = vld [vmem:[%s9623_s10 + $0x38] sm:$0xff]   ;;  %v1222_v60 = vld [vmem:[%s9624_s29] sm:$0xff] }
 0x5be   :  { %v5645_v1 = vmul.f32 -1.442695, %v1014_v62  ;;  %v1013_v2 = vsel %vm1009_vm7, %v1007_v59, %v1011_v61  ;;  %6503 = vmatpush3.bf16.msra.mxu1 %v1048_v63  ;;  %v1223_v61 = vld [vmem:[%s9624_s29 + $0x8] sm:$0xff]  ;;  %v1224_v62 = vld [vmem:[%s9624_s29 + $0x10] sm:$0xff] }
 0x5bf   :  { %v5644_v3 = vmul.f32 -1.442695, %v1013_v2  ;;  %6508 = vmatprep.subr.bf16.mxu1 %v7814_v0  ;;  %v1225_v2 = vld [vmem:[%s9624_s29 + $0x18] sm:$0xff] }
 0x5c0   :  { %7666 = vpow2.f32 %v5645_v1  ;;  %v7172_v1 = vpack.c.bf16 %v1223_v61, %v1222_v60 }
 0x5c1   :  { %7668 = vpow2.f32 %v5644_v3 }
 0x5c2   :  { %7173 = vmatprep.subr.bf16.mxu0 %v7172_v1 }
 0x5c3   :  { %7175 = vmatpush3.bf16.msra.mxu0 %v7172_v1 }
 0x5ca   :  { %v7667_v35 = vpop.eup %7666 }
 0x5cb   :  { %v7669_v5 = vpop.eup %7668  ;;  %v1022_v7 = vadd.f32 1.0, %v7667_v35  ;;  %v7176_v35 = vpack.c.bf16 %v1225_v2, %v1224_v62 }
 0x5cc   :  { %v1021_v8 = vadd.f32 1.0, %v7669_v5  ;;  %v1226_v5 = vld [vmem:[%s9624_s29 + $0x20] sm:$0xff] }
 0x5cd   :  { %7670 = vrcp.f32 %v1022_v7  ;;  %v1227_v7 = vld [vmem:[%s9624_s29 + $0x28] sm:$0xff]  ;;  %7177 = vmatprep.subr.bf16.mxu0 %v7176_v35 }
 0x5ce   :  { %7672 = vrcp.f32 %v1021_v8  ;;  %7179 = vmatpush3.bf16.msra.mxu0 %v7176_v35 }
 0x5d7   :  { %v7671_v9 = vpop.eup %7670 }
 0x5d8   :  { %v7673_v10 = vpop.eup %7672  ;;  %v1029_v11 = vmul.f32 1.442695, %v7671_v9 }
 0x5d9   :  { %v1027_v14 = vmul.f32 1.442695, %v7673_v10 }
 0x5da   :  { %7674 = vpow2.f32 %v1029_v11  ;;  %v7180_v11 = vpack.c.bf16 %v1227_v7, %v1226_v5 }
 0x5db   :  { %7676 = vpow2.f32 %v1027_v14  ;;  %v1228_v14 = vld [vmem:[%s9624_s29 + $0x30] sm:$0xff] }
 0x5dc   :  { %7181 = vmatprep.subr.bf16.mxu0 %v7180_v11 }
 0x5dd   :  { %7183 = vmatpush3.bf16.msra.mxu0 %v7180_v11 }
 0x5e4   :  { %v7675_v16 = vpop.eup %7674 }
 0x5e5   :  { %v7677_v17 = vpop.eup %7676  ;;  %v1032_v18 = vmul.f32 %v7675_v16, %v8207_v13  ;;  %v1229_v16 = vld [vmem:[%s9624_s29 + $0x38] sm:$0xff] }
 0x5e6   :  { %v1031_v19 = vmul.f32 %v7677_v17, %v8202_v12  ;;  %v7184_v17 = vpack.c.bf16 %v1229_v16, %v1228_v14 }
 0x5e7   :  { %v1034_v20 = vsel %vm96_vm1, %v1032_v18, 0.0 }
 0x5e8   :  { %v1033_v21 = vsel %vm96_vm1, %v1031_v19, 0.0  ;;  %7185 = vmatprep.subr.bf16.mxu0 %v7184_v17 }
 0x5e9   :  { %v1035_v22 = vadd.f32 %v1034_v20, %v1033_v21  ;;  %v1232_v21 = vld [vmem:[%s9624_s29 + $0x50] sm:$0xff]  ;;  %7187 = vmatpush3.bf16.msra.mxu0 %v7184_v17 }
 0x5eb   :  { %v1036_v23 = vrot.slane %v1035_v22, 4 }
 0x5ed   :  { %v1037_v24 = vadd.f32 %v1036_v23, %v1035_v22  ;;  %v1233_v22 = vld [vmem:[%s9624_s29 + $0x58] sm:$0xff] }
 0x5ee   :  { %v7192_v23 = vpack.c.bf16 %v1233_v22, %v1232_v21 }
 0x5ef   :  { %v1038_v26 = vrot.slane %v1037_v24, 2 }
 0x5f1   :  { %v1039_v27 = vadd.f32 %v1038_v26, %v1037_v24  ;;  %v1234_v24 = vld [vmem:[%s9624_s29 + $0x60] sm:$0xff]  ;;  %v1235_v26 = vld [vmem:[%s9624_s29 + $0x68] sm:$0xff] }
 0x5f3   :  { %v1040_v28 = vrot.slane %v1039_v27, 1 }
 0x5f5   :  { %v1041_v29 = vadd.f32 %v1040_v28, %v1039_v27  ;;  %v7196_v27 = vpack.c.bf16 %v1235_v26, %v1234_v24  ;;  %v1236_v28 = vld [vmem:[%s9624_s29 + $0x70] sm:$0xff] }
 0x5f7   :  { %7678 = vrcp.f32 %v1041_v29  ;;  %v1237_v29 = vld [vmem:[%s9624_s29 + $0x78] sm:$0xff] }
 0x601   :  { %v7679_v31 = vpop.eup %7678 }
 0x602   :  { %v1043_v32 = vmul.f32 %v7679_v31, %v1031_v19  ;;  %v1044_v33 = vmul.f32 %v7679_v31, %v1032_v18  ;;  %v1230_v18 = vld [vmem:[%s9624_s29 + $0x40] sm:$0xff]  ;;  %v1231_v19 = vld [vmem:[%s9624_s29 + $0x48] sm:$0xff]  ;;  %v7200_v31 = vpack.c.bf16 %v1237_v29, %v1236_v28  ;;  %s9631_s29 = sld [smem:[#allocation13_spill]] }
 0x603   :  { %v7188_v20 = vpack.c.bf16 %v1231_v19, %v1230_v18 }
 0x604   :  { %v1045_v36 = vpack.c.bf16 %v1044_v33, %v1043_v32  ;;  %v816_v32 = vmin.f32 %v8236_v48, 0.0  ;;  %v817_v33 = vmin.f32 %v8238_v50, 0.0 }
 0x605   :  { %7189 = vmatprep.subr.bf16.mxu0 %v7188_v20 }
 0x606   :  { %6505 = vmatmul.mubr.msk.bf16.vlgmr.msra.gmra.mrb[12].mxu1 %vm96_vm1, %v1045_v36  ;;  %7191 = vmatpush3.bf16.msra.mxu0 %v7188_v20  ;;  %v818_v36 = vmul.f32 1.442695, %v816_v32 }
 0x607   :  { %6524 = vmatprep.mubr.msk.bf16.mxu1 %vm7815_vm0, %v7814_v0  ;;  %6509 = vmatpush3.bf16.msra.mxu1 %v7524_v37  ;;  %v820_v37 = vmul.f32 1.442695, %v817_v33 }
 0x608   :  { %6510 = vmatprep.subr.bf16.mxu1 %v7814_v0  ;;  %7193 = vmatprep.subr.bf16.mxu0 %v7192_v23 }
 0x60a   :  { %7195 = vmatpush3.bf16.msra.mxu0 %v7192_v23 }
 0x60b   :  { %6511 = vmatpush3.bf16.msra.mxu1 %v7525_v41  ;;  %7197 = vmatprep.subr.bf16.mxu0 %v7196_v27 }
 0x60c   :  { %6512 = vmatprep.subr.bf16.mxu1 %v7814_v0 }
 0x60e   :  { %7199 = vmatpush3.bf16.msra.mxu0 %v7196_v27 }
 0x60f   :  { %6513 = vmatpush3.bf16.msra.mxu1 %v7526_v42  ;;  %7201 = vmatprep.subr.bf16.mxu0 %v7200_v31 }
 0x610   :  { %6514 = vmatprep.subr.bf16.mxu1 %v7814_v0 }
 0x612   :  { %7203 = vmatpush3.bf16.msra.mxu0 %v7200_v31 }
 0x613   :  { %6515 = vmatpush3.bf16.msra.mxu1 %v7527_v43  ;;  %6570 = vmatprep.subr.bf16.mxu0 %v7814_v0 }
 0x614   :  { %6516 = vmatprep.subr.bf16.mxu1 %v7814_v0 }
 0x617   :  { %6517 = vmatpush3.bf16.msra.mxu1 %v7528_v44 }
 0x618   :  { %6518 = vmatprep.subr.bf16.mxu1 %v7814_v0 }
 0x61b   :  { %6519 = vmatpush3.bf16.msra.mxu1 %v7529_v45 }
 0x61c   :  { %6520 = vmatprep.subr.bf16.mxu1 %v7814_v0 }
 0x61f   :  { %6521 = vmatpush3.bf16.msra.mxu1 %v7530_v46 }
 0x620   :  { %6522 = vmatprep.subr.bf16.mxu1 %v7814_v0 }
 0x623   :  { %6523 = vmatpush3.bf16.msra.mxu1 %v7531_v58 }
 0x624   :  { %7204 = vmatprep.subr.bf16.mxu1 %v7816_v30 }
 0x6d9   :  { %v1087_v39 = vpop.f32.mrb[12].mxu1 }
 0x6da   :  { %v1096_v47 = vmin.f32 %v1087_v39, 0.0  ;;  %v6506_v49 = vpop.f32.mrb[13].mxu1  ;;  %vm1094_vm8 = vcmp.gt.f32.partialorder %v1087_v39, 0.0 }
 0x6db   :  { %v1090_v53 = vpop.f32.mrb[14].mxu1 }
 0x6dc   :  { %v1098_v54 = vmul.f32 1.442695, %v1096_v47  ;;  %v1097_v55 = vmin.f32 %v1090_v53, 0.0  ;;  %v6507_v56 = vpop.f32.mrb[15].mxu1  ;;  %vm1095_vm9 = vcmp.gt.f32.partialorder %v1090_v53, 0.0 }
 0x6de   :  { %7680 = vpow2.f32 %v1098_v54  ;;  %v1100_v57 = vmul.f32 1.442695, %v1097_v55 }
 0x6e0   :  { %7682 = vpow2.f32 %v1100_v57 }
 0x6e1   :  { %7684 = vpow2.f32 %v818_v36 }
 0x6e2   :  { %7686 = vpow2.f32 %v820_v37 }
 0x6e8   :  { %v7681_v40 = vpop.eup %7680 }
 0x6e9   :  { %v5647_v59 = vadd.f32 -1.0, %v7681_v40 }
 0x6ea   :  { %v7683_v63 = vpop.eup %7682 }
 0x6eb   :  { %v5648_v3 = vadd.f32 -1.0, %v7683_v63  ;;  %v1104_v8 = vsel %vm1094_vm8, %v1087_v39, %v5647_v59  ;;  %v7685_v41 = vpop.eup %7684 }
 0x6ec   :  { %v7687_v42 = vpop.eup %7686  ;;  %v5628_v43 = vadd.f32 -1.0, %v7685_v41 }
 0x6ed   :  { %v1105_v9 = vsel %vm1095_vm9, %v1090_v53, %v5648_v3  ;;  %v5629_v44 = vadd.f32 -1.0, %v7687_v42 }
 0x6ee   :  { %v7482_v10 = vpack.i.bf16 %v1105_v9, %v1104_v8  ;;  %v824_v47 = vsel %vm814_vm10, %v8236_v48, %v5628_v43  ;;  %v1238_v48 = vld [vmem:[%s9626_s30] sm:$0x1]  ;;  %s9629_s30 = sld [smem:[#allocation10_spill]] }
 0x6ef   :  { %v825_v49 = vsel %vm815_vm11, %v8238_v50, %v5629_v44 }
 0x6f0   :  { %7483 = vrot.lane.b32.xlu1 %v7482_v10, %s9625_s7 }
 0x762   :  { %v7484_v45 = vpop.permute.xlu1 %7483 }
 0x763   :  { %v7486_v46 = vunpack.i.h.bf16 %v7484_v45  ;;  %v7485_v39 = vunpack.i.l.bf16 %v7484_v45 }
 0x765   :  { %v1115_v53 = vsel %vm559_vm2, %v825_v49, %v7486_v46  ;;  %v1114_v54 = vsel %vm559_vm2, %v824_v47, %v7485_v39  ;;  %v7533_v46 = vld [vmem:[%s9627_s1 + $0x8] sm:$0xff]   ;;  %v7534_v39 = vld [vmem:[%s9627_s1 + $0x10] sm:$0xff]   ;;  %v7535_v47 = vld [vmem:[%s9627_s1 + $0x18] sm:$0xff]  }
 0x766   :  { %v1132_v55 = vpack.c.bf16 %v1115_v53, %v1114_v54  ;;  %v7536_v49 = vld [vmem:[%s9627_s1 + $0x20] sm:$0xff]   ;;  %v7537_v53 = vld [vmem:[%s9627_s1 + $0x28] sm:$0xff]   ;;  %v7538_v54 = vld [vmem:[%s9627_s1 + $0x30] sm:$0xff]  }
 0x768   :  { %6525 = vmatmul.mubr.bf16.vlgmr.msra.gmra.mrb[16].mxu1 %v1132_v55  ;;  %v7539_v55 = vld [vmem:[%s9627_s1 + $0x38] sm:$0xff]  }
 0x769   :  { %6567 = vmatprep.mubr.msk.f32.mxu1 %vm7815_vm0, %v7814_v0 }
 0x83b   :  { %v1215_v56 = vpop.f32.mrb[16].mxu1 }
 0x83c   :  { %v6526_v57 = vpop.f32.mrb[17].mxu1  ;;  %6560 = vmatprep.mubr.f32.mxu0 %v1215_v56 }
 0x83d   :  { %v1218_v58 = vpop.f32.mrb[18].mxu1  ;;  %v1598_v57 = vld [vmem:[%s9567_s17 + $0x8] sm:$0xff] }
 0x83e   :  { %v7205_v40 = vpack.c.bf16 %v1218_v58, %v1215_v56  ;;  %v6527_v59 = vpop.f32.mrb[19].mxu1  ;;  %6561 = vmatmul.mubr.f32.vlgmr.msra.gmra.mrb[26].mxu0 %v1218_v58  ;;  %v1597_v56 = vld [vmem:[%s9567_s17] sm:$0xff]  ;;  %v1599_v58 = vld [vmem:[%s9567_s17 + $0x10] sm:$0xff] }
 0x83f   :  { %6572 = vmatprep.mubr.msk.bf16.mxu0 %vm7815_vm0, %v7814_v0  ;;  %v1600_v59 = vld [vmem:[%s9567_s17 + $0x18] sm:$0xff] }
 0x840   :  { %7206 = vmatpush3.bf16.xpose.msra.mxu1 %v7205_v40  ;;  %6571 = vmatpush3.bf16.msra.mxu0 %v7205_v40  ;;  %v7207_v40 = vpack.c.bf16 %v1598_v57, %v1597_v56  ;;  %v1898_v56 = vld [vmem:[%s9571_s5] sm:$0xff] }
 0x841   :  { %6576 = vmatprep.subr.bf16.mxu0 %v7814_v0 }
 0x842   :  { %7208 = vmatprep.subr.bf16.mxu1 %v7207_v40 }
 0x847   :  { %6568 = vmatmul.mubr.f32.vlgmr.msra.gmra.mrb[10].mxu1 %v1238_v48  ;;  %v7211_v48 = vpack.c.bf16 %v1600_v59, %v1599_v58 }
 0x848   :  { %7210 = vmatpush3.bf16.msra.mxu1 %v7207_v40 }
 0x849   :  { %7212 = vmatprep.subr.bf16.mxu1 %v7211_v48 }
 0x84c   :  { %7214 = vmatpush3.bf16.msra.mxu1 %v7211_v48 }
 0x911   :  { %v6562_v50 = vpop.f32.mrb[26].mxu0 }
 0x912   :  { %1391 = vperm.xlu1 %7481, %v6562_v50   ;;  %v1305_v60 = vpop.f32.mrb[27].mxu0  ;;  %v1601_v50 = vld [vmem:[%s9567_s17 + $0x20] sm:$0xff] }
 0x913   :  { %1386 = vperm.xlu0 %7480, %v1305_v60   ;;  %v1602_v60 = vld [vmem:[%s9567_s17 + $0x28] sm:$0xff] }
 0x91a   :  { %v1380_v61 = vpop.f32.mrb[10].mxu1 }
 0x91b   :  { %v6569_v62 = vpop.f32.mrb[11].mxu1  ;;  %v1397_v63 = vrot.slane %v1380_v61, %v8196_v52  ;;  %v7215_v61 = vpack.c.bf16 %v1602_v60, %v1601_v50 }
 0x91c   :  { %v1603_v62 = vld [vmem:[%s9567_s17 + $0x30] sm:$0xff] }
 0x91d   :  { %7216 = vmatprep.subr.bf16.mxu1 %v7215_v61 }
 0x91e   :  { %7218 = vmatpush3.bf16.msra.mxu1 %v7215_v61 }
 0x991   :  { %v1392_v1 = vpop.permute.xlu1 %1391 }
 0x992   :  { %v1399_v2 = vadd.f32 %v1397_v63, %v1392_v1  ;;  %v1387_v3 = vpop.permute.xlu0 %1386 }
 0x993   :  { %v1398_v35 = vadd.f32 %v1397_v63, %v1387_v3  ;;  %v1604_v63 = vld [vmem:[%s9567_s17 + $0x38] sm:$0xff]  ;;  %v1606_v3 = vld [vmem:[%s9567_s17 + $0x48] sm:$0xff] }
 0x994   :  { %vm1401_vm12 = vcmp.gt.f32.partialorder %v1399_v2, 0.0  ;;  %v1403_v5 = vmul.f32 0.1, %v1399_v2  ;;  %v7219_v1 = vpack.c.bf16 %v1604_v63, %v1603_v62 }
 0x995   :  { %vm1400_vm13 = vcmp.gt.f32.partialorder %v1398_v35, 0.0  ;;  %v1402_v7 = vmul.f32 0.1, %v1398_v35 }
 0x996   :  { %v1405_v8 = vsel %vm1401_vm12, %v1399_v2, %v1403_v5  ;;  %v1605_v2 = vld [vmem:[%s9567_s17 + $0x40] sm:$0xff]  ;;  %7220 = vmatprep.subr.bf16.mxu1 %v7219_v1  ;;  %v1607_v5 = vld [vmem:[%s9567_s17 + $0x50] sm:$0xff] }
 0x997   :  { %v5658_v9 = vmul.f32 -1.442695, %v1405_v8  ;;  %v1404_v10 = vsel %vm1400_vm13, %v1398_v35, %v1402_v7  ;;  %v7223_v35 = vpack.c.bf16 %v1606_v3, %v1605_v2  ;;  %v1608_v7 = vld [vmem:[%s9567_s17 + $0x58] sm:$0xff]  ;;  %7222 = vmatpush3.bf16.msra.mxu1 %v7219_v1 }
 0x998   :  { %v5657_v11 = vmul.f32 -1.442695, %v1404_v10  ;;  %v7227_v8 = vpack.c.bf16 %v1608_v7, %v1607_v5  ;;  %v1610_v10 = vld [vmem:[%s9567_s17 + $0x68] sm:$0xff] }
 0x999   :  { %7688 = vpow2.f32 %v5658_v9  ;;  %7224 = vmatprep.subr.bf16.mxu1 %v7223_v35  ;;  %v1609_v9 = vld [vmem:[%s9567_s17 + $0x60] sm:$0xff] }
 0x99a   :  { %7690 = vpow2.f32 %v5657_v11  ;;  %v7231_v11 = vpack.c.bf16 %v1610_v10, %v1609_v9 }
 0x99b   :  { %7226 = vmatpush3.bf16.msra.mxu1 %v7223_v35 }
 0x99c   :  { %7228 = vmatprep.subr.bf16.mxu1 %v7227_v8 }
 0x99f   :  { %7230 = vmatpush3.bf16.msra.mxu1 %v7227_v8 }
 0x9a0   :  { %7232 = vmatprep.subr.bf16.mxu1 %v7231_v11 }
 0x9a3   :  { %v7689_v14 = vpop.eup %7688  ;;  %7234 = vmatpush3.bf16.msra.mxu1 %v7231_v11 }
 0x9a4   :  { %v7691_v16 = vpop.eup %7690  ;;  %v1413_v17 = vadd.f32 1.0, %v7689_v14 }
 0x9a5   :  { %v1412_v18 = vadd.f32 1.0, %v7691_v16 }
 0x9a6   :  { %7692 = vrcp.f32 %v1413_v17 }
 0x9a7   :  { %7694 = vrcp.f32 %v1412_v18 }
 0x9b0   :  { %v7693_v19 = vpop.eup %7692 }
 0x9b1   :  { %v7695_v20 = vpop.eup %7694  ;;  %v1420_v21 = vmul.f32 1.442695, %v7693_v19 }
 0x9b2   :  { %v1418_v22 = vmul.f32 1.442695, %v7695_v20 }
 0x9b3   :  { %7696 = vpow2.f32 %v1420_v21 }
 0x9b4   :  { %7698 = vpow2.f32 %v1418_v22  ;;  %v1611_v22 = vld [vmem:[%s9567_s17 + $0x70] sm:$0xff] }
 0x9bd   :  { %v7697_v23 = vpop.eup %7696 }
 0x9be   :  { %v7699_v24 = vpop.eup %7698  ;;  %v1423_v26 = vmul.f32 %v7697_v23, %v8207_v13  ;;  %v7532_v13 = vld [vmem:[%s9627_s1] sm:$0xff]   ;;  %v1612_v23 = vld [vmem:[%s9567_s17 + $0x78] sm:$0xff] }
 0x9bf   :  { %v1422_v27 = vmul.f32 %v7699_v24, %v8202_v12  ;;  %v7235_v24 = vpack.c.bf16 %v1612_v23, %v1611_v22 }
 0x9c0   :  { %v1425_v28 = vsel %vm96_vm1, %v1423_v26, 0.0 }
 0x9c1   :  { %v1424_v29 = vsel %vm96_vm1, %v1422_v27, 0.0  ;;  %7236 = vmatprep.subr.bf16.mxu1 %v7235_v24 }
 0x9c2   :  { %v1426_v31 = vadd.f32 %v1425_v28, %v1424_v29  ;;  %7238 = vmatpush3.bf16.msra.mxu1 %v7235_v24 }
 0x9c3   :  { %6631 = vmatprep.subr.mxu1 %v7814_v0 }
 0x9c4   :  { %v1427_v32 = vrot.slane %v1426_v31, 4 }
 0x9c6   :  { %v1428_v33 = vadd.f32 %v1427_v32, %v1426_v31 }
 0x9c8   :  { %v1429_v36 = vrot.slane %v1428_v33, 2 }
 0x9ca   :  { %v1430_v37 = vadd.f32 %v1429_v36, %v1428_v33 }
 0x9cc   :  { %v1431_v41 = vrot.slane %v1430_v37, 1 }
 0x9ce   :  { %v1432_v42 = vadd.f32 %v1431_v41, %v1430_v37 }
 0x9d0   :  { %7700 = vrcp.f32 %v1432_v42 }
 0x9da   :  { %v7701_v43 = vpop.eup %7700 }
 0x9db   :  { %v1434_v44 = vmul.f32 %v7701_v43, %v1422_v27  ;;  %v1435_v45 = vmul.f32 %v7701_v43, %v1423_v26  ;;  %v5660_v26 = vld [vmem:[%s9568_s16] ss:$0 sm:$0xff] }
 0x9dd   :  { %v1436_v12 = vpack.c.bf16 %v1435_v45, %v1434_v44  ;;  %v1689_v44 = vld [vmem:[%s9569_s18] sm:$0xff] }
 0x9df   :  { %6573 = vmatmul.mubr.msk.bf16.vlgmr.msra.gmra.mrb[28].mxu0 %vm96_vm1, %v1436_v12 }
 0x9e0   :  { %6577 = vmatpush3.bf16.msra.mxu0 %v7532_v13  ;;  %6592 = vmatprep.mubr.msk.bf16.mxu0 %vm7815_vm0, %v7814_v0 }
 0x9e1   :  { %6578 = vmatprep.subr.bf16.mxu0 %v7814_v0 }
 0x9e4   :  { %6579 = vmatpush3.bf16.msra.mxu0 %v7533_v46 }
 0x9e5   :  { %6580 = vmatprep.subr.bf16.mxu0 %v7814_v0 }
 0x9e8   :  { %6581 = vmatpush3.bf16.msra.mxu0 %v7534_v39 }
 0x9e9   :  { %6582 = vmatprep.subr.bf16.mxu0 %v7814_v0 }
 0x9ec   :  { %6583 = vmatpush3.bf16.msra.mxu0 %v7535_v47 }
 0x9ed   :  { %6584 = vmatprep.subr.bf16.mxu0 %v7814_v0 }
 0x9f0   :  { %6585 = vmatpush3.bf16.msra.mxu0 %v7536_v49 }
 0x9f1   :  { %6586 = vmatprep.subr.bf16.mxu0 %v7814_v0 }
 0x9f4   :  { %6587 = vmatpush3.bf16.msra.mxu0 %v7537_v53  ;;  %v1688_v53 = vld [vmem:[%s9570_s19] sm:$0xff] }
 0x9f5   :  { %6588 = vmatprep.subr.bf16.mxu0 %v7814_v0 }
 0x9f8   :  { %6589 = vmatpush3.bf16.msra.mxu0 %v7538_v54 }
 0x9f9   :  { %6590 = vmatprep.subr.bf16.mxu0 %v7814_v0 }
 0x9fc   :  { %6591 = vmatpush3.bf16.msra.mxu0 %v7539_v55 }
 0x9fd   :  { %6636 = vmatprep.subr.mxu0 %v7814_v0 }
 0xab2   :  { %v1475_v14 = vpop.f32.mrb[28].mxu0 }
 0xab3   :  { %v6574_v16 = vpop.f32.mrb[29].mxu0  ;;  %v1482_v18 = vmax.f32 %v1475_v14, 0.0 }
 0xab4   :  { %v1478_v17 = vpop.f32.mrb[30].mxu0 }
 0xab5   :  { %v1483_v19 = vmax.f32 %v1478_v17, 0.0  ;;  %v6575_v20 = vpop.f32.mrb[31].mxu0 }
 0xab7   :  { %v1500_v21 = vpack.c.bf16 %v1483_v19, %v1482_v18 }
 0xab9   :  { %6593 = vmatmul.mubr.bf16.vlgmr.msra.gmra.mrb[32].mxu0 %v1500_v21 }
 0xaba   :  { %6638 = vmatprep.mubr.msk.f32.mxu0 %vm7815_vm0, %v7814_v0 }
 0xb8c   :  { %v1590_v27 = vpop.f32.mrb[32].mxu0 }
 0xb8d   :  { %v8443_v28 = vadd.f32 %v5660_v26, %v1590_v27  ;;  %v6594_v29 = vpop.f32.mrb[33].mxu0 }
 0xb8e   :  { %v1593_v31 = vpop.f32.mrb[34].mxu0 }
 0xb8f   :  { %v8445_v32 = vadd.f32 %v5660_v26, %v1593_v31  ;;  %v6595_v33 = vpop.f32.mrb[35].mxu0  ;;  %6628 = vmatprep.mubr.f32.mxu1 %v8443_v28 }
 0xb91   :  { %v2313_v36 = vpack.c.bf16 %v8445_v32, %v8443_v28  ;;  %6629 = vmatmul.mubr.f32.vlgmr.msra.gmra.mrb[20].mxu1 %v8445_v32 }
 0xb92   :  { %6633 = vmatprep.mubr.msk.f32.mxu1 %vm7815_vm0, %v7814_v0 }
 0xc64   :  { %v6630_v37 = vpop.f32.mrb[20].mxu1 }
 0xc65   :  { %v1679_v41 = vpop.f32.mrb[21].mxu1 }
 0xc66   :  { %1690 = vxpose.xlu1.b32.start.end [1/1] (short) (narrow) %v1679_v41, 8  ;;  %1723 = vrot.lane.b32.xlu0 %v1679_v41, %s7819_s27 }
 0xc6a   :  { %2045 = vrot.lane.b32.xlu0 %v6630_v37, %s7819_s27 }
 0xc88   :  { %2012 = vxpose.xlu0.b32.start.end [1/1] (short) (narrow) %v6630_v37, 8 }
 0xcd8   :  { %v1724_v42 = vpop.permute.xlu0 %1723 }
 0xcd9   :  { %6632 = vmatpush3.msra.mxu1 %v1724_v42 }
 0xcda   :  { %6641 = vmatprep.subr.mxu1 %v7814_v0 }
 0xcdc   :  { %v2046_v49 = vpop.permute.xlu0 %2045 }
 0xce6   :  { %v1706_v43 = vpop.trf.xlu1 }
 0xce7   :  { %6634 = vmatmul.mubr.msk.f32.vlgmr.msra.gmra.mrb[22].mxu1 %vm1726_vm14, %v1706_v43 }
 0xce8   :  { %6643 = vmatprep.mubr.msk.f32.mxu1 %vm7815_vm0, %v7814_v0  ;;  %6642 = vmatpush3.msra.mxu1 %v1898_v56 }
 0xce9   :  { %6651 = vmatprep.subr.mxu1 %v7814_v0 }
 0xd08   :  { %v2028_v55 = vpop.trf.xlu0 }
 0xdba   :  { %v1796_v45 = vpop.f32.mrb[22].mxu1 }
 0xdbb   :  { %v1797_v13 = vadd.f32 %v1796_v45, %v1689_v44  ;;  %v6635_v12 = vpop.f32.mrb[23].mxu1 }
 0xdbd   :  { %v5670_v46 = vmul.f32 -1.442695, %v1797_v13 }
 0xdbf   :  { %7702 = vpow2.f32 %v5670_v46 }
 0xdc9   :  { %v7703_v39 = vpop.eup %7702 }
 0xdca   :  { %v1803_v47 = vadd.f32 1.0, %v7703_v39 }
 0xdcc   :  { %7704 = vrcp.f32 %v1803_v47 }
 0xdd6   :  { %v7705_v54 = vpop.eup %7704 }
 0xdd7   :  { %6637 = vmatpush3.msra.mxu0 %v7705_v54 }
 0xdd8   :  { %6639 = vmatmul.mubr.msk.f32.vlgmr.msra.gmra.mrb[36].mxu0 %vm1726_vm14, %v1688_v53  ;;  %6646 = vmatprep.subr.mxu0 %v7814_v0 }
 0xdd9   :  { %6647 = vmatpush3.msra.mxu0 %v2046_v49  ;;  %6648 = vmatprep.mubr.msk.f32.mxu0 %vm7815_vm0, %v7814_v0 }
 0xdda   :  { %6656 = vmatprep.subr.mxu0 %v7814_v0 }
 0xddc   :  { %6649 = vmatmul.mubr.msk.f32.vlgmr.msra.gmra.mrb[38].mxu0 %vm1726_vm14, %v2028_v55 }
 0xddd   :  { %6658 = vmatprep.mubr.msk.f32.mxu0 %vm7815_vm0, %v7814_v0  ;;  %6657 = vmatpush3.msra.mxu0 %v1898_v56 }
 0xdde   :  { %6661 = vmatprep.subr.bf16.mxu0 %v7814_v0 }
 0xeab   :  { %v1875_v57 = vpop.f32.mrb[36].mxu0 }
 0xeac   :  { %v1879_v58 = vsel %vm1726_vm14, %v1875_v57, -inf  ;;  %v6640_v40 = vpop.f32.mrb[37].mxu0 }
 0xead   :  { %v1880_v59 = vrot.slane %v1879_v58, 4  ;;  %v7542_v40 = vld [vmem:[%s9572_s20 + $0x10] sm:$0xff]  }
 0xeaf   :  { %v1881_v48 = vmax.f32 %v1879_v58, %v1880_v59  ;;  %v2117_v50 = vpop.f32.mrb[38].mxu0  ;;  %v7541_v58 = vld [vmem:[%s9572_s20 + $0x8] sm:$0xff]   ;;  %v7543_v59 = vld [vmem:[%s9572_s20 + $0x18] sm:$0xff]  }
 0xeb0   :  { %v6650_v60 = vpop.f32.mrb[39].mxu0  ;;  %v2118_v35 = vadd.f32 %v2117_v50, %v1689_v44  ;;  %v7545_v50 = vld [vmem:[%s9572_s20 + $0x28] sm:$0xff]  }
 0xeb1   :  { %v1882_v61 = vrot.slane %v1881_v48, 2  ;;  %v7546_v60 = vld [vmem:[%s9572_s20 + $0x30] sm:$0xff]  }
 0xeb2   :  { %v5674_v5 = vmul.f32 -1.442695, %v2118_v35 }
 0xeb3   :  { %v1883_v62 = vmax.f32 %v1881_v48, %v1882_v61  ;;  %v7544_v48 = vld [vmem:[%s9572_s20 + $0x20] sm:$0xff]   ;;  %v7547_v61 = vld [vmem:[%s9572_s20 + $0x38] sm:$0xff]  }
 0xeb5   :  { %v1884_v63 = vrot.slane %v1883_v62, 1 }
 0xeb7   :  { %v1885_v1 = vmax.f32 %v1883_v62, %v1884_v63  ;;  %v2471_v62 = vld [vmem:[%s9573_s3] sm:$0xff]  ;;  %v2472_v63 = vld [vmem:[%s9573_s3 + $0x8] sm:$0xff] }
 0xeb9   :  { %v1886_v2 = vsub.f32 %v1875_v57, %v1885_v1  ;;  %v7540_v57 = vld [vmem:[%s9572_s20] sm:$0xff]   ;;  %v2473_v1 = vld [vmem:[%s9573_s3 + $0x10] sm:$0xff] }
 0xebb   :  { %v1887_v3 = vmul.f32 1.442695, %v1886_v2  ;;  %v8533_v2 = vpack.c.bf16 %v2472_v63, %v2471_v62  ;;  %v1981_v62 = vld [vmem:[%s9574_s4 + $0x48] sm:$0xff] }
 0xebd   :  { %7706 = vpow2.f32 %v1887_v3  ;;  %v2474_v3 = vld [vmem:[%s9573_s3 + $0x18] sm:$0xff] }
 0xebe   :  { %7708 = vpow2.f32 %v5674_v5  ;;  %v8538_v35 = vpack.c.bf16 %v2474_v3, %v2473_v1  ;;  %v2476_v5 = vld [vmem:[%s9573_s3 + $0x28] sm:$0xff] }
 0xec7   :  { %v7707_v7 = vpop.eup %7706 }
 0xec8   :  { %v1889_v8 = vsel %vm1726_vm14, %v7707_v7, 0.0  ;;  %v7709_v14 = vpop.eup %7708 }
 0xec9   :  { %v1890_v9 = vrot.slane %v1889_v8, 4  ;;  %v2124_v18 = vadd.f32 1.0, %v7709_v14  ;;  %v2480_v14 = vld [vmem:[%s9573_s3 + $0x48] sm:$0xff] }
 0xecb   :  { %v1891_v10 = vadd.f32 %v1890_v9, %v1889_v8  ;;  %v2477_v8 = vld [vmem:[%s9573_s3 + $0x30] sm:$0xff]  ;;  %v2478_v9 = vld [vmem:[%s9573_s3 + $0x38] sm:$0xff] }
 0xecd   :  { %v1892_v11 = vrot.slane %v1891_v10, 2 }
 0xecf   :  { %v1893_v16 = vadd.f32 %v1892_v11, %v1891_v10  ;;  %v8559_v10 = vpack.c.bf16 %v2478_v9, %v2477_v8  ;;  %v2479_v11 = vld [vmem:[%s9573_s3 + $0x40] sm:$0xff]  ;;  %v1982_v9 = vld [vmem:[%s9574_s4 + $0x50] sm:$0xff] }
 0xed1   :  { %v1894_v17 = vrot.slane %v1893_v16, 1 }
 0xed3   :  { %v1895_v19 = vadd.f32 %v1894_v17, %v1893_v16  ;;  %v8569_v16 = vpack.c.bf16 %v2480_v14, %v2479_v11  ;;  %v2481_v17 = vld [vmem:[%s9573_s3 + $0x50] sm:$0xff]  ;;  %v1983_v11 = vld [vmem:[%s9574_s4 + $0x58] sm:$0xff] }
 0xed5   :  { %7710 = vrcp.f32 %v1895_v19 }
 0xed6   :  { %7712 = vrcp.f32 %v2124_v18  ;;  %v2482_v18 = vld [vmem:[%s9573_s3 + $0x58] sm:$0xff] }
 0xed7   :  { %v8580_v19 = vpack.c.bf16 %v2482_v18, %v2481_v17 }
 0xedf   :  { %v7711_v20 = vpop.eup %7710 }
 0xee0   :  { %v7713_v21 = vpop.eup %7712  ;;  %v1897_v22 = vmul.f32 %v7711_v20, %v7707_v7  ;;  %v1972_v20 = vld [vmem:[%s9574_s4] sm:$0xff] }
 0xee2   :  { %6644 = vmatmul.mubr.msk.f32.vlgmr.msra.gmra.mrb[24].mxu1 %vm1726_vm14, %v1897_v22 }
 0xee3   :  { %6652 = vmatpush3.msra.mxu1 %v7713_v21  ;;  %6653 = vmatprep.mubr.msk.f32.mxu1 %vm7815_vm0, %v7814_v0  ;;  %v1973_v21 = vld [vmem:[%s9574_s4 + $0x8] sm:$0xff] }
 0xee6   :  { %6654 = vmatmul.mubr.msk.f32.vlgmr.msra.gmra.mrb[26].mxu1 %vm1726_vm14, %v1688_v53 }
 0xee7   :  { %2346 = vmatprep.mubr.bf16.mxu1 %v7818_v38 }
 0xfb5   :  { %v8485_v23 = vpop.f32.mrb[24].mxu1 }
 0xfb6   :  { %v6645_v24 = vpop.f32.mrb[25].mxu1  ;;  %v1997_v8 = vmul.f32 %v1981_v62, %v8485_v23 }
 0xfb7   :  { %v1988_v24 = vmul.f32 %v1972_v20, %v8485_v23 }
 0xfb9   :  { %v2193_v26 = vpop.f32.mrb[26].mxu1 }
 0xfba   :  { %v2197_v27 = vsel %vm1726_vm14, %v2193_v26, -inf  ;;  %v6655_v29 = vpop.f32.mrb[27].mxu1 }
 0xfbb   :  { %v2198_v31 = vrot.slane %v2197_v27, 4  ;;  %v1975_v29 = vld [vmem:[%s9574_s4 + $0x18] sm:$0xff] }
 0xfbd   :  { %v2199_v33 = vmax.f32 %v2197_v27, %v2198_v31  ;;  %v1974_v27 = vld [vmem:[%s9574_s4 + $0x10] sm:$0xff] }
 0xfbf   :  { %v2200_v37 = vrot.slane %v2199_v33, 2 }
 0xfc1   :  { %v2201_v41 = vmax.f32 %v2199_v33, %v2200_v37 }
 0xfc3   :  { %v2202_v42 = vrot.slane %v2201_v41, 1 }
 0xfc5   :  { %v2203_v43 = vmax.f32 %v2201_v41, %v2202_v42 }
 0xfc7   :  { %v2204_v44 = vsub.f32 %v2193_v26, %v2203_v43  ;;  %v1989_v26 = vmul.f32 %v1973_v21, %v8485_v23 }
 0xfc9   :  { %v2205_v45 = vmul.f32 1.442695, %v2204_v44  ;;  %v2004_v44 = vpack.c.bf16 %v1989_v26, %v1988_v24  ;;  %v1999_v24 = vmul.f32 %v1983_v11, %v8485_v23  ;;  %v1984_v26 = vld [vmem:[%s9574_s4 + $0x60] sm:$0xff] }
 0xfcb   :  { %7714 = vpow2.f32 %v2205_v45  ;;  %v1990_v45 = vmul.f32 %v1974_v27, %v8485_v23 }
 0xfd5   :  { %v7715_v13 = vpop.eup %7714 }
 0xfd6   :  { %v2207_v12 = vsel %vm1726_vm14, %v7715_v13, 0.0 }
 0xfd7   :  { %v2208_v46 = vrot.slane %v2207_v12, 4 }
 0xfd9   :  { %v2209_v39 = vadd.f32 %v2208_v46, %v2207_v12  ;;  %v1976_v12 = vld [vmem:[%s9574_s4 + $0x20] sm:$0xff]  ;;  %v1977_v46 = vld [vmem:[%s9574_s4 + $0x28] sm:$0xff] }
 0xfdb   :  { %v2210_v47 = vrot.slane %v2209_v39, 2 }
 0xfdd   :  { %v2211_v49 = vadd.f32 %v2210_v47, %v2209_v39 }
 0xfdf   :  { %v2212_v53 = vrot.slane %v2211_v49, 1 }
 0xfe1   :  { %v2213_v54 = vadd.f32 %v2212_v53, %v2211_v49 }
 0xfe3   :  { %7716 = vrcp.f32 %v2213_v54  ;;  %v1992_v54 = vmul.f32 %v1976_v12, %v8485_v23 }
 0xfed   :  { %v7717_v55 = vpop.eup %7716 }
 0xfee   :  { %v2215_v56 = vmul.f32 %v7717_v55, %v7715_v13  ;;  %v1991_v13 = vmul.f32 %v1975_v29, %v8485_v23  ;;  %v1993_v55 = vmul.f32 %v1977_v46, %v8485_v23 }
 0xff0   :  { %6659 = vmatmul.mubr.msk.f32.vlgmr.msra.gmra.mrb[40].mxu0 %vm1726_vm14, %v2215_v56  ;;  %v2005_v53 = vpack.c.bf16 %v1991_v13, %v1990_v45  ;;  %v1978_v56 = vld [vmem:[%s9574_s4 + $0x30] sm:$0xff] }
 0xff1   :  { %6677 = vmatprep.mubr.msk.bf16.mxu0 %vm7815_vm0, %v7814_v0  ;;  %6662 = vmatpush3.bf16.msra.mxu0 %v7540_v57  ;;  %v1979_v57 = vld [vmem:[%s9574_s4 + $0x38] sm:$0xff] }
 0xff2   :  { %6663 = vmatprep.subr.bf16.mxu0 %v7814_v0 }
 0xff5   :  { %6664 = vmatpush3.bf16.msra.mxu0 %v7541_v58 }
 0xff6   :  { %6665 = vmatprep.subr.bf16.mxu0 %v7814_v0 }
 0xff9   :  { %6666 = vmatpush3.bf16.msra.mxu0 %v7542_v40 }
 0xffa   :  { %6667 = vmatprep.subr.bf16.mxu0 %v7814_v0 }
 0xffd   :  { %6668 = vmatpush3.bf16.msra.mxu0 %v7543_v59 }
 0xffe   :  { %6669 = vmatprep.subr.bf16.mxu0 %v7814_v0 }
0x1001   :  { %6670 = vmatpush3.bf16.msra.mxu0 %v7544_v48  ;;  %v2006_v48 = vpack.c.bf16 %v1993_v55, %v1992_v54  ;;  %v2484_v54 = vld [vmem:[%s9573_s3 + $0x68] sm:$0xff] }
0x1002   :  { %6671 = vmatprep.subr.bf16.mxu0 %v7814_v0 }
0x1005   :  { %6672 = vmatpush3.bf16.msra.mxu0 %v7545_v50  ;;  %v1994_v50 = vmul.f32 %v1978_v56, %v8485_v23 }
0x1006   :  { %6673 = vmatprep.subr.bf16.mxu0 %v7814_v0 }
0x1009   :  { %6674 = vmatpush3.bf16.msra.mxu0 %v7546_v60  ;;  %v1995_v60 = vmul.f32 %v1979_v57, %v8485_v23 }
0x100a   :  { %6675 = vmatprep.subr.bf16.mxu0 %v7814_v0 }
0x100d   :  { %6676 = vmatpush3.bf16.msra.mxu0 %v7547_v61  ;;  %v1980_v61 = vld [vmem:[%s9574_s4 + $0x40] sm:$0xff] }
0x100e   :  { %7272 = vmatprep.subr.bf16.mxu0 %v8533_v2 }
0x1010   :  { %6678 = vmatmul.mubr.bf16.vlgmr.msra.gmra.mrb[44].mxu0 %v7967_v4  ;;  %v2475_v4 = vld [vmem:[%s9573_s3 + $0x20] sm:$0xff] }
0x1011   :  { %7274 = vmatpush3.bf16.msra.mxu0 %v8533_v2  ;;  %v8549_v7 = vpack.c.bf16 %v2476_v5, %v2475_v4  ;;  %v2007_v4 = vpack.c.bf16 %v1995_v60, %v1994_v50  ;;  %v1996_v5 = vmul.f32 %v1980_v61, %v8485_v23 }
0x1012   :  { %7276 = vmatprep.subr.bf16.mxu0 %v8538_v35 }
0x1015   :  { %7278 = vmatpush3.bf16.msra.mxu0 %v8538_v35 }
0x1016   :  { %7280 = vmatprep.subr.bf16.mxu0 %v8549_v7 }
0x1019   :  { %7282 = vmatpush3.bf16.msra.mxu0 %v8549_v7 }
0x101a   :  { %7284 = vmatprep.subr.bf16.mxu0 %v8559_v10 }
0x101d   :  { %7286 = vmatpush3.bf16.msra.mxu0 %v8559_v10 }
0x101e   :  { %7288 = vmatprep.subr.bf16.mxu0 %v8569_v16 }
0x1021   :  { %7290 = vmatpush3.bf16.msra.mxu0 %v8569_v16 }
0x1022   :  { %7292 = vmatprep.subr.bf16.mxu0 %v8580_v19 }
0x1025   :  { %7294 = vmatpush3.bf16.msra.mxu0 %v8580_v19 }
0x10c3   :  { %v8590_v22 = vpop.f32.mrb[40].mxu0 }
0x10c4   :  { %v6660_v31 = vpop.f32.mrb[41].mxu0  ;;  %v2289_v33 = vmul.f32 %v8590_v22, %v1972_v20  ;;  %v2290_v37 = vmul.f32 %v8590_v22, %v1973_v21  ;;  %v2291_v41 = vmul.f32 %v8590_v22, %v1974_v27  ;;  %v2292_v42 = vmul.f32 %v8590_v22, %v1975_v29  ;;  %v1985_v27 = vld [vmem:[%s9574_s4 + $0x68] sm:$0xff] }
0x10c5   :  { %v2293_v47 = vmul.f32 %v8590_v22, %v1976_v12  ;;  %v2294_v49 = vmul.f32 %v8590_v22, %v1977_v46  ;;  %v2295_v40 = vmul.f32 %v8590_v22, %v1978_v56  ;;  %v2296_v59 = vmul.f32 %v8590_v22, %v1979_v57  ;;  %v2485_v56 = vld [vmem:[%s9573_s3 + $0x70] sm:$0xff]  ;;  %v2486_v57 = vld [vmem:[%s9573_s3 + $0x78] sm:$0xff] }
0x10c6   :  { %v2305_v43 = vpack.c.bf16 %v2290_v37, %v2289_v33  ;;  %v2306_v39 = vpack.c.bf16 %v2292_v42, %v2291_v41  ;;  %v2297_v1 = vmul.f32 %v8590_v22, %v1980_v61  ;;  %v2298_v3 = vmul.f32 %v8590_v22, %v1981_v62 }
0x10c7   :  { %v2307_v58 = vpack.c.bf16 %v2294_v49, %v2293_v47  ;;  %v2308_v63 = vpack.c.bf16 %v2296_v59, %v2295_v40  ;;  %v2299_v17 = vmul.f32 %v8590_v22, %v1982_v9  ;;  %v2300_v18 = vmul.f32 %v8590_v22, %v1983_v11  ;;  %v5677_v40 = vld [vmem:[%s9575_s21] ss:$0 sm:$0xff]  ;;  %v7551_v11 = vld [vmem:[%s9576_s24 + $0x10] ss:$8 sps:$4 sm:$0xff]  }
0x10c8   :  { %2314 = vmatprep.subr.bf16.mxu1 %v2305_v43  ;;  %v2309_v14 = vpack.c.bf16 %v2298_v3, %v2297_v1  ;;  %v2008_v20 = vpack.c.bf16 %v1997_v8, %v1996_v5  ;;  %v1998_v21 = vmul.f32 %v1982_v9, %v8485_v23  ;;  %v2301_v31 = vmul.f32 %v8590_v22, %v1984_v26  ;;  %v1986_v43 = vld [vmem:[%s9574_s4 + $0x70] sm:$0xff]  ;;  %v7548_v5 = vld [vmem:[%s9576_s24] ss:$8 sps:$4 sm:$0xff]   ;;  %v7550_v8 = vld [vmem:[%s9576_s24 + $0x4] ss:$8 sps:$4 sm:$0xff]  }
0x10c9   :  { %2315 = vmatpush1.bf16.msra.mxu1 %v2004_v44  ;;  %v2310_v29 = vpack.c.bf16 %v2300_v18, %v2299_v17  ;;  %v2302_v33 = vmul.f32 %v8590_v22, %v1985_v27  ;;  %v2000_v41 = vmul.f32 %v1984_v26, %v8485_v23  ;;  %v2001_v42 = vmul.f32 %v1985_v27, %v8485_v23  ;;  %v1987_v44 = vld [vmem:[%s9574_s4 + $0x78] sm:$0xff]  ;;  %v7554_v17 = vld [vmem:[%s9576_s24 + $0x20] ss:$8 sps:$4 sm:$0xff]  }
0x10ca   :  { %2316 = vmatprep.subr.bf16.mxu1 %v2306_v39  ;;  %v2009_v37 = vpack.c.bf16 %v1999_v24, %v1998_v21  ;;  %v2303_v13 = vmul.f32 %v8590_v22, %v1986_v43  ;;  %v2304_v12 = vmul.f32 %v8590_v22, %v1987_v44  ;;  %v2002_v39 = vmul.f32 %v1986_v43, %v8485_v23  ;;  %v2483_v22 = vld [vmem:[%s9573_s3 + $0x60] sm:$0xff]  ;;  %v7553_v9 = vld [vmem:[%s9576_s24 + $0x14] ss:$8 sps:$4 sm:$0xff]  }
0x10cb   :  { %v2311_v45 = vpack.c.bf16 %v2302_v33, %v2301_v31  ;;  %v2010_v46 = vpack.c.bf16 %v2001_v42, %v2000_v41  ;;  %v2003_v47 = vmul.f32 %v1987_v44, %v8485_v23  ;;  %v8687_v55 = vpack.c.bf16 %v2484_v54, %v2483_v22  ;;  %v7557_v31 = vld [vmem:[%s9576_s24 + $0x30] ss:$8 sps:$4 sm:$0xff]   ;;  %v7562_v33 = vld [vmem:[%s9576_s24 + $0x44] ss:$8 sps:$4 sm:$0xff]   ;;  %v7565_v41 = vld [vmem:[%s9576_s24 + $0x54] ss:$8 sps:$4 sm:$0xff]  }
0x10cc   :  { %v2312_v49 = vpack.c.bf16 %v2304_v12, %v2303_v13  ;;  %v7563_v42 = vld [vmem:[%s9576_s24 + $0x50] ss:$8 sps:$4 sm:$0xff]   ;;  %v7568_v43 = vld [vmem:[%s9576_s24 + $0x64] ss:$8 sps:$4 sm:$0xff]   ;;  %v7566_v44 = vld [vmem:[%s9576_s24 + $0x60] ss:$8 sps:$4 sm:$0xff]  }
0x10cd   :  { %2317 = vmatpush1.bf16.msra.mxu1 %v2005_v53  ;;  %v2011_v53 = vpack.c.bf16 %v2003_v47, %v2002_v39  ;;  %7296 = vmatprep.subr.bf16.mxu0 %v8687_v55  ;;  %v7569_v13 = vld [vmem:[%s9576_s24 + $0x70] ss:$8 sps:$4 sm:$0xff]  }
0x10ce   :  { %2318 = vmatprep.subr.bf16.mxu1 %v2307_v58  ;;  %7298 = vmatpush3.bf16.msra.mxu0 %v8687_v55  ;;  %v8699_v58 = vpack.c.bf16 %v2486_v57, %v2485_v56 }
0x10d0   :  { %7300 = vmatprep.subr.bf16.mxu0 %v8699_v58 }
0x10d1   :  { %2319 = vmatpush1.bf16.msra.mxu1 %v2006_v48 }
0x10d2   :  { %2320 = vmatprep.subr.bf16.mxu1 %v2308_v63  ;;  %7302 = vmatpush3.bf16.msra.mxu0 %v8699_v58 }
0x10d3   :  { %6751 = vmatprep.subr.bf16.mxu0 %v7814_v0 }
0x10d5   :  { %2321 = vmatpush1.bf16.msra.mxu1 %v2007_v4 }
0x10d6   :  { %2322 = vmatprep.subr.bf16.mxu1 %v2309_v14  ;;  %v7556_v14 = vld [vmem:[%s9576_s24 + $0x24] ss:$8 sps:$4 sm:$0xff]  }
0x10d9   :  { %2323 = vmatpush1.bf16.msra.mxu1 %v2008_v20 }
0x10da   :  { %2324 = vmatprep.subr.bf16.mxu1 %v2310_v29  ;;  %v7559_v29 = vld [vmem:[%s9576_s24 + $0x34] ss:$8 sps:$4 sm:$0xff]  }
0x10dd   :  { %2325 = vmatpush1.bf16.msra.mxu1 %v2009_v37  ;;  %v7560_v37 = vld [vmem:[%s9576_s24 + $0x40] ss:$8 sps:$4 sm:$0xff]  }
0x10de   :  { %2326 = vmatprep.subr.bf16.mxu1 %v2311_v45  ;;  %v7571_v45 = vld [vmem:[%s9576_s24 + $0x74] ss:$8 sps:$4 sm:$0xff]  }
0x10e1   :  { %2327 = vmatpush1.bf16.msra.mxu1 %v2010_v46 }
0x10e2   :  { %2328 = vmatprep.subr.bf16.mxu1 %v2312_v49 }
0x10e3   :  { %v2460_v28 = vpop.f32.mrb[44].mxu0 }
0x10e4   :  { %v6679_v32 = vpop.f32.mrb[45].mxu0  ;;  %v2461_v59 = vadd.f32 %v5677_v40, %v2460_v28 }
0x10e5   :  { %2329 = vmatpush1.bf16.msra.mxu1 %v2011_v53  ;;  %v5686_v53 = vld [vmem:[%s9577_s22] ss:$0 sm:$0xff] }
0x10e6   :  { %7240 = vmatprep.subr.bf16.mxu1 %v8533_v2 }
0x10e8   :  { %2347 = vmatmul.mubr.bf16.vlgmr.msra.gmra.mrb[28].mxu1 %v2313_v36  ;;  %v2463_v36 = vpop.f32.mrb[46].mxu0 }
0x10e9   :  { %7242 = vmatpush3.bf16.msra.mxu1 %v8533_v2  ;;  %v6680_v23 = vpop.f32.mrb[47].mxu0  ;;  %v2464_v61 = vadd.f32 %v5677_v40, %v2463_v36 }
0x10ea   :  { %7244 = vmatprep.subr.bf16.mxu1 %v8538_v35  ;;  %v5687_v23 = vld [vmem:[%s9578_s23] ss:$0 sm:$0xff] }
0x10ed   :  { %7246 = vmatpush3.bf16.msra.mxu1 %v8538_v35 }
0x10ee   :  { %7248 = vmatprep.subr.bf16.mxu1 %v8549_v7 }
0x10f1   :  { %7250 = vmatpush3.bf16.msra.mxu1 %v8549_v7 }
0x10f2   :  { %7252 = vmatprep.subr.bf16.mxu1 %v8559_v10 }
0x10f5   :  { %7254 = vmatpush3.bf16.msra.mxu1 %v8559_v10 }
0x10f6   :  { %7256 = vmatprep.subr.bf16.mxu1 %v8569_v16 }
0x10f9   :  { %7258 = vmatpush3.bf16.msra.mxu1 %v8569_v16 }
0x10fa   :  { %7260 = vmatprep.subr.bf16.mxu1 %v8580_v19 }
0x10fd   :  { %7262 = vmatpush3.bf16.msra.mxu1 %v8580_v19 }
0x10fe   :  { %7264 = vmatprep.subr.bf16.mxu1 %v8687_v55 }
0x1101   :  { %7266 = vmatpush3.bf16.msra.mxu1 %v8687_v55 }
0x1102   :  { %7268 = vmatprep.subr.bf16.mxu1 %v8699_v58 }
0x1105   :  { %7270 = vmatpush3.bf16.msra.mxu1 %v8699_v58 }
0x1106   :  { %2772 = vmatprep.subr.bf16.mxu1 %v7550_v8  ;;  %v7792_v8 = vld [vmem:[%s9614_s12] sm:$0xff] }
0x11bb   :  { %v2348_v48 = vpop.f32.mrb[28].mxu1 }
0x11bc   :  { %v2467_v50 = vadd.f32 %v2461_v59, %v2348_v48  ;;  %v2350_v60 = vpop.f32.mrb[29].mxu1  ;;  %v7577_v59 = vld [vmem:[%s9616_s15 + $0x140] sm:$0xff]   ;;  %v7580_v48 = vld [vmem:[%s9616_s15 + $0x148] sm:$0xff]  }
0x11bd   :  { %v2351_v62 = vpop.f32.mrb[30].mxu1  ;;  %v2680_v60 = vld [vmem:[%s9579_s25] sm:$0x3] }
0x11be   :  { %v2469_v63 = vmax.f32 %v2467_v50, 0.0  ;;  %v2352_v1 = vpop.f32.mrb[31].mxu1  ;;  %v7583_v50 = vld [vmem:[%s9616_s15 + $0x150] sm:$0xff]  }
0x11bf   :  { %v2468_v3 = vadd.f32 %v2464_v61, %v2352_v1  ;;  %v2685_v61 = vrot.slane %v2680_v60, %v8196_v52 }
0x11c0   :  { %6713 = vmatprep.mubr.f32.mxu1 %v2469_v63 }
0x11c1   :  { %v2470_v4 = vmax.f32 %v2468_v3, 0.0 }
0x11c3   :  { %6714 = vmatmul.mubr.f32.vlgmr.msra.gmra.mrb[32].mxu1 %v2470_v4 }
0x11c4   :  { %2804 = vmatprep.mubr.bf16.mxu1 %v7818_v38  ;;  %2773 = vmatpush1.bf16.msra.mxu1 %v7548_v5 }
0x11c5   :  { %2774 = vmatprep.subr.bf16.mxu1 %v7553_v9 }
0x11c8   :  { %2775 = vmatpush1.bf16.msra.mxu1 %v7551_v11  ;;  %v7793_v11 = vld [vmem:[%s9614_s12 + $0x8] sm:$0xff] }
0x11c9   :  { %2776 = vmatprep.subr.bf16.mxu1 %v7556_v14 }
0x11cc   :  { %2777 = vmatpush1.bf16.msra.mxu1 %v7554_v17  ;;  %v7572_v17 = vld [vmem:[%s9616_s15 + $0x100] sm:$0xff]  }
0x11cd   :  { %2778 = vmatprep.subr.bf16.mxu1 %v7559_v29  ;;  %v7581_v29 = vld [vmem:[%s9616_s15 + $0xd8] sm:$0xff]  }
0x11d0   :  { %2779 = vmatpush1.bf16.msra.mxu1 %v7557_v31  ;;  %v7582_v31 = vld [vmem:[%s9616_s15 + $0x120] sm:$0xff]  }
0x11d1   :  { %2780 = vmatprep.subr.bf16.mxu1 %v7562_v33  ;;  %v7584_v33 = vld [vmem:[%s9616_s15 + $0xe0] sm:$0xff]  }
0x11d4   :  { %2781 = vmatpush1.bf16.msra.mxu1 %v7560_v37  ;;  %v7586_v37 = vld [vmem:[%s9616_s15 + $0x158] sm:$0xff]  }
0x11d5   :  { %2782 = vmatprep.subr.bf16.mxu1 %v7565_v41  ;;  %v7587_v41 = vld [vmem:[%s9616_s15 + $0xe8] sm:$0xff]  }
0x11d8   :  { %2783 = vmatpush1.bf16.msra.mxu1 %v7563_v42  ;;  %v7588_v42 = vld [vmem:[%s9616_s15 + $0x130] sm:$0xff]  }
0x11d9   :  { %2784 = vmatprep.subr.bf16.mxu1 %v7568_v43  ;;  %v7590_v43 = vld [vmem:[%s9616_s15 + $0xf0] sm:$0xff]  }
0x11dc   :  { %2785 = vmatpush1.bf16.msra.mxu1 %v7566_v44  ;;  %v7591_v44 = vld [vmem:[%s9616_s15 + $0x138] sm:$0xff]  }
0x11dd   :  { %2786 = vmatprep.subr.bf16.mxu1 %v7571_v45  ;;  %v7592_v45 = vld [vmem:[%s9616_s15 + $0x168] sm:$0xff]  }
0x11e0   :  { %2787 = vmatpush1.bf16.msra.mxu1 %v7569_v13  ;;  %v7593_v13 = vld [vmem:[%s9616_s15 + $0xf8] sm:$0xff]  }
0x11e1   :  { %6765 = vmatprep.subr.bf16.mxu1 %v7814_v0 }
0x1296   :  { %v6715_v18 = vpop.f32.mrb[32].mxu1 }
0x1297   :  { %v2563_v20 = vsub.f32 %v2470_v4, %v6715_v18  ;;  %v2553_v21 = vpop.f32.mrb[33].mxu1 }
0x1298   :  { %v2562_v24 = vsub.f32 %v2469_v63, %v2553_v21  ;;  %v7574_v21 = vld [vmem:[%s9616_s15 + $0x108] sm:$0xff]  }
0x1299   :  { %v2565_v27 = vmul.f32 %v2563_v20, %v2563_v20 }
0x129a   :  { %v2564_v26 = vmul.f32 %v2562_v24, %v2562_v24 }
0x129c   :  { %6748 = vmatprep.mubr.f32.mxu0 %v2564_v26  ;;  %v7576_v26 = vld [vmem:[%s9616_s15 + $0x110] sm:$0xff]  }
0x129d   :  { %6749 = vmatmul.mubr.f32.vlgmr.msra.gmra.mrb[42].mxu0 %v2565_v27  ;;  %v7578_v27 = vld [vmem:[%s9616_s15 + $0xd0] sm:$0xff]  }
0x129e   :  { %6753 = vmatprep.mubr.msk.bf16.mxu0 %vm7815_vm0, %v7814_v0 }
0x1370   :  { %v6750_v12 = vpop.f32.mrb[42].mxu0 }
0x1371   :  { %v2638_v46 = vadd.f32 1e-05, %v6750_v12  ;;  %v2632_v39 = vpop.f32.mrb[43].mxu0  ;;  %v7594_v12 = vld [vmem:[%s9616_s15 + $0x170] sm:$0xff]  }
0x1372   :  { %v2633_v47 = vadd.f32 1e-05, %v2632_v39 }
0x1373   :  { %7718 = vrsqrt.f32 %v2638_v46  ;;  %v7595_v46 = vld [vmem:[%s9616_s15 + $0x178] sm:$0xff]  }
0x1374   :  { %7720 = vrsqrt.f32 %v2633_v47 }
0x137d   :  { %v7719_v49 = vpop.eup %7718 }
0x137e   :  { %v7721_v28 = vpop.eup %7720  ;;  %v2644_v32 = vmul.f32 %v7719_v49, %v2563_v20  ;;  %v7573_v20 = vld [vmem:[%s9616_s15 + $0xc0] sm:$0xff]  }
0x137f   :  { %v2643_v36 = vmul.f32 %v7721_v28, %v2562_v24  ;;  %v7575_v24 = vld [vmem:[%s9616_s15 + $0xc8] sm:$0xff]  }
0x1380   :  { %v2653_v22 = vmul.f32 %v5686_v53, %v2644_v32 }
0x1381   :  { %v2652_v54 = vmul.f32 %v5686_v53, %v2643_v36 }
0x1382   :  { %v2662_v56 = vadd.f32 %v5687_v23, %v2653_v22 }
0x1383   :  { %v2661_v57 = vadd.f32 %v5687_v23, %v2652_v54 }
0x1385   :  { %v2679_v40 = vpack.c.bf16 %v2662_v56, %v2661_v57  ;;  %v7596_v56 = vld [vmem:[%s9617_s0 + $0x40] sm:$0xff]   ;;  %v7597_v57 = vld [vmem:[%s9617_s0 + $0x48] sm:$0xff]  }
0x1387   :  { %2805 = vmatmul.mubr.bf16.vlgmr.msra.gmra.mrb[36].mxu1 %v2679_v40 }
0x1388   :  { %6781 = vmatprep.mubr.msk.bf16.mxu1 %vm7815_vm0, %v7814_v0  ;;  %6766 = vmatpush3.bf16.msra.mxu1 %v7577_v59 }
0x1389   :  { %6767 = vmatprep.subr.bf16.mxu1 %v7814_v0 }
0x138c   :  { %6768 = vmatpush3.bf16.msra.mxu1 %v7580_v48 }
0x138d   :  { %6769 = vmatprep.subr.bf16.mxu1 %v7814_v0 }
0x1390   :  { %6770 = vmatpush3.bf16.msra.mxu1 %v7583_v50 }
0x1391   :  { %6771 = vmatprep.subr.bf16.mxu1 %v7814_v0 }
0x1394   :  { %6772 = vmatpush3.bf16.msra.mxu1 %v7586_v37 }
0x1395   :  { %6773 = vmatprep.subr.bf16.mxu1 %v7814_v0 }
0x145a   :  { %v2806_v62 = vpop.f32.mrb[36].mxu1 }
0x145b   :  { %v2807_v63 = vadd.f32 %v2806_v62, %v2685_v61  ;;  %v8785_v1 = vpop.f32.mrb[37].mxu1  ;;  %v7599_v62 = vld [vmem:[%s9617_s0 + $0x58] sm:$0xff]  }
0x145c   :  { %v2810_v3 = vpop.f32.mrb[38].mxu1 }
0x145d   :  { %v2811_v4 = vadd.f32 %v2810_v3, %v2685_v61  ;;  %v8787_v5 = vpop.f32.mrb[39].mxu1  ;;  %v2815_v9 = vsub.f32 %v7792_v8, %v2807_v63  ;;  %v7598_v61 = vld [vmem:[%s9617_s0 + $0x50] sm:$0xff]   ;;  %v7600_v63 = vld [vmem:[%s9617_s0 + $0x60] sm:$0xff]   ;;  %v7601_v3 = vld [vmem:[%s9617_s0 + $0x68] sm:$0xff]  }
0x145e   :  { %v7603_v8 = vld [vmem:[%s9617_s0 + $0x78] sm:$0xff]  }
0x145f   :  { %v2816_v14 = vsub.f32 %v7793_v11, %v2811_v4  ;;  %v7602_v4 = vld [vmem:[%s9617_s0 + $0x70] sm:$0xff]   ;;  %v5804_v11 = vld [vmem:[%s9618_s8 + $0x88] sm:$0xff] }
0x1461   :  { %v8798_v18 = vpack.c.bf16 %v2816_v14, %v2815_v9  ;;  %v5803_v9 = vld [vmem:[%s9618_s8 + $0x80] sm:$0xff]  ;;  %v5805_v14 = vld [vmem:[%s9618_s8 + $0x90] sm:$0xff] }
0x1463   :  { %6752 = vmatpush3.bf16.msra.mxu0 %v8798_v18 }
0x1464   :  { %6195 = vmatprep.subr.bf16.mxu0 %v7572_v17  ;;  %v7303_v17 = vpack.c.bf16 %v5804_v11, %v5803_v9  ;;  %v5829_v9 = vld [vmem:[%s9618_s8 + $0xf8] sm:$0xff] }
0x1466   :  { %6754 = vmatmul.mubr.msk.bf16.vlgmr.msra.gmra.mrb[48].mxu0 %vm96_vm1, %v7972_v6  ;;  %v7579_v6 = vld [vmem:[%s9616_s15 + $0x118] sm:$0xff]  }
0x1467   :  { %6757 = vmatprep.mubr.msk.bf16.mxu0 %vm7815_vm0, %v7814_v0  ;;  %6196 = vmatpush3.bf16.msra.mxu0 %v7573_v20  ;;  %v5806_v20 = vld [vmem:[%s9618_s8 + $0x98] sm:$0xff] }
0x1468   :  { %6197 = vmatprep.subr.bf16.mxu0 %v7574_v21  ;;  %v7307_v21 = vpack.c.bf16 %v5806_v20, %v5805_v14 }
0x146b   :  { %6198 = vmatpush3.bf16.msra.mxu0 %v7575_v24  ;;  %v5807_v24 = vld [vmem:[%s9618_s8 + $0xa0] sm:$0xff] }
0x146c   :  { %6199 = vmatprep.subr.bf16.mxu0 %v7576_v26  ;;  %v5808_v26 = vld [vmem:[%s9618_s8 + $0xa8] sm:$0xff] }
0x146e   :  { %6758 = vmatmul.mubr.msk.bf16.gmra.mrb[52].mxu0 %vm96_vm1, %v8004_v15  ;;  %v7585_v15 = vld [vmem:[%s9616_s15 + $0x128] sm:$0xff]  }
0x146f   :  { %6761 = vmatprep.mubr.msk.bf16.mxu0 %vm7815_vm0, %v7814_v0  ;;  %6200 = vmatpush3.bf16.msra.mxu0 %v7578_v27  ;;  %v7311_v27 = vpack.c.bf16 %v5808_v26, %v5807_v24 }
0x1470   :  { %6201 = vmatprep.subr.bf16.mxu0 %v7579_v6  ;;  %v5809_v6 = vld [vmem:[%s9618_s8 + $0xb0] sm:$0xff] }
0x1473   :  { %6202 = vmatpush3.bf16.msra.mxu0 %v7581_v29  ;;  %v5810_v29 = vld [vmem:[%s9618_s8 + $0xb8] sm:$0xff] }
0x1474   :  { %6203 = vmatprep.subr.bf16.mxu0 %v7582_v31  ;;  %v7315_v31 = vpack.c.bf16 %v5810_v29, %v5809_v6 }
0x1476   :  { %6762 = vmatmul.mubr.msk.bf16.gmra.mrb[56].mxu0 %vm96_vm1, %v8039_v25  ;;  %v7589_v25 = vld [vmem:[%s9616_s15 + $0x160] sm:$0xff]  }
0x1477   :  { %6204 = vmatpush3.bf16.msra.mxu0 %v7584_v33  ;;  %6774 = vmatpush3.bf16.msra.mxu1 %v7589_v25 }
0x1478   :  { %6205 = vmatprep.subr.bf16.mxu0 %v7585_v15  ;;  %6775 = vmatprep.subr.bf16.mxu1 %v7814_v0 }
0x147b   :  { %6206 = vmatpush3.bf16.msra.mxu0 %v7587_v41  ;;  %6776 = vmatpush3.bf16.msra.mxu1 %v7592_v45 }
0x147c   :  { %6207 = vmatprep.subr.bf16.mxu0 %v7588_v42  ;;  %6777 = vmatprep.subr.bf16.mxu1 %v7814_v0 }
0x147f   :  { %6208 = vmatpush3.bf16.msra.mxu0 %v7590_v43  ;;  %6778 = vmatpush3.bf16.msra.mxu1 %v7594_v12 }
0x1480   :  { %6209 = vmatprep.subr.bf16.mxu0 %v7591_v44  ;;  %6779 = vmatprep.subr.bf16.mxu1 %v7814_v0 }
0x1483   :  { %6210 = vmatpush3.bf16.msra.mxu0 %v7593_v13  ;;  %6780 = vmatpush3.bf16.msra.mxu1 %v7595_v46 }
0x1484   :  { %6785 = vmatprep.subr.bf16.mxu0 %v7814_v0  ;;  %7304 = vmatprep.subr.bf16.mxu1 %v7303_v17 }
0x1539   :  { %v2854_v39 = vpop.f32.mrb[48].mxu0 }
0x153a   :  { %v6755_v47 = vpop.f32.mrb[49].mxu0 }
0x153b   :  { %v2857_v49 = vpop.f32.mrb[50].mxu0 }
0x153c   :  { %v2926_v53 = vpack.c.bf16 %v2857_v49, %v2854_v39  ;;  %v6756_v28 = vpop.f32.mrb[51].mxu0 }
0x1541   :  { %v2862_v32 = vpop.f32.mrb[52].mxu0 }
0x1542   :  { %v6759_v36 = vpop.f32.mrb[53].mxu0 }
0x1543   :  { %v2865_v23 = vpop.f32.mrb[54].mxu0 }
0x1544   :  { %v2927_v22 = vpack.c.bf16 %v2865_v23, %v2862_v32  ;;  %v6760_v54 = vpop.f32.mrb[55].mxu0 }
0x1546   :  { %3105 = vmatprep.mubr.bf16.mxu0 %v2927_v22 }
0x1547   :  { %3106 = vmatmul.mubr.bf16.vlgmr.msra.gmra.mrb[60].mxu0 %v2926_v53 }
0x1548   :  { %6786 = vmatpush3.bf16.msra.mxu0 %v7596_v56  ;;  %6801 = vmatprep.mubr.msk.bf16.mxu0 %vm7815_vm0, %v7814_v0  ;;  %v5811_v56 = vld [vmem:[%s9621_s13 + $0x2] sm:$0x1] }
0x1549   :  { %v2870_v40 = vpop.f32.mrb[56].mxu0  ;;  %6787 = vmatprep.subr.bf16.mxu0 %v7814_v0 }
0x154a   :  { %v6763_v59 = vpop.f32.mrb[57].mxu0 }
0x154b   :  { %v2873_v48 = vpop.f32.mrb[58].mxu0  ;;  %v5824_v59 = vld [vmem:[%s9618_s8 + $0xd0] sm:$0xff] }
0x154c   :  { %v2928_v50 = vpack.c.bf16 %v2873_v48, %v2870_v40  ;;  %v6764_v60 = vpop.f32.mrb[59].mxu0  ;;  %6788 = vmatpush3.bf16.msra.mxu0 %v7597_v57  ;;  %v5822_v57 = vld [vmem:[%s9618_s8 + $0xc0] sm:$0xff]  ;;  %v5823_v40 = vld [vmem:[%s9618_s8 + $0xc8] sm:$0xff] }
0x154d   :  { %6789 = vmatprep.subr.bf16.mxu0 %v7814_v0  ;;  %v7323_v48 = vpack.c.bf16 %v5823_v40, %v5822_v57 }
0x154e   :  { %6782 = vmatmul.mubr.bf16.vlgmr.msra.gmra.mrb[40].mxu1 %v2928_v50  ;;  %v5825_v50 = vld [vmem:[%s9618_s8 + $0xd8] sm:$0xff] }
0x154f   :  { %7306 = vmatpush3.bf16.msra.mxu1 %v7303_v17  ;;  %v7327_v60 = vpack.c.bf16 %v5825_v50, %v5824_v59 }
0x1550   :  { %6790 = vmatpush3.bf16.msra.mxu0 %v7598_v61  ;;  %7308 = vmatprep.subr.bf16.mxu1 %v7307_v21 }
0x1551   :  { %6791 = vmatprep.subr.bf16.mxu0 %v7814_v0 }
0x1553   :  { %7310 = vmatpush3.bf16.msra.mxu1 %v7307_v21 }
0x1554   :  { %6792 = vmatpush3.bf16.msra.mxu0 %v7599_v62  ;;  %7312 = vmatprep.subr.bf16.mxu1 %v7311_v27 }
0x1555   :  { %6793 = vmatprep.subr.bf16.mxu0 %v7814_v0 }
0x1557   :  { %7314 = vmatpush3.bf16.msra.mxu1 %v7311_v27 }
0x1558   :  { %6794 = vmatpush3.bf16.msra.mxu0 %v7600_v63  ;;  %7316 = vmatprep.subr.bf16.mxu1 %v7315_v31  ;;  %v5826_v63 = vld [vmem:[%s9618_s8 + $0xe0] sm:$0xff] }
0x1559   :  { %6795 = vmatprep.subr.bf16.mxu0 %v7814_v0 }
0x155b   :  { %7318 = vmatpush3.bf16.msra.mxu1 %v7315_v31 }
0x155c   :  { %6796 = vmatpush3.bf16.msra.mxu0 %v7601_v3  ;;  %7324 = vmatprep.subr.bf16.mxu1 %v7323_v48  ;;  %v5827_v3 = vld [vmem:[%s9618_s8 + $0xe8] sm:$0xff] }
0x155d   :  { %6797 = vmatprep.subr.bf16.mxu0 %v7814_v0 }
0x1560   :  { %6798 = vmatpush3.bf16.msra.mxu0 %v7602_v4  ;;  %v7331_v4 = vpack.c.bf16 %v5827_v3, %v5826_v63 }
0x1561   :  { %6799 = vmatprep.subr.bf16.mxu0 %v7814_v0 }
0x1564   :  { %6800 = vmatpush3.bf16.msra.mxu0 %v7603_v8  ;;  %v5828_v8 = vld [vmem:[%s9618_s8 + $0xf0] sm:$0xff] }
0x1565   :  { %7319 = vmatprep.subr.bf16.mxu0 %v7816_v30  ;;  %v7335_v11 = vpack.c.bf16 %v5829_v9, %v5828_v8  ;;  %v5830_v8 = vld [vmem:[%s9621_s13 + $0x3] sm:$0x1]  ;;  %s9633_s13 = sld [smem:[#allocation15_spill]] }
0x161a   :  { %v6211_v33 = vpop.f32.mrb[60].mxu0 }
0x161b   :  { %v6212_v15 = vpop.f32.mrb[61].mxu0 }
0x161c   :  { %v6213_v37 = vadd.f32 %v6212_v15, %v6211_v33  ;;  %v6214_v41 = vpop.f32.mrb[62].mxu0 }
0x161d   :  { %v6215_v42 = vpop.f32.mrb[63].mxu0 }
0x161e   :  { %v6216_v25 = vadd.f32 %v6215_v42, %v6214_v41 }
0x1621   :  { %v3148_v43 = vpop.f32.mrb[40].mxu1 }
0x1622   :  { %v3149_v44 = vadd.f32 %v6213_v37, %v3148_v43  ;;  %v6783_v45 = vpop.f32.mrb[41].mxu1 }
0x1623   :  { %v3151_v13 = vpop.f32.mrb[42].mxu1 }
0x1624   :  { %v3155_v12 = vmul.f32 0.5, %v3149_v44  ;;  %v3152_v46 = vadd.f32 %v6216_v25, %v3151_v13  ;;  %v6784_v39 = vpop.f32.mrb[43].mxu1 }
0x1626   :  { %v3156_v47 = vmul.f32 0.5, %v3152_v46  ;;  %v3157_v49 = vmax.f32 %v3155_v12, 0.0 }
0x1628   :  { %v3158_v53 = vmax.f32 %v3156_v47, 0.0 }
0x162a   :  { %v3176_v28 = vpack.c.bf16 %v3158_v53, %v3157_v49  ;;  %v8984_v53 = vld [vmem:[%s9622_s28 + $0x8] sm:$0xff] }
0x162c   :  { %6802 = vmatmul.mubr.bf16.vlgmr.msra.gmra.mrb[64].mxu0 %v3176_v28 }
0x162d   :  { %6828 = vmatprep.mubr.msk.f32.mxu0 %vm7815_vm0, %v7814_v0 }
0x16ff   :  { %v3259_v32 = vpop.f32.mrb[64].mxu0 }
0x1700   :  { %v6803_v36 = vpop.f32.mrb[65].mxu0  ;;  %6821 = vmatprep.mubr.msk.f32.mxu1 %vm559_vm2, %v3259_v32 }
0x1701   :  { %v3262_v23 = vpop.f32.mrb[66].mxu0 }
0x1702   :  { %v8937_v22 = vpack.c.bf16 %v3262_v23, %v3259_v32  ;;  %v6804_v54 = vpop.f32.mrb[67].mxu0  ;;  %6822 = vmatmul.mubr.msk.f32.vlgmr.msra.gmra.mrb[34].mxu1 %vm559_vm2, %v3262_v23 }
0x1703   :  { %7326 = vmatpush3.bf16.msra.mxu1 %v7323_v48 }
0x1704   :  { %7322 = vmatpush3.bf16.xpose.msk.msra.mxu0 %vm8149_vm3, %v8937_v22  ;;  %7328 = vmatprep.subr.bf16.mxu1 %v7327_v60 }
0x1705   :  { %6831 = vmatprep.subr.bf16.mxu0 %v7814_v0 }
0x1707   :  { %7330 = vmatpush3.bf16.msra.mxu1 %v7327_v60 }
0x1708   :  { %7332 = vmatprep.subr.bf16.mxu1 %v7331_v4 }
0x170b   :  { %6829 = vmatmul.mubr.msk.f32.vlgmr.msra.gmra.mrb[68].mxu0 %vm559_vm2, %v5811_v56  ;;  %7334 = vmatpush3.bf16.msra.mxu1 %v7331_v4 }
0x170c   :  { %6832 = vmatpush3.bf16.msra.mxu0 %v8937_v22  ;;  %6833 = vmatprep.mubr.msk.bf16.mxu0 %vm7815_vm0, %v7814_v0 }
0x170d   :  { %7339 = vmatprep.subr.bf16.mxu0 %v7816_v30  ;;  %7336 = vmatprep.subr.bf16.mxu1 %v7335_v11 }
0x170f   :  { %7338 = vmatpush3.bf16.msra.mxu1 %v7335_v11 }
0x17d5   :  { %v6823_v61 = vpop.f32.mrb[34].mxu1 }
0x17d6   :  { %3438 = vperm.xlu1 %7481, %v6823_v61   ;;  %v3349_v62 = vpop.f32.mrb[35].mxu1 }
0x17d7   :  { %3433 = vperm.xlu0 %7480, %v3349_v62  }
0x17da   :  { %3552 = vrot.lane.b32.xlu1 %v3259_v32, %s9625_s7  ;;  %v8990_v32 = vld [vmem:[%s9622_s28] sm:$0xff] }
0x17de   :  { %3554 = vrot.lane.b32.xlu1 %v3262_v23, %s9625_s7  ;;  %v3427_v14 = vpop.f32.mrb[68].mxu0 }
0x17df   :  { %v6830_v17 = vpop.f32.mrb[69].mxu0  ;;  %v3444_v20 = vrot.slane %v3427_v14, %v8196_v52 }
0x1855   :  { %v3439_v21 = vpop.permute.xlu1 %3438 }
0x1856   :  { %v3446_v24 = vadd.f32 %v3444_v20, %v3439_v21  ;;  %v3434_v26 = vpop.permute.xlu0 %3433 }
0x1857   :  { %v3445_v27 = vadd.f32 %v3444_v20, %v3434_v26 }
0x1858   :  { %vm3448_vm15 = vcmp.gt.f32.partialorder %v3446_v24, 0.0  ;;  %v3450_v6 = vmul.f32 0.1, %v3446_v24 }
0x1859   :  { %vm3447_vm4 = vcmp.gt.f32.partialorder %v3445_v27, 0.0  ;;  %v3449_v29 = vmul.f32 0.1, %v3445_v27  ;;  %v3553_v31 = vpop.permute.xlu1 %3552 }
0x185a   :  { %v3452_v33 = vsel %vm3448_vm15, %v3446_v24, %v3450_v6  ;;  %6853 = vmatprep.mubr.msk.f32.mxu1 %vm559_vm2, %v3553_v31 }
0x185b   :  { %v5818_v15 = vmul.f32 -1.442695, %v3452_v33  ;;  %v3451_v37 = vsel %vm3447_vm4, %v3445_v27, %v3449_v29 }
0x185c   :  { %v5817_v41 = vmul.f32 -1.442695, %v3451_v37 }
0x185d   :  { %7722 = vpow2.f32 %v5818_v15  ;;  %v3555_v42 = vpop.permute.xlu1 %3554 }
0x185e   :  { %7724 = vpow2.f32 %v5817_v41  ;;  %6854 = vmatmul.mubr.msk.f32.vlgmr.msra.gmra.mrb[44].mxu1 %vm559_vm2, %v3555_v42  ;;  %v7340_v4 = vpack.c.bf16 %v3555_v42, %v3553_v31 }
0x1867   :  { %v7723_v25 = vpop.eup %7722 }
0x1868   :  { %v7725_v43 = vpop.eup %7724  ;;  %v3460_v44 = vadd.f32 1.0, %v7723_v25 }
0x1869   :  { %v3459_v45 = vadd.f32 1.0, %v7725_v43 }
0x186a   :  { %7726 = vrcp.f32 %v3460_v44 }
0x186b   :  { %7728 = vrcp.f32 %v3459_v45 }
0x1874   :  { %v7727_v13 = vpop.eup %7726 }
0x1875   :  { %v7729_v12 = vpop.eup %7728  ;;  %v3467_v46 = vmul.f32 1.442695, %v7727_v13 }
0x1876   :  { %v3465_v39 = vmul.f32 1.442695, %v7729_v12 }
0x1877   :  { %7730 = vpow2.f32 %v3467_v46 }
0x1878   :  { %7732 = vpow2.f32 %v3465_v39 }
0x1881   :  { %v7731_v47 = vpop.eup %7730 }
0x1882   :  { %v7733_v49 = vpop.eup %7732  ;;  %v3470_v28 = vmul.f32 %v8984_v53, %v7731_v47 }
0x1883   :  { %v3469_v36 = vmul.f32 %v8990_v32, %v7733_v49 }
0x1884   :  { %v3472_v23 = vsel %vm96_vm1, %v3470_v28, 0.0 }
0x1885   :  { %v3471_v54 = vsel %vm96_vm1, %v3469_v36, 0.0 }
0x1886   :  { %v3473_v56 = vadd.f32 %v3472_v23, %v3471_v54 }
0x1888   :  { %v3474_v57 = vrot.slane %v3473_v56, 4 }
0x188a   :  { %v3475_v40 = vadd.f32 %v3474_v57, %v3473_v56 }
0x188c   :  { %v3476_v59 = vrot.slane %v3475_v40, 2 }
0x188e   :  { %v3477_v48 = vadd.f32 %v3476_v59, %v3475_v40 }
0x1890   :  { %v3478_v50 = vrot.slane %v3477_v48, 1 }
0x1892   :  { %v3479_v60 = vadd.f32 %v3478_v50, %v3477_v48 }
0x1894   :  { %7734 = vrcp.f32 %v3479_v60 }
0x189e   :  { %v7735_v61 = vpop.eup %7734 }
0x189f   :  { %v3481_v62 = vmul.f32 %v7735_v61, %v3469_v36  ;;  %v3482_v63 = vmul.f32 %v7735_v61, %v3470_v28 }
0x18a1   :  { %v3483_v3 = vpack.c.bf16 %v3482_v63, %v3481_v62 }
0x18a3   :  { %6834 = vmatmul.mubr.msk.bf16.vlgmr.msra.gmra.mrb[72].mxu0 %vm96_vm1, %v3483_v3 }
0x18a4   :  { %7342 = vmatpush3.bf16.xpose.msk.msra.mxu0 %vm8149_vm3, %v7340_v4  ;;  %6860 = vmatprep.mubr.msk.f32.mxu0 %vm7815_vm0, %v7814_v0 }
0x18a5   :  { %6863 = vmatprep.subr.bf16.mxu0 %v7814_v0 }
0x18ab   :  { %6861 = vmatmul.mubr.msk.f32.vlgmr.msra.gmra.mrb[70].mxu0 %vm559_vm2, %v5830_v8  ;;  %v7604_v8 = vld [vmem:[%s9628_s26 + $0x40] sm:$0xff]  }
0x18ac   :  { %6865 = vmatprep.mubr.msk.bf16.mxu0 %vm7815_vm0, %v7814_v0 }
0x1931   :  { %v6855_v9 = vpop.f32.mrb[44].mxu1 }
0x1932   :  { %3715 = vperm.xlu1 %7481, %v6855_v9   ;;  %v3626_v11 = vpop.f32.mrb[45].mxu1  ;;  %v7605_v9 = vld [vmem:[%s9628_s26 + $0x48] sm:$0xff]  }
0x1933   :  { %3710 = vperm.xlu0 %7480, %v3626_v11   ;;  %v7606_v11 = vld [vmem:[%s9628_s26 + $0x50] sm:$0xff]  }
0x1937   :  { %3762 = vrot.lane.b32.xlu0 %v8937_v22, %s9625_s7 }
0x1976   :  { %v9009_v34 = vpop.f32.mrb[72].mxu0 }
0x1977   :  { %v6835_v14 = vpop.f32.mrb[73].mxu0  ;;  %vm3529_vm8 = vcmp.gt.f32.partialorder %v9009_v34, 0.0 }
0x1978   :  { %v9011_v17 = vpop.f32.mrb[74].mxu0  ;;  %v7607_v14 = vld [vmem:[%s9628_s26 + $0x58] sm:$0xff]  }
0x1979   :  { %v6836_v20 = vpop.f32.mrb[75].mxu0  ;;  %vm3530_vm9 = vcmp.gt.f32.partialorder %v9011_v17, 0.0 }
0x197a   :  { %v7608_v20 = vld [vmem:[%s9628_s26 + $0x60] sm:$0xff]  }
0x197e   :  { %v3704_v21 = vpop.f32.mrb[70].mxu0 }
0x197f   :  { %v6862_v24 = vpop.f32.mrb[71].mxu0  ;;  %v3721_v26 = vrot.slane %v3704_v21, %v8196_v52  ;;  %v7609_v21 = vld [vmem:[%s9628_s26 + $0x68] sm:$0xff]  }
0x1980   :  { %v7610_v24 = vld [vmem:[%s9628_s26 + $0x70] sm:$0xff]  }
0x19b1   :  { %v3716_v27 = vpop.permute.xlu1 %3715 }
0x19b2   :  { %v3723_v6 = vadd.f32 %v3721_v26, %v3716_v27  ;;  %v3711_v29 = vpop.permute.xlu0 %3710 }
0x19b3   :  { %v3722_v31 = vadd.f32 %v3721_v26, %v3711_v29 }
0x19b4   :  { %vm3725_vm3 = vcmp.gt.f32.partialorder %v3723_v6, 0.0  ;;  %v3727_v33 = vmul.f32 0.1, %v3723_v6 }
0x19b5   :  { %vm3724_vm5 = vcmp.gt.f32.partialorder %v3722_v31, 0.0  ;;  %v3726_v15 = vmul.f32 0.1, %v3722_v31 }
0x19b6   :  { %v3729_v37 = vsel %vm3725_vm3, %v3723_v6, %v3727_v33  ;;  %v3763_v22 = vpop.permute.xlu0 %3762 }
0x19b7   :  { %v5837_v41 = vmul.f32 -1.442695, %v3729_v37  ;;  %v3728_v42 = vsel %vm3724_vm5, %v3722_v31, %v3726_v15  ;;  %6864 = vmatpush3.bf16.msra.mxu0 %v3763_v22  ;;  %v7611_v22 = vld [vmem:[%s9628_s26 + $0x78] sm:$0xff]  }
0x19b8   :  { %v5836_v25 = vmul.f32 -1.442695, %v3728_v42  ;;  %6869 = vmatprep.subr.bf16.mxu0 %v7814_v0  ;;  %v5865_v42 = vld [vmem:[%s9629_s30 + $0x80] sm:$0xff] }
0x19b9   :  { %7736 = vpow2.f32 %v5837_v41 }
0x19ba   :  { %7738 = vpow2.f32 %v5836_v25  ;;  %v5866_v25 = vld [vmem:[%s9629_s30 + $0x88] sm:$0xff] }
0x19c3   :  { %v7737_v43 = vpop.eup %7736 }
0x19c4   :  { %v7739_v44 = vpop.eup %7738  ;;  %v3737_v45 = vadd.f32 1.0, %v7737_v43  ;;  %v5867_v43 = vld [vmem:[%s9629_s30 + $0x90] sm:$0xff] }
0x19c5   :  { %v3736_v13 = vadd.f32 1.0, %v7739_v44 }
0x19c6   :  { %7740 = vrcp.f32 %v3737_v45  ;;  %v7343_v45 = vpack.c.bf16 %v5866_v25, %v5865_v42 }
0x19c7   :  { %7742 = vrcp.f32 %v3736_v13  ;;  %v5868_v13 = vld [vmem:[%s9629_s30 + $0x98] sm:$0xff] }
0x19c8   :  { %7344 = vmatprep.subr.bf16.mxu1 %v7343_v45 }
0x19c9   :  { %7346 = vmatpush3.bf16.msra.mxu1 %v7343_v45 }
0x19d0   :  { %v7741_v12 = vpop.eup %7740 }
0x19d1   :  { %v7743_v46 = vpop.eup %7742  ;;  %v3744_v39 = vmul.f32 1.442695, %v7741_v12 }
0x19d2   :  { %v3742_v47 = vmul.f32 1.442695, %v7743_v46  ;;  %v7347_v46 = vpack.c.bf16 %v5868_v13, %v5867_v43 }
0x19d3   :  { %7744 = vpow2.f32 %v3744_v39  ;;  %v5869_v39 = vld [vmem:[%s9629_s30 + $0xa0] sm:$0xff] }
0x19d4   :  { %7746 = vpow2.f32 %v3742_v47  ;;  %v5870_v47 = vld [vmem:[%s9629_s30 + $0xa8] sm:$0xff]  ;;  %7348 = vmatprep.subr.bf16.mxu1 %v7347_v46 }
0x19d5   :  { %7350 = vmatpush3.bf16.msra.mxu1 %v7347_v46 }
0x19dd   :  { %v7745_v49 = vpop.eup %7744 }
0x19de   :  { %v7747_v28 = vpop.eup %7746  ;;  %v3747_v36 = vmul.f32 %v8984_v53, %v7745_v49 }
0x19df   :  { %v3746_v23 = vmul.f32 %v8990_v32, %v7747_v28 }
0x19e0   :  { %v3749_v54 = vsel %vm96_vm1, %v3747_v36, 0.0 }
0x19e1   :  { %v3748_v56 = vsel %vm96_vm1, %v3746_v23, 0.0 }
0x19e2   :  { %v3750_v57 = vadd.f32 %v3749_v54, %v3748_v56  ;;  %v5871_v54 = vld [vmem:[%s9629_s30 + $0xb0] sm:$0xff]  ;;  %v5872_v56 = vld [vmem:[%s9629_s30 + $0xb8] sm:$0xff] }
0x19e4   :  { %v3751_v40 = vrot.slane %v3750_v57, 4 }
0x19e6   :  { %v3752_v59 = vadd.f32 %v3751_v40, %v3750_v57  ;;  %v7355_v57 = vpack.c.bf16 %v5872_v56, %v5871_v54  ;;  %v5873_v40 = vld [vmem:[%s9629_s30 + $0xc0] sm:$0xff] }
0x19e8   :  { %v3753_v48 = vrot.slane %v3752_v59, 2 }
0x19ea   :  { %v3754_v50 = vadd.f32 %v3753_v48, %v3752_v59  ;;  %v5874_v59 = vld [vmem:[%s9629_s30 + $0xc8] sm:$0xff] }
0x19eb   :  { %v7359_v48 = vpack.c.bf16 %v5874_v59, %v5873_v40 }
0x19ec   :  { %v3755_v60 = vrot.slane %v3754_v50, 1 }
0x19ee   :  { %v3756_v61 = vadd.f32 %v3755_v60, %v3754_v50  ;;  %v5875_v50 = vld [vmem:[%s9629_s30 + $0xd0] sm:$0xff]  ;;  %v5876_v60 = vld [vmem:[%s9629_s30 + $0xd8] sm:$0xff] }
0x19f0   :  { %7748 = vrcp.f32 %v3756_v61  ;;  %v7363_v61 = vpack.c.bf16 %v5876_v60, %v5875_v50 }
0x19fa   :  { %v7749_v62 = vpop.eup %7748 }
0x19fb   :  { %v3758_v63 = vmul.f32 %v7749_v62, %v3746_v23  ;;  %v3759_v3 = vmul.f32 %v7749_v62, %v3747_v36  ;;  %v7351_v23 = vpack.c.bf16 %v5870_v47, %v5869_v39  ;;  %v5877_v62 = vld [vmem:[%s9629_s30 + $0xe0] sm:$0xff] }
0x19fd   :  { %v3760_v4 = vpack.c.bf16 %v3759_v3, %v3758_v63  ;;  %7352 = vmatprep.subr.bf16.mxu1 %v7351_v23  ;;  %v5878_v63 = vld [vmem:[%s9629_s30 + $0xe8] sm:$0xff] }
0x19fe   :  { %7354 = vmatpush3.bf16.msra.mxu1 %v7351_v23  ;;  %v7367_v3 = vpack.c.bf16 %v5878_v63, %v5877_v62 }
0x19ff   :  { %6866 = vmatmul.mubr.msk.bf16.vlgmr.msra.gmra.mrb[76].mxu0 %vm96_vm1, %v3760_v4  ;;  %7356 = vmatprep.subr.bf16.mxu1 %v7355_v57  ;;  %v5879_v4 = vld [vmem:[%s9629_s30 + $0xf0] sm:$0xff] }
0x1a00   :  { %6885 = vmatprep.mubr.msk.bf16.mxu0 %vm7815_vm0, %v7814_v0  ;;  %6870 = vmatpush3.bf16.msra.mxu0 %v7604_v8  ;;  %v5880_v8 = vld [vmem:[%s9629_s30 + $0xf8] sm:$0xff] }
0x1a01   :  { %6871 = vmatprep.subr.bf16.mxu0 %v7814_v0 }
0x1a02   :  { %7358 = vmatpush3.bf16.msra.mxu1 %v7355_v57 }
0x1a03   :  { %7360 = vmatprep.subr.bf16.mxu1 %v7359_v48 }
0x1a04   :  { %6872 = vmatpush3.bf16.msra.mxu0 %v7605_v9  ;;  %v7371_v9 = vpack.c.bf16 %v5880_v8, %v5879_v4 }
0x1a05   :  { %6873 = vmatprep.subr.bf16.mxu0 %v7814_v0 }
0x1a06   :  { %7362 = vmatpush3.bf16.msra.mxu1 %v7359_v48 }
0x1a07   :  { %7364 = vmatprep.subr.bf16.mxu1 %v7363_v61 }
0x1a08   :  { %6874 = vmatpush3.bf16.msra.mxu0 %v7606_v11  ;;  %v3531_v11 = vmin.f32 %v9009_v34, 0.0 }
0x1a09   :  { %6875 = vmatprep.subr.bf16.mxu0 %v7814_v0 }
0x1a0a   :  { %7366 = vmatpush3.bf16.msra.mxu1 %v7363_v61 }
0x1a0b   :  { %7368 = vmatprep.subr.bf16.mxu1 %v7367_v3 }
0x1a0c   :  { %6876 = vmatpush3.bf16.msra.mxu0 %v7607_v14  ;;  %v3532_v14 = vmin.f32 %v9011_v17, 0.0 }
0x1a0d   :  { %6877 = vmatprep.subr.bf16.mxu0 %v7814_v0 }
0x1a0e   :  { %7370 = vmatpush3.bf16.msra.mxu1 %v7367_v3 }
0x1a0f   :  { %7372 = vmatprep.subr.bf16.mxu1 %v7371_v9 }
0x1a10   :  { %6878 = vmatpush3.bf16.msra.mxu0 %v7608_v20  ;;  %v3533_v20 = vmul.f32 1.442695, %v3531_v11 }
0x1a11   :  { %6879 = vmatprep.subr.bf16.mxu0 %v7814_v0 }
0x1a12   :  { %7374 = vmatpush3.bf16.msra.mxu1 %v7371_v9 }
0x1a13   :  { %6931 = vmatprep.subr.bf16.mxu1 %v7814_v0 }
0x1a14   :  { %6880 = vmatpush3.bf16.msra.mxu0 %v7609_v21  ;;  %v3535_v21 = vmul.f32 1.442695, %v3532_v14 }
0x1a15   :  { %6881 = vmatprep.subr.bf16.mxu0 %v7814_v0 }
0x1a18   :  { %6882 = vmatpush3.bf16.msra.mxu0 %v7610_v24 }
0x1a19   :  { %6883 = vmatprep.subr.bf16.mxu0 %v7814_v0 }
0x1a1c   :  { %6884 = vmatpush3.bf16.msra.mxu0 %v7611_v22 }
0x1a1d   :  { %7375 = vmatprep.subr.bf16.mxu0 %v7816_v30 }
0x1ad2   :  { %v3802_v26 = vpop.f32.mrb[76].mxu0 }
0x1ad3   :  { %v3811_v27 = vmin.f32 %v3802_v26, 0.0  ;;  %v6867_v6 = vpop.f32.mrb[77].mxu0  ;;  %vm3809_vm6 = vcmp.gt.f32.partialorder %v3802_v26, 0.0 }
0x1ad4   :  { %v3805_v29 = vpop.f32.mrb[78].mxu0 }
0x1ad5   :  { %v3813_v31 = vmul.f32 1.442695, %v3811_v27  ;;  %v3812_v33 = vmin.f32 %v3805_v29, 0.0  ;;  %v6868_v15 = vpop.f32.mrb[79].mxu0  ;;  %vm3810_vm7 = vcmp.gt.f32.partialorder %v3805_v29, 0.0 }
0x1ad7   :  { %7750 = vpow2.f32 %v3813_v31  ;;  %v3815_v37 = vmul.f32 1.442695, %v3812_v33 }
0x1ad9   :  { %7752 = vpow2.f32 %v3815_v37 }
0x1ada   :  { %7754 = vpow2.f32 %v3533_v20 }
0x1adb   :  { %7756 = vpow2.f32 %v3535_v21 }
0x1ae1   :  { %v7751_v41 = vpop.eup %7750 }
0x1ae2   :  { %v5839_v44 = vadd.f32 -1.0, %v7751_v41 }
0x1ae3   :  { %v7753_v12 = vpop.eup %7752 }
0x1ae4   :  { %v5840_v49 = vadd.f32 -1.0, %v7753_v12  ;;  %v3819_v28 = vsel %vm3809_vm6, %v3802_v26, %v5839_v44  ;;  %v7755_v24 = vpop.eup %7754 }
0x1ae5   :  { %v7757_v26 = vpop.eup %7756  ;;  %v5820_v27 = vadd.f32 -1.0, %v7755_v24 }
0x1ae6   :  { %v3820_v36 = vsel %vm3810_vm7, %v3805_v29, %v5840_v49  ;;  %v5821_v6 = vadd.f32 -1.0, %v7757_v26 }
0x1ae7   :  { %v7487_v30 = vpack.i.bf16 %v3820_v36, %v3819_v28  ;;  %v3539_v15 = vsel %vm3529_vm8, %v9009_v34, %v5820_v27  ;;  %v5881_v34 = vld [vmem:[%s9630_s14 + $0x1] sm:$0x1] }
0x1ae8   :  { %v3540_v37 = vsel %vm3530_vm9, %v9011_v17, %v5821_v6 }
0x1ae9   :  { %7488 = vrot.lane.b32.xlu1 %v7487_v30, %s9625_s7 }
0x1b5b   :  { %v7489_v29 = vpop.permute.xlu1 %7488 }
0x1b5c   :  { %v7491_v31 = vunpack.i.h.bf16 %v7489_v29  ;;  %v7490_v33 = vunpack.i.l.bf16 %v7489_v29 }
0x1b5e   :  { %v3830_v22 = vsel %vm559_vm2, %v3540_v37, %v7491_v31  ;;  %v3829_v41 = vsel %vm559_vm2, %v3539_v15, %v7490_v33 }
0x1b5f   :  { %v3848_v42 = vpack.c.bf16 %v3830_v22, %v3829_v41  ;;  %v7613_v22 = vld [vmem:[%s9627_s1 + $0x48] sm:$0xff]   ;;  %v7614_v41 = vld [vmem:[%s9627_s1 + $0x50] sm:$0xff]  }
0x1b61   :  { %6886 = vmatmul.mubr.bf16.vlgmr.msra.gmra.mrb[80].mxu0 %v3848_v42  ;;  %v7615_v42 = vld [vmem:[%s9627_s1 + $0x58] sm:$0xff]  }
0x1b62   :  { %6928 = vmatprep.mubr.msk.f32.mxu0 %vm7815_vm0, %v7814_v0 }
0x1c34   :  { %v3931_v25 = vpop.f32.mrb[80].mxu0 }
0x1c35   :  { %v6887_v43 = vpop.f32.mrb[81].mxu0  ;;  %6921 = vmatprep.mubr.f32.mxu1 %v3931_v25 }
0x1c36   :  { %v3934_v44 = vpop.f32.mrb[82].mxu0  ;;  %v7617_v43 = vld [vmem:[%s9627_s1 + $0x68] sm:$0xff]  }
0x1c37   :  { %v7376_v45 = vpack.c.bf16 %v3934_v44, %v3931_v25  ;;  %v6888_v13 = vpop.f32.mrb[83].mxu0  ;;  %6922 = vmatmul.mubr.f32.vlgmr.msra.gmra.mrb[46].mxu1 %v3934_v44  ;;  %v7616_v25 = vld [vmem:[%s9627_s1 + $0x60] sm:$0xff]   ;;  %v7618_v44 = vld [vmem:[%s9627_s1 + $0x70] sm:$0xff]  }
0x1c38   :  { %6933 = vmatprep.mubr.msk.bf16.mxu1 %vm7815_vm0, %v7814_v0  ;;  %v5911_v13 = vld [vmem:[%s9567_s17 + $0x80] sm:$0xff] }
0x1c39   :  { %7377 = vmatpush3.bf16.xpose.msra.mxu0 %v7376_v45  ;;  %6932 = vmatpush3.bf16.msra.mxu1 %v7376_v45  ;;  %v7619_v45 = vld [vmem:[%s9627_s1 + $0x78] sm:$0xff]  }
0x1c3a   :  { %6937 = vmatprep.subr.bf16.mxu1 %v7814_v0 }
0x1c40   :  { %6929 = vmatmul.mubr.f32.vlgmr.msra.gmra.mrb[84].mxu0 %v5881_v34  ;;  %v5912_v34 = vld [vmem:[%s9567_s17 + $0x88] sm:$0xff] }
0x1d0a   :  { %v6923_v17 = vpop.f32.mrb[46].mxu1 }
0x1d0b   :  { %4109 = vperm.xlu1 %7481, %v6923_v17   ;;  %v4023_v12 = vpop.f32.mrb[47].mxu1  ;;  %v5913_v17 = vld [vmem:[%s9567_s17 + $0x90] sm:$0xff] }
0x1d0c   :  { %4104 = vperm.xlu0 %7480, %v4023_v12   ;;  %v7378_v12 = vpack.c.bf16 %v5912_v34, %v5911_v13 }
0x1d0e   :  { %7379 = vmatprep.subr.bf16.mxu0 %v7378_v12 }
0x1d0f   :  { %7381 = vmatpush3.bf16.msra.mxu0 %v7378_v12 }
0x1d13   :  { %v4098_v46 = vpop.f32.mrb[84].mxu0 }
0x1d14   :  { %v6930_v39 = vpop.f32.mrb[85].mxu0  ;;  %v4115_v47 = vrot.slane %v4098_v46, %v8196_v52  ;;  %v5914_v46 = vld [vmem:[%s9567_s17 + $0x98] sm:$0xff] }
0x1d15   :  { %v7382_v39 = vpack.c.bf16 %v5914_v46, %v5913_v17  ;;  %v5927_v17 = vld [vmem:[%s9570_s19 + $0x8] sm:$0xff] }
0x1d17   :  { %7383 = vmatprep.subr.bf16.mxu0 %v7382_v39 }
0x1d18   :  { %7385 = vmatpush3.bf16.msra.mxu0 %v7382_v39 }
0x1d8a   :  { %v4110_v49 = vpop.permute.xlu1 %4109 }
0x1d8b   :  { %v4117_v28 = vadd.f32 %v4115_v47, %v4110_v49  ;;  %v4105_v36 = vpop.permute.xlu0 %4104  ;;  %v5916_v49 = vld [vmem:[%s9567_s17 + $0xa8] sm:$0xff] }
0x1d8c   :  { %v4116_v23 = vadd.f32 %v4115_v47, %v4105_v36  ;;  %v5915_v47 = vld [vmem:[%s9567_s17 + $0xa0] sm:$0xff]  ;;  %v5917_v36 = vld [vmem:[%s9567_s17 + $0xb0] sm:$0xff] }
0x1d8d   :  { %vm4119_vm2 = vcmp.gt.f32.partialorder %v4117_v28, 0.0  ;;  %v4121_v30 = vmul.f32 0.1, %v4117_v28 }
0x1d8e   :  { %vm4118_vm10 = vcmp.gt.f32.partialorder %v4116_v23, 0.0  ;;  %v4120_v54 = vmul.f32 0.1, %v4116_v23 }
0x1d8f   :  { %v4123_v56 = vsel %vm4119_vm2, %v4117_v28, %v4121_v30  ;;  %v7386_v28 = vpack.c.bf16 %v5916_v49, %v5915_v47 }
0x1d90   :  { %v5883_v57 = vmul.f32 -1.442695, %v4123_v56  ;;  %v4122_v40 = vsel %vm4118_vm10, %v4116_v23, %v4120_v54  ;;  %v5918_v23 = vld [vmem:[%s9567_s17 + $0xb8] sm:$0xff]  ;;  %v5919_v54 = vld [vmem:[%s9567_s17 + $0xc0] sm:$0xff]  ;;  %v5920_v56 = vld [vmem:[%s9567_s17 + $0xc8] sm:$0xff] }
0x1d91   :  { %v5882_v59 = vmul.f32 -1.442695, %v4122_v40  ;;  %7387 = vmatprep.subr.bf16.mxu0 %v7386_v28  ;;  %v7390_v30 = vpack.c.bf16 %v5918_v23, %v5917_v36  ;;  %v5921_v40 = vld [vmem:[%s9567_s17 + $0xd0] sm:$0xff] }
0x1d92   :  { %7758 = vpow2.f32 %v5883_v57  ;;  %7389 = vmatpush3.bf16.msra.mxu0 %v7386_v28  ;;  %v7394_v57 = vpack.c.bf16 %v5920_v56, %v5919_v54 }
0x1d93   :  { %7760 = vpow2.f32 %v5882_v59  ;;  %7391 = vmatprep.subr.bf16.mxu0 %v7390_v30  ;;  %v5922_v59 = vld [vmem:[%s9567_s17 + $0xd8] sm:$0xff] }
0x1d96   :  { %7393 = vmatpush3.bf16.msra.mxu0 %v7390_v30 }
0x1d97   :  { %7395 = vmatprep.subr.bf16.mxu0 %v7394_v57 }
0x1d9a   :  { %7397 = vmatpush3.bf16.msra.mxu0 %v7394_v57 }
0x1d9c   :  { %v7759_v48 = vpop.eup %7758 }
0x1d9d   :  { %v7761_v50 = vpop.eup %7760  ;;  %v4131_v60 = vadd.f32 1.0, %v7759_v48  ;;  %v7398_v48 = vpack.c.bf16 %v5922_v59, %v5921_v40 }
0x1d9e   :  { %v4130_v61 = vadd.f32 1.0, %v7761_v50  ;;  %v5923_v50 = vld [vmem:[%s9567_s17 + $0xe0] sm:$0xff] }
0x1d9f   :  { %7762 = vrcp.f32 %v4131_v60  ;;  %v5924_v60 = vld [vmem:[%s9567_s17 + $0xe8] sm:$0xff]  ;;  %7399 = vmatprep.subr.bf16.mxu0 %v7398_v48 }
0x1da0   :  { %7764 = vrcp.f32 %v4130_v61  ;;  %v7402_v61 = vpack.c.bf16 %v5924_v60, %v5923_v50  ;;  %7401 = vmatpush3.bf16.msra.mxu0 %v7398_v48 }
0x1da2   :  { %7403 = vmatprep.subr.bf16.mxu0 %v7402_v61 }
0x1da4   :  { %7405 = vmatpush3.bf16.msra.mxu0 %v7402_v61 }
0x1da9   :  { %v7763_v52 = vpop.eup %7762 }
0x1daa   :  { %v7765_v62 = vpop.eup %7764  ;;  %v4138_v63 = vmul.f32 1.442695, %v7763_v52 }
0x1dab   :  { %v4136_v3 = vmul.f32 1.442695, %v7765_v62 }
0x1dac   :  { %7766 = vpow2.f32 %v4138_v63 }
0x1dad   :  { %7768 = vpow2.f32 %v4136_v3 }
0x1db6   :  { %v7767_v4 = vpop.eup %7766 }
0x1db7   :  { %v7769_v8 = vpop.eup %7768  ;;  %v4141_v9 = vmul.f32 %v8984_v53, %v7767_v4  ;;  %v7612_v53 = vld [vmem:[%s9627_s1 + $0x40] sm:$0xff]  }
0x1db8   :  { %v4140_v11 = vmul.f32 %v8990_v32, %v7769_v8 }
0x1db9   :  { %v4143_v14 = vsel %vm96_vm1, %v4141_v9, 0.0 }
0x1dba   :  { %v4142_v20 = vsel %vm96_vm1, %v4140_v11, 0.0 }
0x1dbb   :  { %v4144_v21 = vadd.f32 %v4143_v14, %v4142_v20  ;;  %v5926_v14 = vld [vmem:[%s9567_s17 + $0xf8] sm:$0xff] }
0x1dbd   :  { %v4145_v24 = vrot.slane %v4144_v21, 4 }
0x1dbf   :  { %v4146_v26 = vadd.f32 %v4145_v24, %v4144_v21  ;;  %v5902_v21 = vld [vmem:[%s9568_s16 + $0x1] ss:$0 sm:$0xff] }
0x1dc1   :  { %v4147_v27 = vrot.slane %v4146_v26, 2 }
0x1dc3   :  { %v4148_v6 = vadd.f32 %v4147_v27, %v4146_v26 }
0x1dc5   :  { %v4149_v29 = vrot.slane %v4148_v6, 1 }
0x1dc7   :  { %v4150_v31 = vadd.f32 %v4149_v29, %v4148_v6 }
0x1dc9   :  { %7770 = vrcp.f32 %v4150_v31 }
0x1dd3   :  { %v7771_v33 = vpop.eup %7770 }
0x1dd4   :  { %v4152_v15 = vmul.f32 %v7771_v33, %v4140_v11  ;;  %v4153_v37 = vmul.f32 %v7771_v33, %v4141_v9  ;;  %v5925_v11 = vld [vmem:[%s9567_s17 + $0xf0] sm:$0xff] }
0x1dd5   :  { %v7406_v20 = vpack.c.bf16 %v5926_v14, %v5925_v11 }
0x1dd6   :  { %v4154_v32 = vpack.c.bf16 %v4153_v37, %v4152_v15 }
0x1dd7   :  { %7407 = vmatprep.subr.bf16.mxu0 %v7406_v20 }
0x1dd8   :  { %6934 = vmatmul.mubr.msk.bf16.vlgmr.msra.gmra.mrb[48].mxu1 %vm96_vm1, %v4154_v32  ;;  %7409 = vmatpush3.bf16.msra.mxu0 %v7406_v20 }
0x1dd9   :  { %6938 = vmatpush3.bf16.msra.mxu1 %v7612_v53  ;;  %6953 = vmatprep.mubr.msk.bf16.mxu1 %vm7815_vm0, %v7814_v0 }
0x1dda   :  { %6939 = vmatprep.subr.bf16.mxu1 %v7814_v0  ;;  %6992 = vmatprep.subr.mxu0 %v7814_v0 }
0x1ddd   :  { %6940 = vmatpush3.bf16.msra.mxu1 %v7613_v22  ;;  %v7796_v22 = vld [vmem:[%s9571_s5] sm:$0xff] }
0x1dde   :  { %6941 = vmatprep.subr.bf16.mxu1 %v7814_v0 }
0x1de1   :  { %6942 = vmatpush3.bf16.msra.mxu1 %v7614_v41  ;;  %v5928_v41 = vld [vmem:[%s9569_s18 + $0x8] sm:$0xff] }
0x1de2   :  { %6943 = vmatprep.subr.bf16.mxu1 %v7814_v0 }
0x1de5   :  { %6944 = vmatpush3.bf16.msra.mxu1 %v7615_v42 }
0x1de6   :  { %6945 = vmatprep.subr.bf16.mxu1 %v7814_v0 }
0x1de9   :  { %6946 = vmatpush3.bf16.msra.mxu1 %v7616_v25 }
0x1dea   :  { %6947 = vmatprep.subr.bf16.mxu1 %v7814_v0 }
0x1ded   :  { %6948 = vmatpush3.bf16.msra.mxu1 %v7617_v43 }
0x1dee   :  { %6949 = vmatprep.subr.bf16.mxu1 %v7814_v0 }
0x1df1   :  { %6950 = vmatpush3.bf16.msra.mxu1 %v7618_v44 }
0x1df2   :  { %6951 = vmatprep.subr.bf16.mxu1 %v7814_v0 }
0x1df5   :  { %6952 = vmatpush3.bf16.msra.mxu1 %v7619_v45 }
0x1df6   :  { %6997 = vmatprep.subr.mxu1 %v7814_v0 }
0x1eab   :  { %v4193_v52 = vpop.f32.mrb[48].mxu1 }
0x1eac   :  { %v6935_v62 = vpop.f32.mrb[49].mxu1  ;;  %v4200_v3 = vmax.f32 %v4193_v52, 0.0 }
0x1ead   :  { %v4196_v63 = vpop.f32.mrb[50].mxu1 }
0x1eae   :  { %v4201_v4 = vmax.f32 %v4196_v63, 0.0  ;;  %v6936_v8 = vpop.f32.mrb[51].mxu1 }
0x1eb0   :  { %v4219_v9 = vpack.c.bf16 %v4201_v4, %v4200_v3 }
0x1eb2   :  { %6954 = vmatmul.mubr.bf16.vlgmr.msra.gmra.mrb[52].mxu1 %v4219_v9 }
0x1eb3   :  { %6999 = vmatprep.mubr.msk.f32.mxu1 %vm7815_vm0, %v7814_v0 }
0x1f85   :  { %v4310_v24 = vpop.f32.mrb[52].mxu1 }
0x1f86   :  { %v9214_v26 = vadd.f32 %v5902_v21, %v4310_v24  ;;  %v6955_v27 = vpop.f32.mrb[53].mxu1 }
0x1f87   :  { %v4313_v6 = vpop.f32.mrb[54].mxu1 }
0x1f88   :  { %v9216_v29 = vadd.f32 %v5902_v21, %v4313_v6  ;;  %v6956_v31 = vpop.f32.mrb[55].mxu1  ;;  %6989 = vmatprep.mubr.f32.mxu0 %v9214_v26 }
0x1f8a   :  { %v5018_v33 = vpack.c.bf16 %v9216_v29, %v9214_v26  ;;  %6990 = vmatmul.mubr.f32.vlgmr.msra.gmra.mrb[86].mxu0 %v9216_v29 }
0x1f8b   :  { %6994 = vmatprep.mubr.msk.f32.mxu0 %vm7815_vm0, %v7814_v0 }
0x205d   :  { %v6991_v15 = vpop.f32.mrb[86].mxu0 }
0x205e   :  { %v4400_v37 = vpop.f32.mrb[87].mxu0 }
0x205f   :  { %4413 = vxpose.xlu1.b32.start.end [1/1] (short) (narrow) %v4400_v37, 8  ;;  %4446 = vrot.lane.b32.xlu0 %v4400_v37, %s7819_s27 }
0x2063   :  { %4750 = vrot.lane.b32.xlu0 %v6991_v15, %s7819_s27 }
0x2081   :  { %4717 = vxpose.xlu0.b32.start.end [1/1] (short) (narrow) %v6991_v15, 8 }
0x20d1   :  { %v4447_v53 = vpop.permute.xlu0 %4446 }
0x20d2   :  { %6993 = vmatpush3.msra.mxu0 %v4447_v53 }
0x20d3   :  { %7002 = vmatprep.subr.mxu0 %v7814_v0 }
0x20d5   :  { %v4751_v34 = vpop.permute.xlu0 %4750 }
0x20df   :  { %v4429_v32 = vpop.trf.xlu1 }
0x20e0   :  { %6995 = vmatmul.mubr.msk.f32.vlgmr.msra.gmra.mrb[88].mxu0 %vm1726_vm14, %v4429_v32 }
0x20e1   :  { %7003 = vmatpush3.msra.mxu0 %v7796_v22  ;;  %7004 = vmatprep.mubr.msk.f32.mxu0 %vm7815_vm0, %v7814_v0 }
0x20e2   :  { %7012 = vmatprep.subr.mxu0 %v7814_v0 }
0x2101   :  { %v4733_v46 = vpop.trf.xlu0 }
0x21b3   :  { %v4518_v42 = vpop.f32.mrb[88].mxu0 }
0x21b4   :  { %v4519_v25 = vadd.f32 %v5928_v41, %v4518_v42  ;;  %v6996_v43 = vpop.f32.mrb[89].mxu0 }
0x21b6   :  { %v5930_v44 = vmul.f32 -1.442695, %v4519_v25 }
0x21b8   :  { %7772 = vpow2.f32 %v5930_v44 }
0x21c2   :  { %v7773_v45 = vpop.eup %7772 }
0x21c3   :  { %v4525_v13 = vadd.f32 1.0, %v7773_v45 }
0x21c5   :  { %7774 = vrcp.f32 %v4525_v13 }
0x21cf   :  { %v7775_v12 = vpop.eup %7774 }
0x21d0   :  { %6998 = vmatpush3.msra.mxu1 %v7775_v12 }
0x21d1   :  { %7000 = vmatmul.mubr.msk.f32.vlgmr.msra.gmra.mrb[56].mxu1 %vm1726_vm14, %v5927_v17  ;;  %7007 = vmatprep.subr.mxu1 %v7814_v0 }
0x21d2   :  { %7008 = vmatpush3.msra.mxu1 %v4751_v34  ;;  %7009 = vmatprep.mubr.msk.f32.mxu1 %vm7815_vm0, %v7814_v0 }
0x21d3   :  { %7017 = vmatprep.subr.mxu1 %v7814_v0 }
0x21d5   :  { %7010 = vmatmul.mubr.msk.f32.vlgmr.msra.gmra.mrb[58].mxu1 %vm1726_vm14, %v4733_v46 }
0x21d6   :  { %7018 = vmatpush3.msra.mxu1 %v7796_v22  ;;  %7019 = vmatprep.mubr.msk.f32.mxu1 %vm7815_vm0, %v7814_v0 }
0x21d7   :  { %7022 = vmatprep.subr.bf16.mxu1 %v7814_v0 }
0x22a4   :  { %v4597_v39 = vpop.f32.mrb[56].mxu1 }
0x22a5   :  { %v4601_v47 = vsel %vm1726_vm14, %v4597_v39, -inf  ;;  %v7001_v49 = vpop.f32.mrb[57].mxu1 }
0x22a6   :  { %v4602_v28 = vrot.slane %v4601_v47, 4 }
0x22a8   :  { %v4603_v36 = vmax.f32 %v4601_v47, %v4602_v28  ;;  %v4822_v23 = vpop.f32.mrb[58].mxu1  ;;  %v7620_v28 = vld [vmem:[%s9572_s20 + $0x40] sm:$0xff]  }
0x22a9   :  { %v7011_v30 = vpop.f32.mrb[59].mxu1  ;;  %v4823_v50 = vadd.f32 %v5928_v41, %v4822_v23  ;;  %v7621_v23 = vld [vmem:[%s9572_s20 + $0x48] sm:$0xff]  }
0x22aa   :  { %v4604_v54 = vrot.slane %v4603_v36, 2  ;;  %v7622_v30 = vld [vmem:[%s9572_s20 + $0x50] sm:$0xff]  }
0x22ab   :  { %v5934_v60 = vmul.f32 -1.442695, %v4823_v50 }
0x22ac   :  { %v4605_v56 = vmax.f32 %v4603_v36, %v4604_v54  ;;  %v7623_v54 = vld [vmem:[%s9572_s20 + $0x58] sm:$0xff]  }
0x22ae   :  { %v4606_v57 = vrot.slane %v4605_v56, 1 }
0x22b0   :  { %v4607_v40 = vmax.f32 %v4605_v56, %v4606_v57  ;;  %v7624_v56 = vld [vmem:[%s9572_s20 + $0x60] sm:$0xff]   ;;  %v7625_v57 = vld [vmem:[%s9572_s20 + $0x68] sm:$0xff]  }
0x22b2   :  { %v4608_v59 = vsub.f32 %v4597_v39, %v4607_v40  ;;  %v7626_v40 = vld [vmem:[%s9572_s20 + $0x70] sm:$0xff]  }
0x22b4   :  { %v4609_v48 = vmul.f32 1.442695, %v4608_v59  ;;  %v7627_v59 = vld [vmem:[%s9572_s20 + $0x78] sm:$0xff]  }
0x22b6   :  { %7776 = vpow2.f32 %v4609_v48  ;;  %v7797_v48 = vld [vmem:[%s9574_s4] sm:$0xff] }
0x22b7   :  { %7778 = vpow2.f32 %v5934_v60  ;;  %v7798_v60 = vld [vmem:[%s9574_s4 + $0x8] sm:$0xff] }
0x22c0   :  { %v7777_v61 = vpop.eup %7776 }
0x22c1   :  { %v4611_v52 = vsel %vm1726_vm14, %v7777_v61, 0.0  ;;  %v7779_v4 = vpop.eup %7778 }
0x22c2   :  { %v4612_v62 = vrot.slane %v4611_v52, 4  ;;  %v4829_v11 = vadd.f32 1.0, %v7779_v4 }
0x22c4   :  { %v4613_v63 = vadd.f32 %v4612_v62, %v4611_v52 }
0x22c6   :  { %v4614_v3 = vrot.slane %v4613_v63, 2 }
0x22c8   :  { %v4615_v8 = vadd.f32 %v4614_v3, %v4613_v63  ;;  %v7799_v3 = vld [vmem:[%s9574_s4 + $0x10] sm:$0xff] }
0x22ca   :  { %v4616_v9 = vrot.slane %v4615_v8, 1 }
0x22cc   :  { %v4617_v14 = vadd.f32 %v4616_v9, %v4615_v8  ;;  %v7800_v8 = vld [vmem:[%s9574_s4 + $0x18] sm:$0xff] }
0x22ce   :  { %7780 = vrcp.f32 %v4617_v14 }
0x22cf   :  { %7782 = vrcp.f32 %v4829_v11 }
0x22d8   :  { %v7781_v20 = vpop.eup %7780 }
0x22d9   :  { %v7783_v21 = vpop.eup %7782  ;;  %v4619_v24 = vmul.f32 %v7781_v20, %v7777_v61 }
0x22db   :  { %7005 = vmatmul.mubr.msk.f32.vlgmr.msra.gmra.mrb[90].mxu0 %vm1726_vm14, %v4619_v24 }
0x22dc   :  { %7013 = vmatpush3.msra.mxu0 %v7783_v21  ;;  %7014 = vmatprep.mubr.msk.f32.mxu0 %vm7815_vm0, %v7814_v0 }
0x22df   :  { %7015 = vmatmul.mubr.msk.f32.vlgmr.msra.gmra.mrb[92].mxu0 %vm1726_vm14, %v5927_v17 }
0x22e0   :  { %5051 = vmatprep.mubr.bf16.mxu0 %v7818_v38 }
0x23ae   :  { %v9256_v27 = vpop.f32.mrb[90].mxu0 }
0x23af   :  { %v7006_v6 = vpop.f32.mrb[91].mxu0  ;;  %v4693_v50 = vmul.f32 %v7797_v48, %v9256_v27  ;;  %v4694_v61 = vmul.f32 %v7798_v60, %v9256_v27  ;;  %v4695_v20 = vmul.f32 %v7799_v3, %v9256_v27  ;;  %v4696_v21 = vmul.f32 %v7800_v8, %v9256_v27 }
0x23b0   :  { %v7801_v6 = vld [vmem:[%s9574_s4 + $0x20] sm:$0xff] }
0x23b1   :  { %v4709_v14 = vpack.c.bf16 %v4694_v61, %v4693_v50 }
0x23b2   :  { %v4898_v31 = vpop.f32.mrb[92].mxu0 }
0x23b3   :  { %v4902_v15 = vsel %vm1726_vm14, %v4898_v31, -inf  ;;  %v7016_v37 = vpop.f32.mrb[93].mxu0 }
0x23b4   :  { %v4903_v53 = vrot.slane %v4902_v15, 4 }
0x23b6   :  { %v4904_v32 = vmax.f32 %v4902_v15, %v4903_v53  ;;  %v7802_v15 = vld [vmem:[%s9574_s4 + $0x28] sm:$0xff]  ;;  %v4710_v53 = vpack.c.bf16 %v4696_v21, %v4695_v20 }
0x23b8   :  { %v4905_v22 = vrot.slane %v4904_v32, 2 }
0x23ba   :  { %v4906_v41 = vmax.f32 %v4904_v32, %v4905_v22  ;;  %v4697_v32 = vmul.f32 %v7801_v6, %v9256_v27  ;;  %v4698_v22 = vmul.f32 %v7802_v15, %v9256_v27 }
0x23bc   :  { %v4907_v42 = vrot.slane %v4906_v41, 1 }
0x23be   :  { %v4908_v25 = vmax.f32 %v4906_v41, %v4907_v42  ;;  %v7803_v42 = vld [vmem:[%s9574_s4 + $0x30] sm:$0xff] }
0x23c0   :  { %v4909_v43 = vsub.f32 %v4898_v31, %v4908_v25 }
0x23c2   :  { %v4910_v44 = vmul.f32 1.442695, %v4909_v43  ;;  %v7804_v43 = vld [vmem:[%s9574_s4 + $0x38] sm:$0xff] }
0x23c4   :  { %7784 = vpow2.f32 %v4910_v44 }
0x23ce   :  { %v7785_v45 = vpop.eup %7784 }
0x23cf   :  { %v4912_v13 = vsel %vm1726_vm14, %v7785_v45, 0.0 }
0x23d0   :  { %v4913_v34 = vrot.slane %v4912_v13, 4 }
0x23d2   :  { %v4914_v17 = vadd.f32 %v4913_v34, %v4912_v13  ;;  %v4699_v13 = vmul.f32 %v7803_v42, %v9256_v27  ;;  %v4700_v34 = vmul.f32 %v7804_v43, %v9256_v27 }
0x23d4   :  { %v4915_v12 = vrot.slane %v4914_v17, 2 }
0x23d6   :  { %v4916_v46 = vadd.f32 %v4915_v12, %v4914_v17  ;;  %v7805_v12 = vld [vmem:[%s9574_s4 + $0x40] sm:$0xff] }
0x23d8   :  { %v4917_v39 = vrot.slane %v4916_v46, 1 }
0x23da   :  { %v4918_v47 = vadd.f32 %v4917_v39, %v4916_v46  ;;  %v7806_v39 = vld [vmem:[%s9574_s4 + $0x48] sm:$0xff] }
0x23dc   :  { %7786 = vrcp.f32 %v4918_v47 }
0x23e6   :  { %v7787_v49 = vpop.eup %7786 }
0x23e7   :  { %v4920_v36 = vmul.f32 %v7787_v49, %v7785_v45  ;;  %v4711_v45 = vpack.c.bf16 %v4698_v22, %v4697_v32  ;;  %v4712_v49 = vpack.c.bf16 %v4700_v34, %v4699_v13 }
0x23e9   :  { %7020 = vmatmul.mubr.msk.f32.vlgmr.msra.gmra.mrb[60].mxu1 %vm1726_vm14, %v4920_v36  ;;  %v4702_v36 = vmul.f32 %v7806_v39, %v9256_v27 }
0x23ea   :  { %7023 = vmatpush3.bf16.msra.mxu1 %v7620_v28  ;;  %7038 = vmatprep.mubr.msk.bf16.mxu1 %vm7815_vm0, %v7814_v0  ;;  %v4701_v28 = vmul.f32 %v7805_v12, %v9256_v27 }
0x23eb   :  { %7024 = vmatprep.subr.bf16.mxu1 %v7814_v0 }
0x23ee   :  { %7025 = vmatpush3.bf16.msra.mxu1 %v7621_v23 }
0x23ef   :  { %7026 = vmatprep.subr.bf16.mxu1 %v7814_v0 }
0x23f2   :  { %7027 = vmatpush3.bf16.msra.mxu1 %v7622_v30  ;;  %v7807_v30 = vld [vmem:[%s9574_s4 + $0x50] sm:$0xff] }
0x23f3   :  { %7028 = vmatprep.subr.bf16.mxu1 %v7814_v0 }
0x23f6   :  { %7029 = vmatpush3.bf16.msra.mxu1 %v7623_v54 }
0x23f7   :  { %7030 = vmatprep.subr.bf16.mxu1 %v7814_v0 }
0x23fa   :  { %7031 = vmatpush3.bf16.msra.mxu1 %v7624_v56  ;;  %v7808_v56 = vld [vmem:[%s9574_s4 + $0x58] sm:$0xff] }
0x23fb   :  { %7032 = vmatprep.subr.bf16.mxu1 %v7814_v0 }
0x23fe   :  { %7033 = vmatpush3.bf16.msra.mxu1 %v7625_v57 }
0x23ff   :  { %7034 = vmatprep.subr.bf16.mxu1 %v7814_v0 }
0x2402   :  { %7035 = vmatpush3.bf16.msra.mxu1 %v7626_v40  ;;  %v4713_v40 = vpack.c.bf16 %v4702_v36, %v4701_v28  ;;  %v7643_v28 = vld [vmem:[%s9576_s24 + $0xd0] ss:$8 sps:$4 sm:$0xff]   ;;  %v7648_v36 = vld [vmem:[%s9576_s24 + $0xe4] ss:$8 sps:$4 sm:$0xff]  }
0x2403   :  { %7036 = vmatprep.subr.bf16.mxu1 %v7814_v0 }
0x2406   :  { %7037 = vmatpush3.bf16.msra.mxu1 %v7627_v59  ;;  %v4703_v59 = vmul.f32 %v7807_v30, %v9256_v27 }
0x2407   :  { %7443 = vmatprep.subr.bf16.mxu1 %v8533_v2 }
0x2409   :  { %7039 = vmatmul.mubr.bf16.vlgmr.msra.gmra.mrb[64].mxu1 %v8798_v18 }
0x240a   :  { %7445 = vmatpush3.bf16.msra.mxu1 %v8533_v2 }
0x240b   :  { %7447 = vmatprep.subr.bf16.mxu1 %v8538_v35 }
0x240e   :  { %7449 = vmatpush3.bf16.msra.mxu1 %v8538_v35 }
0x240f   :  { %7451 = vmatprep.subr.bf16.mxu1 %v8549_v7 }
0x2412   :  { %7453 = vmatpush3.bf16.msra.mxu1 %v8549_v7 }
0x2413   :  { %7455 = vmatprep.subr.bf16.mxu1 %v8559_v10 }
0x2416   :  { %7457 = vmatpush3.bf16.msra.mxu1 %v8559_v10 }
0x2417   :  { %7459 = vmatprep.subr.bf16.mxu1 %v8569_v16 }
0x241a   :  { %7461 = vmatpush3.bf16.msra.mxu1 %v8569_v16 }
0x241b   :  { %7463 = vmatprep.subr.bf16.mxu1 %v8580_v19 }
0x241e   :  { %7465 = vmatpush3.bf16.msra.mxu1 %v8580_v19 }
0x241f   :  { %7467 = vmatprep.subr.bf16.mxu1 %v8687_v55 }
0x2422   :  { %7469 = vmatpush3.bf16.msra.mxu1 %v8687_v55 }
0x2423   :  { %7471 = vmatprep.subr.bf16.mxu1 %v8699_v58 }
0x2426   :  { %7473 = vmatpush3.bf16.msra.mxu1 %v8699_v58 }
0x2427   :  { %7112 = vmatprep.subr.bf16.mxu1 %v7814_v0 }
0x24bc   :  { %v9312_v18 = vpop.f32.mrb[60].mxu1 }
0x24bd   :  { %v7021_v52 = vpop.f32.mrb[61].mxu1  ;;  %v4994_v62 = vmul.f32 %v7797_v48, %v9312_v18  ;;  %v4995_v63 = vmul.f32 %v7798_v60, %v9312_v18  ;;  %v4996_v4 = vmul.f32 %v7799_v3, %v9312_v18  ;;  %v4997_v9 = vmul.f32 %v7800_v8, %v9312_v18  ;;  %v7809_v60 = vld [vmem:[%s9574_s4 + $0x60] sm:$0xff] }
0x24be   :  { %v4998_v31 = vmul.f32 %v7801_v6, %v9312_v18  ;;  %v4999_v37 = vmul.f32 %v7802_v15, %v9312_v18  ;;  %v5000_v25 = vmul.f32 %v7803_v42, %v9312_v18  ;;  %v5001_v44 = vmul.f32 %v7804_v43, %v9312_v18  ;;  %v7810_v52 = vld [vmem:[%s9574_s4 + $0x68] sm:$0xff]  ;;  %v7631_v42 = vld [vmem:[%s9576_s24 + $0x90] ss:$8 sps:$4 sm:$0xff]  }
0x24bf   :  { %v5010_v11 = vpack.c.bf16 %v4995_v63, %v4994_v62  ;;  %v5011_v24 = vpack.c.bf16 %v4997_v9, %v4996_v4  ;;  %v5002_v46 = vmul.f32 %v7805_v12, %v9312_v18  ;;  %v5003_v47 = vmul.f32 %v7806_v39, %v9312_v18  ;;  %v7811_v9 = vld [vmem:[%s9574_s4 + $0x70] sm:$0xff]  ;;  %v7642_v39 = vld [vmem:[%s9576_s24 + $0xc4] ss:$8 sps:$4 sm:$0xff]  }
0x24c0   :  { %v5012_v41 = vpack.c.bf16 %v4999_v37, %v4998_v31  ;;  %v5013_v17 = vpack.c.bf16 %v5001_v44, %v5000_v25  ;;  %v5004_v54 = vmul.f32 %v7807_v30, %v9312_v18  ;;  %v5005_v57 = vmul.f32 %v7808_v56, %v9312_v18  ;;  %v7634_v25 = vld [vmem:[%s9576_s24 + $0xa0] ss:$8 sps:$4 sm:$0xff]   ;;  %v7639_v12 = vld [vmem:[%s9576_s24 + $0xb4] ss:$8 sps:$4 sm:$0xff]  }
0x24c1   :  { %5019 = vmatprep.subr.bf16.mxu0 %v5010_v11  ;;  %v5014_v23 = vpack.c.bf16 %v5003_v47, %v5002_v46  ;;  %v4704_v48 = vmul.f32 %v7808_v56, %v9256_v27  ;;  %v5006_v61 = vmul.f32 %v7809_v60, %v9312_v18  ;;  %v5007_v62 = vmul.f32 %v7810_v52, %v9312_v18  ;;  %v7637_v46 = vld [vmem:[%s9576_s24 + $0xb0] ss:$8 sps:$4 sm:$0xff]   ;;  %v7640_v47 = vld [vmem:[%s9576_s24 + $0xc0] ss:$8 sps:$4 sm:$0xff]   ;;  %v7651_v30 = vld [vmem:[%s9576_s24 + $0xf4] ss:$8 sps:$4 sm:$0xff]  }
0x24c2   :  { %5020 = vmatpush1.bf16.msra.mxu0 %v4709_v14  ;;  %v5015_v50 = vpack.c.bf16 %v5005_v57, %v5004_v54  ;;  %v4705_v3 = vmul.f32 %v7809_v60, %v9256_v27  ;;  %v4706_v4 = vmul.f32 %v7810_v52, %v9256_v27  ;;  %v5008_v11 = vmul.f32 %v7811_v9, %v9312_v18  ;;  %v7812_v14 = vld [vmem:[%s9574_s4 + $0x78] sm:$0xff]  ;;  %v5505_v56 = vld [vmem:[%s9631_s29] sm:$0xff]  ;;  %v5506_v57 = vld [vmem:[%s9631_s29 + $0x8] sm:$0xff] }
0x24c3   :  { %5021 = vmatprep.subr.bf16.mxu0 %v5011_v24  ;;  %v4714_v63 = vpack.c.bf16 %v4704_v48, %v4703_v59  ;;  %v5016_v8 = vpack.c.bf16 %v5007_v62, %v5006_v61  ;;  %v5009_v20 = vmul.f32 %v7812_v14, %v9312_v18  ;;  %v4707_v24 = vmul.f32 %v7811_v9, %v9256_v27  ;;  %v7649_v54 = vld [vmem:[%s9576_s24 + $0xf0] ss:$8 sps:$4 sm:$0xff]   ;;  %v5509_v60 = vld [vmem:[%s9631_s29 + $0x20] sm:$0xff]  ;;  %v5510_v61 = vld [vmem:[%s9631_s29 + $0x28] sm:$0xff] }
0x24c4   :  { %v4715_v21 = vpack.c.bf16 %v4706_v4, %v4705_v3  ;;  %v4708_v6 = vmul.f32 %v7812_v14, %v9256_v27  ;;  %v5522_v59 = vpack.c.bf16 %v5506_v57, %v5505_v56  ;;  %v5508_v48 = vld [vmem:[%s9631_s29 + $0x18] sm:$0xff]  ;;  %v5524_v52 = vpack.c.bf16 %v5510_v61, %v5509_v60  ;;  %v5511_v62 = vld [vmem:[%s9631_s29 + $0x30] sm:$0xff]  ;;  %v5513_v4 = vld [vmem:[%s9631_s29 + $0x40] sm:$0xff] }
0x24c5   :  { %v5017_v31 = vpack.c.bf16 %v5009_v20, %v5008_v11  ;;  %v5515_v11 = vld [vmem:[%s9631_s29 + $0x50] sm:$0xff]  ;;  %v5516_v14 = vld [vmem:[%s9631_s29 + $0x58] sm:$0xff] }
0x24c6   :  { %5022 = vmatpush1.bf16.msra.mxu0 %v4710_v53  ;;  %v4716_v37 = vpack.c.bf16 %v4708_v6, %v4707_v24  ;;  %v5527_v20 = vpack.c.bf16 %v5516_v14, %v5515_v11 }
0x24c7   :  { %5023 = vmatprep.subr.bf16.mxu0 %v5012_v41  ;;  %v7633_v41 = vld [vmem:[%s9576_s24 + $0x94] ss:$8 sps:$4 sm:$0xff]  }
0x24ca   :  { %5024 = vmatpush1.bf16.msra.mxu0 %v4711_v45 }
0x24cb   :  { %5025 = vmatprep.subr.bf16.mxu0 %v5013_v17 }
0x24ce   :  { %5026 = vmatpush1.bf16.msra.mxu0 %v4712_v49  ;;  %v7645_v49 = vld [vmem:[%s9576_s24 + $0xd4] ss:$8 sps:$4 sm:$0xff]  }
0x24cf   :  { %5027 = vmatprep.subr.bf16.mxu0 %v5014_v23  ;;  %v7646_v23 = vld [vmem:[%s9576_s24 + $0xe0] ss:$8 sps:$4 sm:$0xff]  }
0x24d2   :  { %5028 = vmatpush1.bf16.msra.mxu0 %v4713_v40  ;;  %v5507_v40 = vld [vmem:[%s9631_s29 + $0x10] sm:$0xff] }
0x24d3   :  { %5029 = vmatprep.subr.bf16.mxu0 %v5015_v50  ;;  %v5523_v50 = vpack.c.bf16 %v5508_v48, %v5507_v40 }
0x24d6   :  { %5030 = vmatpush1.bf16.msra.mxu0 %v4714_v63  ;;  %v5512_v63 = vld [vmem:[%s9631_s29 + $0x38] sm:$0xff] }
0x24d7   :  { %5031 = vmatprep.subr.bf16.mxu0 %v5016_v8  ;;  %v5525_v3 = vpack.c.bf16 %v5512_v63, %v5511_v62  ;;  %v5514_v8 = vld [vmem:[%s9631_s29 + $0x48] sm:$0xff] }
0x24d8   :  { %v5526_v9 = vpack.c.bf16 %v5514_v8, %v5513_v4 }
0x24da   :  { %5032 = vmatpush1.bf16.msra.mxu0 %v4715_v21 }
0x24db   :  { %5033 = vmatprep.subr.bf16.mxu0 %v5017_v31 }
0x24dc   :  { %v5167_v15 = vpop.f32.mrb[64].mxu1 }
0x24dd   :  { %v7040_v53 = vpop.f32.mrb[65].mxu1 }
0x24de   :  { %v5170_v32 = vpop.f32.mrb[66].mxu1  ;;  %5034 = vmatpush1.bf16.msra.mxu0 %v4716_v37  ;;  %v5964_v37 = vld [vmem:[%s9577_s22 + $0x1] ss:$0 sm:$0xff] }
0x24df   :  { %v7041_v22 = vpop.f32.mrb[67].mxu1  ;;  %7411 = vmatprep.subr.bf16.mxu0 %v8533_v2 }
0x24e1   :  { %5052 = vmatmul.mubr.bf16.vlgmr.msra.gmra.mrb[96].mxu0 %v5018_v33 }
0x24e2   :  { %7413 = vmatpush3.bf16.msra.mxu0 %v8533_v2  ;;  %v5954_v2 = vld [vmem:[%s9575_s21 + $0x1] ss:$0 sm:$0xff] }
0x24e3   :  { %7415 = vmatprep.subr.bf16.mxu0 %v8538_v35  ;;  %v5171_v26 = vadd.f32 %v5954_v2, %v5170_v32 }
0x24e6   :  { %7417 = vmatpush3.bf16.msra.mxu0 %v8538_v35  ;;  %v5168_v35 = vadd.f32 %v5954_v2, %v5167_v15  ;;  %v5966_v2 = vld [vmem:[%s9578_s23 + $0x1] ss:$0 sm:$0xff] }
0x24e7   :  { %7419 = vmatprep.subr.bf16.mxu0 %v8549_v7 }
0x24ea   :  { %7421 = vmatpush3.bf16.msra.mxu0 %v8549_v7 }
0x24eb   :  { %7423 = vmatprep.subr.bf16.mxu0 %v8559_v10 }
0x24ee   :  { %7425 = vmatpush3.bf16.msra.mxu0 %v8559_v10 }
0x24ef   :  { %7427 = vmatprep.subr.bf16.mxu0 %v8569_v16 }
0x24f2   :  { %7429 = vmatpush3.bf16.msra.mxu0 %v8569_v16 }
0x24f3   :  { %7431 = vmatprep.subr.bf16.mxu0 %v8580_v19 }
0x24f6   :  { %7433 = vmatpush3.bf16.msra.mxu0 %v8580_v19 }
0x24f7   :  { %7435 = vmatprep.subr.bf16.mxu0 %v8687_v55 }
0x24fa   :  { %7437 = vmatpush3.bf16.msra.mxu0 %v8687_v55  ;;  %v7628_v55 = vld [vmem:[%s9576_s24 + $0x80] ss:$8 sps:$4 sm:$0xff]  }
0x24fb   :  { %7439 = vmatprep.subr.bf16.mxu0 %v8699_v58 }
0x24fe   :  { %7441 = vmatpush3.bf16.msra.mxu0 %v8699_v58  ;;  %v7630_v58 = vld [vmem:[%s9576_s24 + $0x84] ss:$8 sps:$4 sm:$0xff]  }
0x24ff   :  { %5462 = vmatprep.subr.bf16.mxu0 %v7630_v58  ;;  %v2688_v58 = vsub.s32 1, %v8193_v51 }
0x25b4   :  { %v5053_v7 = vpop.f32.mrb[96].mxu0 }
0x25b5   :  { %v5174_v10 = vadd.f32 %v5168_v35, %v5053_v7  ;;  %v5055_v16 = vpop.f32.mrb[97].mxu0 }
0x25b6   :  { %v5056_v29 = vpop.f32.mrb[98].mxu0 }
0x25b7   :  { %v5176_v33 = vmax.f32 %v5174_v10, 0.0  ;;  %v5057_v19 = vpop.f32.mrb[99].mxu0  ;;  %v5517_v29 = vld [vmem:[%s9631_s29 + $0x60] sm:$0xff] }
0x25b8   :  { %v5175_v27 = vadd.f32 %v5171_v26, %v5057_v19 }
0x25b9   :  { %7074 = vmatprep.mubr.f32.mxu0 %v5176_v33 }
0x25ba   :  { %v5177_v18 = vmax.f32 %v5175_v27, 0.0  ;;  %v5519_v27 = vld [vmem:[%s9631_s29 + $0x70] sm:$0xff] }
0x25bc   :  { %7075 = vmatmul.mubr.f32.vlgmr.msra.gmra.mrb[94].mxu0 %v5177_v18 }
0x25bd   :  { %5494 = vmatprep.mubr.bf16.mxu0 %v7818_v38  ;;  %5463 = vmatpush1.bf16.msra.mxu0 %v7628_v55  ;;  %v7636_v38 = vld [vmem:[%s9576_s24 + $0xa4] ss:$8 sps:$4 sm:$0xff]  }
0x25be   :  { %5464 = vmatprep.subr.bf16.mxu0 %v7633_v41  ;;  %v5983_v41 = vld [vmem:[%s9579_s25 + $0x2] sm:$0x3] }
0x25c1   :  { %5465 = vmatpush1.bf16.msra.mxu0 %v7631_v42  ;;  %v7813_v42 = vld [vmem:[%s9579_s25] sm:$0x3] }
0x25c2   :  { %5466 = vmatprep.subr.bf16.mxu0 %v7636_v38  ;;  %v2689_v38 = vrot.slane %v7813_v42, %v2688_v58 }
0x25c5   :  { %5467 = vmatpush1.bf16.msra.mxu0 %v7634_v25  ;;  %v5380_v25 = vrot.slane %v5983_v41, %v2688_v58 }
0x25c6   :  { %5468 = vmatprep.subr.bf16.mxu0 %v7639_v12 }
0x25c9   :  { %5469 = vmatpush1.bf16.msra.mxu0 %v7637_v46 }
0x25ca   :  { %5470 = vmatprep.subr.bf16.mxu0 %v7642_v39 }
0x25cd   :  { %5471 = vmatpush1.bf16.msra.mxu0 %v7640_v47  ;;  %v6000_v47 = vld [vmem:[%s9632_s9] ss:$0 sm:$0xff] }
0x25ce   :  { %5472 = vmatprep.subr.bf16.mxu0 %v7645_v49 }
0x25d1   :  { %5473 = vmatpush1.bf16.msra.mxu0 %v7643_v28 }
0x25d2   :  { %5474 = vmatprep.subr.bf16.mxu0 %v7648_v36 }
0x25d5   :  { %5475 = vmatpush1.bf16.msra.mxu0 %v7646_v23 }
0x25d6   :  { %5476 = vmatprep.subr.bf16.mxu0 %v7651_v30 }
0x25d9   :  { %5477 = vmatpush1.bf16.msra.mxu0 %v7649_v54 }
0x268f   :  { %v7076_v43 = vpop.f32.mrb[94].mxu0 }
0x2690   :  { %v9435_v44 = vsub.f32 %v5177_v18, %v7076_v43  ;;  %v5244_v45 = vpop.f32.mrb[95].mxu0  ;;  %v5520_v18 = vld [vmem:[%s9631_s29 + $0x78] sm:$0xff] }
0x2691   :  { %v9437_v13 = vsub.f32 %v5176_v33, %v5244_v45  ;;  %v5518_v33 = vld [vmem:[%s9631_s29 + $0x68] sm:$0xff]  ;;  %v5529_v55 = vpack.c.bf16 %v5520_v18, %v5519_v27  ;;  %v2809_v45 = vadd.f32 %v8785_v1, %v2689_v38 }
0x2692   :  { %v5256_v17 = vmul.f32 %v9435_v44, %v9435_v44  ;;  %v5528_v19 = vpack.c.bf16 %v5518_v33, %v5517_v29 }
0x2693   :  { %v5255_v34 = vmul.f32 %v9437_v13, %v9437_v13 }
0x2695   :  { %7109 = vmatprep.mubr.f32.mxu1 %v5255_v34 }
0x2696   :  { %7110 = vmatmul.mubr.f32.vlgmr.msra.gmra.mrb[62].mxu1 %v5256_v17  ;;  %v2813_v17 = vadd.f32 %v8787_v5, %v2689_v38 }
0x2697   :  { %7128 = vmatprep.mubr.msk.bf16.mxu1 %vm7815_vm0, %v7814_v0  ;;  %7113 = vmatpush3.bf16.msra.mxu1 %v5522_v59  ;;  %vm5578_vm0 = vcmask 31744  }
0x2698   :  { %7114 = vmatprep.subr.bf16.mxu1 %v7814_v0 }
0x269b   :  { %7115 = vmatpush3.bf16.msra.mxu1 %v5523_v50 }
0x269c   :  { %7116 = vmatprep.subr.bf16.mxu1 %v7814_v0 }
0x269f   :  { %7117 = vmatpush3.bf16.msra.mxu1 %v5524_v52 }
0x26a0   :  { %7118 = vmatprep.subr.bf16.mxu1 %v7814_v0 }
0x26a3   :  { %7119 = vmatpush3.bf16.msra.mxu1 %v5525_v3 }
0x26a4   :  { %7120 = vmatprep.subr.bf16.mxu1 %v7814_v0 }
0x26a7   :  { %7121 = vmatpush3.bf16.msra.mxu1 %v5526_v9 }
0x26a8   :  { %7122 = vmatprep.subr.bf16.mxu1 %v7814_v0 }
0x26ab   :  { %7123 = vmatpush3.bf16.msra.mxu1 %v5527_v20 }
0x26ac   :  { %7124 = vmatprep.subr.bf16.mxu1 %v7814_v0 }
0x26af   :  { %7125 = vmatpush3.bf16.msra.mxu1 %v5528_v19 }
0x26b0   :  { %7126 = vmatprep.subr.bf16.mxu1 %v7814_v0 }
0x26b3   :  { %7127 = vmatpush3.bf16.msra.mxu1 %v5529_v55 }
0x2769   :  { %v7111_v21 = vpop.f32.mrb[62].mxu1 }
0x276a   :  { %v5329_v24 = vadd.f32 1e-05, %v7111_v21  ;;  %v5323_v6 = vpop.f32.mrb[63].mxu1 }
0x276b   :  { %v5324_v31 = vadd.f32 1e-05, %v5323_v6 }
0x276c   :  { %7788 = vrsqrt.f32 %v5329_v24 }
0x276d   :  { %7790 = vrsqrt.f32 %v5324_v31 }
0x2776   :  { %v7789_v15 = vpop.eup %7788 }
0x2777   :  { %v7791_v53 = vpop.eup %7790  ;;  %v5335_v32 = vmul.f32 %v7789_v15, %v9435_v44 }
0x2778   :  { %v5334_v22 = vmul.f32 %v7791_v53, %v9437_v13 }
0x2779   :  { %v5345_v35 = vmul.f32 %v5964_v37, %v5335_v32 }
0x277a   :  { %v5344_v7 = vmul.f32 %v5964_v37, %v5334_v22 }
0x277b   :  { %v5355_v10 = vadd.f32 %v5966_v2, %v5345_v35 }
0x277c   :  { %v5354_v16 = vadd.f32 %v5966_v2, %v5344_v7 }
0x277e   :  { %v5373_v26 = vpack.c.bf16 %v5355_v10, %v5354_v16 }
0x2780   :  { %5495 = vmatmul.mubr.bf16.vlgmr.msra.gmra.mrb[100].mxu0 %v5373_v26 }
0x2853   :  { %v5496_v43 = vpop.f32.mrb[100].mxu0 }
0x2854   :  { %v5497_v44 = vpop.f32.mrb[101].mxu0 }
0x2855   :  { %v5498_v13 = vadd.f32 %v5497_v44, %v5380_v25  ;;  %v5499_v0 = vpop.f32.mrb[102].mxu0 }
0x2856   :  { %v5500_v34 = vpop.f32.mrb[103].mxu0 }
0x2857   :  { %v5503_v51 = vadd.f32 %v5498_v13, %v2809_v45  ;;  %v5501_v12 = vadd.f32 %v5500_v34, %v5380_v25 }
0x2859   :  { %v5504_v46 = vadd.f32 %v5501_v12, %v2813_v17 }
0x285b   :  { %v5521_v39 = vpack.c.bf16 %v5504_v46, %v5503_v51 }
0x285d   :  { %7129 = vmatmul.mubr.bf16.vlgmr.msra.gmra.mrb[68].mxu1 %v5521_v39 }
0x2930   :  { %v5571_v49 = vpop.f32.mrb[68].mxu1 }
0x2931   :  { %v5572_v28 = vadd.f32 %v6000_v47, %v5571_v49  ;;  %v7130_v36 = vpop.f32.mrb[69].mxu1 }
0x2932   :  { %v5574_v23 = vpop.f32.mrb[70].mxu1 }
0x2933   :  { %5579 = vst.msk [vmem:[%s9633_s13] sm:$0xff] %vm5578_vm0, %v5572_v28  ;;  %v5575_v1 = vadd.f32 %v6000_v47, %v5574_v23  ;;  %v7131_v5 = vpop.f32.mrb[71].mxu1 }
0x2935   :  { %5580 = vst.msk [vmem:[%s9633_s13 + $0x8] sm:$0xff] %vm5578_vm0, %v5575_v1 }

</bundles_post_ra>
